<compile_context>
chip_gen: v7x
topology: tpu7x:2x2x1
jax: 0.10.0
libtpu: 0.0.40
codegen_flags: <defaults>
</compile_context>

<pallas_src>
import functools

import jax
import jax.numpy as jnp
from jax.experimental import pallas as pl
from jax.experimental.pallas import tpu as pltpu


# ----------------------------------------------------------------------------
# Device / budget helpers (host-side, best-effort with safe fallbacks)
# ----------------------------------------------------------------------------

def _device_kind():
    try:
        return jax.devices()[0].device_kind.lower()
    except Exception:
        return ""


def _vmem_capacity_bytes():
    """Physical per-TensorCore VMEM, best effort."""
    try:
        info = pltpu.get_tpu_info()
        cap = int(getattr(info, "vmem_capacity_bytes", 0) or 0)
        if (32 << 20) <= cap <= (256 << 20):
            return cap
    except Exception:
        pass
    kind = _device_kind()
    if "v5" in kind or "v6" in kind:
        return 128 << 20
    return 64 << 20          # conservative default (v7x: 64 MiB per TC)


def _vmem_budget_bytes():
    cap = _vmem_capacity_bytes()
    # Leave headroom for Mosaic internal scratch / spill.
    return max(32 << 20, min(cap - (16 << 20), int(cap * 0.85)))


def _use_bf16_activation():
    # v6e/v7x have bf16 VPU/EUP; v5e does not (bf16 would just add packing).
    return "v5" not in _device_kind()


def _target_rows():
    # v5e MXU saturates at M=128 (4x128^2); v6e/v7x prefer 256.
    return 128 if "v5" in _device_kind() else 256


def _min_grid_steps(n):
    # v7x has 2 TensorCores per chip: prefer >=2 grid steps so the
    # "parallel" axis can shard work across both.
    kind = _device_kind()
    return 2 if ("7" in kind and n >= 2) else 1


# ----------------------------------------------------------------------------
# Kernel
# ----------------------------------------------------------------------------

def _layer_norm(x, w, b, eps=1e-5):
    # PyTorch nn.LayerNorm: biased variance, eps inside rsqrt. fp32 math.
    mu = jnp.mean(x, axis=-1, keepdims=True)
    xc = x - mu
    var = jnp.mean(xc * xc, axis=-1, keepdims=True)
    return xc * jax.lax.rsqrt(var + eps) * w + b


def _resblock_kernel(n_head, hidden_chunk, bf16_act,
                     x_ref, ln1w, ln1b, wqkv, bqkv, wo, bo,
                     ln2w, ln2b, wfc, bfc, wproj, bproj,
                     o_ref):
    Bt, L, D = x_ref.shape
    H = n_head
    hd = D // H
    rows = Bt * L

    # Residual stream kept in fp32 throughout.
    x = x_ref[...].reshape(rows, D).astype(jnp.float32)          # (rows, D)

    # ---- x = x + MHA(ln_1(x)) ----
    xn = _layer_norm(x, ln1w[0], ln1b[0])
    # wqkv is pre-transposed (D, 3D) bf16; 1/sqrt(hd) already folded into Q.
    qkv = jnp.dot(xn.astype(jnp.bfloat16), wqkv[...],
                  preferred_element_type=jnp.float32) + bqkv[0]   # (rows, 3D)

    def to_heads(t):
        # (rows, D) -> (Bt*H, L, hd): head-batched layout for dot_general.
        # (Mosaic batched matmul needs a leading batch dim, so this relayout
        #  is inherent to the single fused qkv projection.)
        return (t.reshape(Bt, L, H, hd)
                 .transpose(0, 2, 1, 3)
                 .reshape(Bt * H, L, hd))

    q = to_heads(qkv[:, 0 * D:1 * D]).astype(jnp.bfloat16)
    k = to_heads(qkv[:, 1 * D:2 * D]).astype(jnp.bfloat16)
    v = to_heads(qkv[:, 2 * D:3 * D]).astype(jnp.bfloat16)

    # Batched S = Q K^T over (batch*head), fp32 accumulation.
    # TODO(synk): for L >= ~512 switch to a KV-tiled online softmax so the
    # (Bt*H, L, L) score matrix never materializes.
    s = jax.lax.dot_general(q, k, (((2,), (2,)), ((0,), (0,))),
                            preferred_element_type=jnp.float32)   # (Bt*H, L, L)
    s = s - jnp.max(s, axis=-1, keepdims=True)
    p = jnp.exp(s)
    p = p * pl.reciprocal(jnp.sum(p, axis=-1, keepdims=True), approx=True)

    # Batched P V.
    ctx = jax.lax.dot_general(p.astype(jnp.bfloat16), v,
                              (((2,), (1,)), ((0,), (0,))),
                              preferred_element_type=jnp.float32)  # (Bt*H, L, hd)
    ctx = (ctx.reshape(Bt, H, L, hd)
              .transpose(0, 2, 1, 3)
              .reshape(rows, D))

    attn_out = jnp.dot(ctx.astype(jnp.bfloat16), wo[...],
                       preferred_element_type=jnp.float32) + bo[0]
    x1 = x + attn_out

    # ---- x = x + MLP(ln_2(x)) ----
    # Hidden dimension processed in chunks: never materialize the full
    # (rows, 4D) fp32 hidden tensor; accumulate c_proj contributions.
    xn2 = _layer_norm(x1, ln2w[0], ln2b[0]).astype(jnp.bfloat16)
    dh = 4 * D
    y = jnp.zeros((rows, D), jnp.float32)
    for c0 in range(0, dh, hidden_chunk):
        c1 = min(c0 + hidden_chunk, dh)
        h = jnp.dot(xn2, wfc[:, c0:c1],
                    preferred_element_type=jnp.float32) + bfc[0, c0:c1]
        if bf16_act:
            hb = h.astype(jnp.bfloat16)
            act = hb * jax.nn.sigmoid(1.702 * hb)       # QuickGELU (bf16 VPU/EUP)
        else:
            act = (h * jax.nn.sigmoid(1.702 * h)).astype(jnp.bfloat16)
        y = y + jnp.dot(act, wproj[c0:c1, :],
                        preferred_element_type=jnp.float32)
    y = y + bproj[0]

    o_ref[...] = (x1 + y).reshape(Bt, L, D).astype(o_ref.dtype)


# ----------------------------------------------------------------------------
# Tiling / spec selection
# ----------------------------------------------------------------------------

def _pick_hidden_chunk(dh):
    """Chunk width for the MLP hidden dim: <=512, divides 4*D, 128-aligned
    when possible."""
    if dh <= 512:
        return dh
    best = None
    for c in range(512, 0, -1):
        if dh % c == 0:
            if c % 128 == 0:
                return c
            if best is None:
                best = c
    return best or dh


def _est_step_bytes(bt, L, D, H, hchunk):
    """Rough per-grid-step activation VMEM footprint (bytes)."""
    rows = bt * L
    f32, bf16 = 4, 2
    b = 4 * rows * D * f32                     # x in + out blocks (2x buffered)
    b += rows * 3 * D * (f32 + bf16)           # qkv fp32 + q/k/v bf16
    b += bt * H * L * L * (2 * f32 + bf16)     # scores, probs, probs(bf16)
    b += 4 * rows * D * f32                    # ctx / attn_out / x1 / xn2
    b += 2 * rows * hchunk * f32               # MLP hidden chunk + activation
    b += rows * D * f32                        # MLP accumulator
    return int(b * 1.25)                       # relayout-temporary fudge


def _pick_batch_tile(N, L, D, H, hchunk, budget, weight_bytes):
    avail = budget - int(1.5 * weight_bytes)
    divisors = [c for c in range(1, N + 1) if N % c == 0]
    fits = [c for c in divisors if _est_step_bytes(c, L, D, H, hchunk) <= avail]
    if not fits:
        return 1
    cand = [c for c in fits if N // c >= _min_grid_steps(N)] or fits
    target = _target_rows()
    reach = [c for c in cand if c * L >= target]
    return min(reach) if reach else max(cand)


_SPEC_MODE = {"mode": None}   # cache: "single" (Buffered(1)) or "double"


def _weight_specs(params, mode):
    specs = []
    for p in params:
        idx = (lambda b, _nd=p.ndim: (0,) * _nd)     # constant -> DMA'd once
        if mode == "single":
            specs.append(pl.BlockSpec(p.shape, idx,
                                      pipeline_mode=pl.Buffered(1)))
        else:
            specs.append(pl.BlockSpec(p.shape, idx))
    return specs


# ----------------------------------------------------------------------------
# Wrapper
# ----------------------------------------------------------------------------

def resblock_apply(x_nld, params, n_head):
    """One ResidualAttentionBlock on x of shape (N, L, D)."""
    N, L, D = x_nld.shape
    budget = _vmem_budget_bytes()
    weight_bytes = sum(int(p.size) * p.dtype.itemsize for p in params)
    # TODO(synk): for very large D on v7x the MLP weights themselves should be
    # streamed (inner pipeline over the hidden dim) rather than held resident.
    hchunk = _pick_hidden_chunk(4 * D)
    b_tile = _pick_batch_tile(N, L, D, n_head, hchunk, budget, weight_bytes)

    kernel = functools.partial(_resblock_kernel, n_head, hchunk,
                               _use_bf16_activation())
    x_spec = pl.BlockSpec((b_tile, L, D), lambda b: (b, 0, 0))
    out_spec = pl.BlockSpec((b_tile, L, D), lambda b: (b, 0, 0))
    out_shape = jax.ShapeDtypeStruct((N, L, D), x_nld.dtype)
    cparams = pltpu.CompilerParams(
        dimension_semantics=("parallel",),
        vmem_limit_bytes=budget)

    mode_order = ([_SPEC_MODE["mode"]] if _SPEC_MODE["mode"] is not None
                  else ["single", "double"])
    last_err = None
    for mode in mode_order:
        try:
            in_specs = [x_spec] + _weight_specs(params, mode)
            out = pl.pallas_call(
                kernel,
                out_shape=out_shape,
                grid=(N // b_tile,),
                in_specs=in_specs,
                out_specs=out_spec,
                compiler_params=cparams,
            )(x_nld, *params)
            if _SPEC_MODE["mode"] is None:
                out = jax.block_until_ready(out)   # surface errors pre-cache
                _SPEC_MODE["mode"] = mode
            return out
        except Exception as err:   # fall back to proven double-buffered specs
            last_err = err
    raise last_err


def init_block_params(key, d, n_head):
    """Deterministic synthetic parameters for one ResidualAttentionBlock.

    Weights are stored pre-transposed as (in_dim, out_dim) and cast to bf16 on
    the host; the 1/sqrt(head_dim) attention scale is folded into the Q
    projection columns.  Biases / LN params stay fp32.
    """
    ks = jax.random.split(key, 8)
    s = 0.02
    hd = d // n_head
    scale = 1.0 / (hd ** 0.5)

    ln1w = jnp.ones((1, d), jnp.float32)
    ln1b = jnp.zeros((1, d), jnp.float32)

    wqkv = jax.random.normal(ks[0], (d, 3 * d), jnp.float32) * s   # (in, out)
    bqkv = jax.random.normal(ks[1], (1, 3 * d), jnp.float32) * s
    qscale = jnp.concatenate([jnp.full((d,), scale, jnp.float32),
                              jnp.ones((2 * d,), jnp.float32)])
    wqkv = wqkv * qscale[None, :]
    bqkv = bqkv * qscale[None, :]

    wo = jax.random.normal(ks[2], (d, d), jnp.float32) * s         # (in, out)
    bo = jax.random.normal(ks[3], (1, d), jnp.float32) * s

    ln2w = jnp.ones((1, d), jnp.float32)
    ln2b = jnp.zeros((1, d), jnp.float32)

    wfc = jax.random.normal(ks[4], (d, 4 * d), jnp.float32) * s    # (in, out)
    bfc = jax.random.normal(ks[5], (1, 4 * d), jnp.float32) * s
    wproj = jax.random.normal(ks[6], (4 * d, d), jnp.float32) * s  # (in, out)
    bproj = jax.random.normal(ks[7], (1, d), jnp.float32) * s

    return (ln1w, ln1b,
            wqkv.astype(jnp.bfloat16), bqkv,
            wo.astype(jnp.bfloat16), bo,
            ln2w, ln2b,
            wfc.astype(jnp.bfloat16), bfc,
            wproj.astype(jnp.bfloat16), bproj)


def transformer_forward(x_lnd, layer_params, n_head):
    """Equivalent of Transformer.forward(x) with attn_mask=None, register=None.

    x_lnd: (L, N, D) float32, matching the PyTorch (seq, batch, width) layout.
    """
    # TODO(synk): key_padding_mask (attn_mask) and the mid-stack Register
    # branch are not implemented; this reproduces the default (None) path.
    # TODO(synk): cross-layer weight prefetch (cross-pallas_call DMA futures)
    # would hide each layer's weight HBM->VMEM copy behind the previous
    # layer's compute.
    x = jnp.transpose(x_lnd, (1, 0, 2))       # -> (N, L, D) for the kernel
    for params in layer_params:
        x = resblock_apply(x, params, n_head)
    return jnp.transpose(x, (1, 0, 2))        # -> (L, N, D)


# ----------------------------------------------------------------------------
# Main
# ----------------------------------------------------------------------------

if __name__ == "__main__":
    width = 32      # d_model
    layers = 2
    heads = 4
    seq = 8         # L
    batch = 2       # N

    key = jax.random.PRNGKey(0)
    kx, kp = jax.random.split(key)
    x = jax.random.normal(kx, (seq, batch, width), jnp.float32)

    layer_keys = jax.random.split(kp, layers)
    layer_params = [init_block_params(k, width, heads) for k in layer_keys]

    out = transformer_forward(x, layer_params, heads)
    out = jax.block_until_ready(out)
    assert out.shape == (seq, batch, width)
    assert out.dtype == jnp.float32
    print("KERNEL_OK")
</pallas_src>

<mosaic_0001>
module attributes {stable_mosaic.version = 11 : i64} {
  func.func @_resblock_kernel(%arg0: i32, %arg1: memref<2x8x32xf32, #tpu.memory_space<vmem>>, %arg2: memref<1x32xf32, #tpu.memory_space<vmem>>, %arg3: memref<1x32xf32, #tpu.memory_space<vmem>>, %arg4: memref<32x96xbf16, #tpu.memory_space<vmem>>, %arg5: memref<1x96xf32, #tpu.memory_space<vmem>>, %arg6: memref<32x32xbf16, #tpu.memory_space<vmem>>, %arg7: memref<1x32xf32, #tpu.memory_space<vmem>>, %arg8: memref<1x32xf32, #tpu.memory_space<vmem>>, %arg9: memref<1x32xf32, #tpu.memory_space<vmem>>, %arg10: memref<32x128xbf16, #tpu.memory_space<vmem>>, %arg11: memref<1x128xf32, #tpu.memory_space<vmem>>, %arg12: memref<128x32xbf16, #tpu.memory_space<vmem>>, %arg13: memref<1x32xf32, #tpu.memory_space<vmem>>, %arg14: memref<2x8x32xf32, #tpu.memory_space<vmem>>) attributes {dimension_semantics = [#tpu.dimension_semantics<parallel>], iteration_bounds = array<i64: 1>, scalar_prefetch = 0 : i64, scratch_operands = 0 : i64, tpu.core_type = #tpu.core_type<tc>, window_params = [{transform_indices = @transform_0, window_bounds = array<i64: 2, 8, 32>}, {pipeline_mode = #tpu.pipeline_mode<synchronous>, transform_indices = @transform_1, window_bounds = array<i64: 1, 32>}, {pipeline_mode = #tpu.pipeline_mode<synchronous>, transform_indices = @transform_2, window_bounds = array<i64: 1, 32>}, {pipeline_mode = #tpu.pipeline_mode<synchronous>, transform_indices = @transform_3, window_bounds = array<i64: 32, 96>}, {pipeline_mode = #tpu.pipeline_mode<synchronous>, transform_indices = @transform_4, window_bounds = array<i64: 1, 96>}, {pipeline_mode = #tpu.pipeline_mode<synchronous>, transform_indices = @transform_5, window_bounds = array<i64: 32, 32>}, {pipeline_mode = #tpu.pipeline_mode<synchronous>, transform_indices = @transform_6, window_bounds = array<i64: 1, 32>}, {pipeline_mode = #tpu.pipeline_mode<synchronous>, transform_indices = @transform_7, window_bounds = array<i64: 1, 32>}, {pipeline_mode = #tpu.pipeline_mode<synchronous>, transform_indices = @transform_8, window_bounds = array<i64: 1, 32>}, {pipeline_mode = #tpu.pipeline_mode<synchronous>, transform_indices = @transform_9, window_bounds = array<i64: 32, 128>}, {pipeline_mode = #tpu.pipeline_mode<synchronous>, transform_indices = @transform_10, window_bounds = array<i64: 1, 128>}, {pipeline_mode = #tpu.pipeline_mode<synchronous>, transform_indices = @transform_11, window_bounds = array<i64: 128, 32>}, {pipeline_mode = #tpu.pipeline_mode<synchronous>, transform_indices = @transform_12, window_bounds = array<i64: 1, 32>}, {transform_indices = @transform_13, window_bounds = array<i64: 2, 8, 32>}]} {
    %c0 = arith.constant 0 : index
    %c0_0 = arith.constant 0 : index
    %c0_1 = arith.constant 0 : index
    %0 = vector.load %arg1[%c0, %c0_0, %c0_1] : memref<2x8x32xf32, #tpu.memory_space<vmem>>, vector<2x8x32xf32>
    %1 = vector.shape_cast %0 : vector<2x8x32xf32> to vector<16x32xf32>
    %c0_2 = arith.constant 0 : index
    %c0_3 = arith.constant 0 : index
    %2 = vector.load %arg2[%c0_2, %c0_3] : memref<1x32xf32, #tpu.memory_space<vmem>>, vector<1x32xf32>
    %3 = vector.shape_cast %2 : vector<1x32xf32> to vector<32xf32>
    %c0_4 = arith.constant 0 : index
    %c0_5 = arith.constant 0 : index
    %4 = vector.load %arg3[%c0_4, %c0_5] : memref<1x32xf32, #tpu.memory_space<vmem>>, vector<1x32xf32>
    %5 = vector.shape_cast %4 : vector<1x32xf32> to vector<32xf32>
    %cst = arith.constant dense<0.000000e+00> : vector<16xf32>
    %6 = vector.multi_reduction <add>, %1, %cst [1] : vector<16x32xf32> to vector<16xf32>
    %7 = vector.shape_cast %6 : vector<16xf32> to vector<16x1xf32>
    %cst_6 = arith.constant 3.200000e+01 : f32
    %8 = vector.broadcast %cst_6 : f32 to vector<16x1xf32>
    %9 = arith.divf %7, %8 : vector<16x1xf32>
    %10 = vector.broadcast %9 : vector<16x1xf32> to vector<16x32xf32>
    %11 = arith.subf %1, %10 : vector<16x32xf32>
    %12 = arith.mulf %11, %11 : vector<16x32xf32>
    %cst_7 = arith.constant dense<0.000000e+00> : vector<16xf32>
    %13 = vector.multi_reduction <add>, %12, %cst_7 [1] : vector<16x32xf32> to vector<16xf32>
    %14 = vector.shape_cast %13 : vector<16xf32> to vector<16x1xf32>
    %cst_8 = arith.constant 3.200000e+01 : f32
    %15 = vector.broadcast %cst_8 : f32 to vector<16x1xf32>
    %16 = arith.divf %14, %15 : vector<16x1xf32>
    %cst_9 = arith.constant 9.99999974E-6 : f32
    %17 = vector.broadcast %cst_9 : f32 to vector<16x1xf32>
    %18 = arith.addf %16, %17 : vector<16x1xf32>
    %19 = math.rsqrt %18 : vector<16x1xf32>
    %20 = vector.broadcast %19 : vector<16x1xf32> to vector<16x32xf32>
    %21 = arith.mulf %11, %20 : vector<16x32xf32>
    %22 = vector.shape_cast %3 : vector<32xf32> to vector<1x32xf32>
    %23 = vector.broadcast %22 : vector<1x32xf32> to vector<16x32xf32>
    %24 = arith.mulf %21, %23 : vector<16x32xf32>
    %25 = vector.shape_cast %5 : vector<32xf32> to vector<1x32xf32>
    %26 = vector.broadcast %25 : vector<1x32xf32> to vector<16x32xf32>
    %27 = arith.addf %24, %26 : vector<16x32xf32>
    %28 = arith.truncf %27 : vector<16x32xf32> to vector<16x32xbf16>
    %c0_10 = arith.constant 0 : index
    %c0_11 = arith.constant 0 : index
    %29 = vector.load %arg4[%c0_10, %c0_11] : memref<32x96xbf16, #tpu.memory_space<vmem>>, vector<32x96xbf16>
    %cst_12 = arith.constant dense<0.000000e+00> : vector<16x96xf32>
    %30 = tpu.matmul %28, %29, %cst_12 {dimension_numbers = #tpu.dot_dimension_numbers<[1], [0], [0], [1], [0, 0, 1, 1], [], []>} : vector<16x32xbf16>, vector<32x96xbf16>, vector<16x96xf32> -> vector<16x96xf32>
    %c0_13 = arith.constant 0 : index
    %c0_14 = arith.constant 0 : index
    %31 = vector.load %arg5[%c0_13, %c0_14] : memref<1x96xf32, #tpu.memory_space<vmem>>, vector<1x96xf32>
    %32 = vector.shape_cast %31 : vector<1x96xf32> to vector<96xf32>
    %33 = vector.shape_cast %32 : vector<96xf32> to vector<1x96xf32>
    %34 = vector.broadcast %33 : vector<1x96xf32> to vector<16x96xf32>
    %35 = arith.addf %30, %34 : vector<16x96xf32>
    %36 = vector.extract_strided_slice %35 {offsets = [0, 0], sizes = [16, 32], strides = [1, 1]} : vector<16x96xf32> to vector<16x32xf32>
    %37 = vector.shape_cast %36 : vector<16x32xf32> to vector<2x8x4x8xf32>
    %38 = tpu.transpose %37, [0, 2, 1, 3] : vector<2x8x4x8xf32> -> vector<2x4x8x8xf32>
    %39 = vector.shape_cast %38 : vector<2x4x8x8xf32> to vector<8x8x8xf32>
    %40 = arith.truncf %39 : vector<8x8x8xf32> to vector<8x8x8xbf16>
    %41 = vector.extract_strided_slice %35 {offsets = [0, 32], sizes = [16, 32], strides = [1, 1]} : vector<16x96xf32> to vector<16x32xf32>
    %42 = vector.shape_cast %41 : vector<16x32xf32> to vector<2x8x4x8xf32>
    %43 = tpu.transpose %42, [0, 2, 1, 3] : vector<2x8x4x8xf32> -> vector<2x4x8x8xf32>
    %44 = vector.shape_cast %43 : vector<2x4x8x8xf32> to vector<8x8x8xf32>
    %45 = arith.truncf %44 : vector<8x8x8xf32> to vector<8x8x8xbf16>
    %46 = vector.extract_strided_slice %35 {offsets = [0, 64], sizes = [16, 32], strides = [1, 1]} : vector<16x96xf32> to vector<16x32xf32>
    %47 = vector.shape_cast %46 : vector<16x32xf32> to vector<2x8x4x8xf32>
    %48 = tpu.transpose %47, [0, 2, 1, 3] : vector<2x8x4x8xf32> -> vector<2x4x8x8xf32>
    %49 = vector.shape_cast %48 : vector<2x4x8x8xf32> to vector<8x8x8xf32>
    %50 = arith.truncf %49 : vector<8x8x8xf32> to vector<8x8x8xbf16>
    %cst_15 = arith.constant dense<0.000000e+00> : vector<8x8x8xf32>
    %51 = tpu.matmul %40, %45, %cst_15 {dimension_numbers = #tpu.dot_dimension_numbers<[2], [2], [1], [1], [0, 0, 0, 1, 1, 1], [0], [0]>} : vector<8x8x8xbf16>, vector<8x8x8xbf16>, vector<8x8x8xf32> -> vector<8x8x8xf32>
    %cst_16 = arith.constant dense<0xFF800000> : vector<8x8xf32>
    %52 = vector.multi_reduction <maximumf>, %51, %cst_16 [2] : vector<8x8x8xf32> to vector<8x8xf32>
    %53 = vector.shape_cast %52 : vector<8x8xf32> to vector<8x8x1xf32>
    %54 = vector.broadcast %53 : vector<8x8x1xf32> to vector<8x8x8xf32>
    %55 = arith.subf %51, %54 : vector<8x8x8xf32>
    %56 = math.exp %55 : vector<8x8x8xf32>
    %cst_17 = arith.constant dense<0.000000e+00> : vector<8x8xf32>
    %57 = vector.multi_reduction <add>, %56, %cst_17 [2] : vector<8x8x8xf32> to vector<8x8xf32>
    %58 = vector.shape_cast %57 : vector<8x8xf32> to vector<8x8x1xf32>
    %59 = tpu.reciprocal %58 {approx = true} : vector<8x8x1xf32> -> vector<8x8x1xf32>
    %60 = vector.broadcast %59 : vector<8x8x1xf32> to vector<8x8x8xf32>
    %61 = arith.mulf %56, %60 : vector<8x8x8xf32>
    %62 = arith.truncf %61 : vector<8x8x8xf32> to vector<8x8x8xbf16>
    %cst_18 = arith.constant dense<0.000000e+00> : vector<8x8x8xf32>
    %63 = tpu.matmul %62, %50, %cst_18 {dimension_numbers = #tpu.dot_dimension_numbers<[2], [1], [1], [2], [0, 0, 0, 1, 1, 2], [0], [0]>} : vector<8x8x8xbf16>, vector<8x8x8xbf16>, vector<8x8x8xf32> -> vector<8x8x8xf32>
    %64 = vector.shape_cast %63 : vector<8x8x8xf32> to vector<2x4x8x8xf32>
    %65 = tpu.transpose %64, [0, 2, 1, 3] : vector<2x4x8x8xf32> -> vector<2x8x4x8xf32>
    %66 = vector.shape_cast %65 : vector<2x8x4x8xf32> to vector<16x32xf32>
    %67 = arith.truncf %66 : vector<16x32xf32> to vector<16x32xbf16>
    %c0_19 = arith.constant 0 : index
    %c0_20 = arith.constant 0 : index
    %68 = vector.load %arg6[%c0_19, %c0_20] : memref<32x32xbf16, #tpu.memory_space<vmem>>, vector<32x32xbf16>
    %cst_21 = arith.constant dense<0.000000e+00> : vector<16x32xf32>
    %69 = tpu.matmul %67, %68, %cst_21 {dimension_numbers = #tpu.dot_dimension_numbers<[1], [0], [0], [1], [0, 0, 1, 1], [], []>} : vector<16x32xbf16>, vector<32x32xbf16>, vector<16x32xf32> -> vector<16x32xf32>
    %c0_22 = arith.constant 0 : index
    %c0_23 = arith.constant 0 : index
    %70 = vector.load %arg7[%c0_22, %c0_23] : memref<1x32xf32, #tpu.memory_space<vmem>>, vector<1x32xf32>
    %71 = vector.shape_cast %70 : vector<1x32xf32> to vector<32xf32>
    %72 = vector.shape_cast %71 : vector<32xf32> to vector<1x32xf32>
    %73 = vector.broadcast %72 : vector<1x32xf32> to vector<16x32xf32>
    %74 = arith.addf %69, %73 : vector<16x32xf32>
    %75 = arith.addf %1, %74 : vector<16x32xf32>
    %c0_24 = arith.constant 0 : index
    %c0_25 = arith.constant 0 : index
    %76 = vector.load %arg8[%c0_24, %c0_25] : memref<1x32xf32, #tpu.memory_space<vmem>>, vector<1x32xf32>
    %77 = vector.shape_cast %76 : vector<1x32xf32> to vector<32xf32>
    %c0_26 = arith.constant 0 : index
    %c0_27 = arith.constant 0 : index
    %78 = vector.load %arg9[%c0_26, %c0_27] : memref<1x32xf32, #tpu.memory_space<vmem>>, vector<1x32xf32>
    %79 = vector.shape_cast %78 : vector<1x32xf32> to vector<32xf32>
    %cst_28 = arith.constant dense<0.000000e+00> : vector<16xf32>
    %80 = vector.multi_reduction <add>, %75, %cst_28 [1] : vector<16x32xf32> to vector<16xf32>
    %81 = vector.shape_cast %80 : vector<16xf32> to vector<16x1xf32>
    %cst_29 = arith.constant 3.200000e+01 : f32
    %82 = vector.broadcast %cst_29 : f32 to vector<16x1xf32>
    %83 = arith.divf %81, %82 : vector<16x1xf32>
    %84 = vector.broadcast %83 : vector<16x1xf32> to vector<16x32xf32>
    %85 = arith.subf %75, %84 : vector<16x32xf32>
    %86 = arith.mulf %85, %85 : vector<16x32xf32>
    %cst_30 = arith.constant dense<0.000000e+00> : vector<16xf32>
    %87 = vector.multi_reduction <add>, %86, %cst_30 [1] : vector<16x32xf32> to vector<16xf32>
    %88 = vector.shape_cast %87 : vector<16xf32> to vector<16x1xf32>
    %cst_31 = arith.constant 3.200000e+01 : f32
    %89 = vector.broadcast %cst_31 : f32 to vector<16x1xf32>
    %90 = arith.divf %88, %89 : vector<16x1xf32>
    %cst_32 = arith.constant 9.99999974E-6 : f32
    %91 = vector.broadcast %cst_32 : f32 to vector<16x1xf32>
    %92 = arith.addf %90, %91 : vector<16x1xf32>
    %93 = math.rsqrt %92 : vector<16x1xf32>
    %94 = vector.broadcast %93 : vector<16x1xf32> to vector<16x32xf32>
    %95 = arith.mulf %85, %94 : vector<16x32xf32>
    %96 = vector.shape_cast %77 : vector<32xf32> to vector<1x32xf32>
    %97 = vector.broadcast %96 : vector<1x32xf32> to vector<16x32xf32>
    %98 = arith.mulf %95, %97 : vector<16x32xf32>
    %99 = vector.shape_cast %79 : vector<32xf32> to vector<1x32xf32>
    %100 = vector.broadcast %99 : vector<1x32xf32> to vector<16x32xf32>
    %101 = arith.addf %98, %100 : vector<16x32xf32>
    %102 = arith.truncf %101 : vector<16x32xf32> to vector<16x32xbf16>
    %cst_33 = arith.constant 0.000000e+00 : f32
    %103 = vector.broadcast %cst_33 : f32 to vector<16x32xf32>
    %c0_34 = arith.constant 0 : index
    %c0_35 = arith.constant 0 : index
    %104 = vector.load %arg10[%c0_34, %c0_35] : memref<32x128xbf16, #tpu.memory_space<vmem>>, vector<32x128xbf16>
    %cst_36 = arith.constant dense<0.000000e+00> : vector<16x128xf32>
    %105 = tpu.matmul %102, %104, %cst_36 {dimension_numbers = #tpu.dot_dimension_numbers<[1], [0], [0], [1], [0, 0, 1, 1], [], []>} : vector<16x32xbf16>, vector<32x128xbf16>, vector<16x128xf32> -> vector<16x128xf32>
    %c0_37 = arith.constant 0 : index
    %c0_38 = arith.constant 0 : index
    %106 = vector.load %arg11[%c0_37, %c0_38] : memref<1x128xf32, #tpu.memory_space<vmem>>, vector<1x128xf32>
    %107 = vector.shape_cast %106 : vector<1x128xf32> to vector<128xf32>
    %108 = vector.shape_cast %107 : vector<128xf32> to vector<1x128xf32>
    %109 = vector.broadcast %108 : vector<1x128xf32> to vector<16x128xf32>
    %110 = arith.addf %105, %109 : vector<16x128xf32>
    %111 = arith.truncf %110 : vector<16x128xf32> to vector<16x128xbf16>
    %cst_39 = arith.constant 1.703130e+00 : bf16
    %112 = vector.broadcast %cst_39 : bf16 to vector<16x128xbf16>
    %113 = arith.mulf %112, %111 : vector<16x128xbf16>
    %114 = arith.negf %113 : vector<16x128xbf16>
    %115 = math.exp %114 : vector<16x128xbf16>
    %cst_40 = arith.constant 1.000000e+00 : bf16
    %116 = vector.broadcast %cst_40 : bf16 to vector<16x128xbf16>
    %117 = arith.addf %116, %115 : vector<16x128xbf16>
    %118 = arith.divf %116, %117 : vector<16x128xbf16>
    %119 = arith.mulf %111, %118 : vector<16x128xbf16>
    %c0_41 = arith.constant 0 : index
    %c0_42 = arith.constant 0 : index
    %120 = vector.load %arg12[%c0_41, %c0_42] : memref<128x32xbf16, #tpu.memory_space<vmem>>, vector<128x32xbf16>
    %cst_43 = arith.constant dense<0.000000e+00> : vector<16x32xf32>
    %121 = tpu.matmul %119, %120, %cst_43 {dimension_numbers = #tpu.dot_dimension_numbers<[1], [0], [0], [1], [0, 0, 1, 1], [], []>} : vector<16x128xbf16>, vector<128x32xbf16>, vector<16x32xf32> -> vector<16x32xf32>
    %122 = arith.addf %103, %121 : vector<16x32xf32>
    %c0_44 = arith.constant 0 : index
    %c0_45 = arith.constant 0 : index
    %123 = vector.load %arg13[%c0_44, %c0_45] : memref<1x32xf32, #tpu.memory_space<vmem>>, vector<1x32xf32>
    %124 = vector.shape_cast %123 : vector<1x32xf32> to vector<32xf32>
    %125 = vector.shape_cast %124 : vector<32xf32> to vector<1x32xf32>
    %126 = vector.broadcast %125 : vector<1x32xf32> to vector<16x32xf32>
    %127 = arith.addf %122, %126 : vector<16x32xf32>
    %128 = arith.addf %75, %127 : vector<16x32xf32>
    %129 = vector.shape_cast %128 : vector<16x32xf32> to vector<2x8x32xf32>
    %c0_46 = arith.constant 0 : index
    %c0_47 = arith.constant 0 : index
    %c0_48 = arith.constant 0 : index
    %130 = vector.load %arg14[%c0_46, %c0_47, %c0_48] : memref<2x8x32xf32, #tpu.memory_space<vmem>>, vector<2x8x32xf32>
    tpu.vector_store %arg14[%c0_46, %c0_47, %c0_48], %129 {strides = array<i32>} : memref<2x8x32xf32, #tpu.memory_space<vmem>>, vector<2x8x32xf32>,
    return
  }
  func.func @transform_0(%arg0: i32) -> (i32, i32, i32) {
    %c0_i32 = arith.constant 0 : i32
    %c0_i32_0 = arith.constant 0 : i32
    %c0_i32_1 = arith.constant 0 : i32
    return %arg0, %c0_i32, %c0_i32_0 : i32, i32, i32
  }
  func.func @transform_1(%arg0: i32) -> (i32, i32) {
    %c0_i32 = arith.constant 0 : i32
    %c0_i32_0 = arith.constant 0 : i32
    %c0_i32_1 = arith.constant 0 : i32
    return %c0_i32, %c0_i32_0 : i32, i32
  }
  func.func @transform_2(%arg0: i32) -> (i32, i32) {
    %c0_i32 = arith.constant 0 : i32
    %c0_i32_0 = arith.constant 0 : i32
    %c0_i32_1 = arith.constant 0 : i32
    return %c0_i32, %c0_i32_0 : i32, i32
  }
  func.func @transform_3(%arg0: i32) -> (i32, i32) {
    %c0_i32 = arith.constant 0 : i32
    %c0_i32_0 = arith.constant 0 : i32
    %c0_i32_1 = arith.constant 0 : i32
    return %c0_i32, %c0_i32_0 : i32, i32
  }
  func.func @transform_4(%arg0: i32) -> (i32, i32) {
    %c0_i32 = arith.constant 0 : i32
    %c0_i32_0 = arith.constant 0 : i32
    %c0_i32_1 = arith.constant 0 : i32
    return %c0_i32, %c0_i32_0 : i32, i32
  }
  func.func @transform_5(%arg0: i32) -> (i32, i32) {
    %c0_i32 = arith.constant 0 : i32
    %c0_i32_0 = arith.constant 0 : i32
    %c0_i32_1 = arith.constant 0 : i32
    return %c0_i32, %c0_i32_0 : i32, i32
  }
  func.func @transform_6(%arg0: i32) -> (i32, i32) {
    %c0_i32 = arith.constant 0 : i32
    %c0_i32_0 = arith.constant 0 : i32
    %c0_i32_1 = arith.constant 0 : i32
    return %c0_i32, %c0_i32_0 : i32, i32
  }
  func.func @transform_7(%arg0: i32) -> (i32, i32) {
    %c0_i32 = arith.constant 0 : i32
    %c0_i32_0 = arith.constant 0 : i32
    %c0_i32_1 = arith.constant 0 : i32
    return %c0_i32, %c0_i32_0 : i32, i32
  }
  func.func @transform_8(%arg0: i32) -> (i32, i32) {
    %c0_i32 = arith.constant 0 : i32
    %c0_i32_0 = arith.constant 0 : i32
    %c0_i32_1 = arith.constant 0 : i32
    return %c0_i32, %c0_i32_0 : i32, i32
  }
  func.func @transform_9(%arg0: i32) -> (i32, i32) {
    %c0_i32 = arith.constant 0 : i32
    %c0_i32_0 = arith.constant 0 : i32
    %c0_i32_1 = arith.constant 0 : i32
    return %c0_i32, %c0_i32_0 : i32, i32
  }
  func.func @transform_10(%arg0: i32) -> (i32, i32) {
    %c0_i32 = arith.constant 0 : i32
    %c0_i32_0 = arith.constant 0 : i32
    %c0_i32_1 = arith.constant 0 : i32
    return %c0_i32, %c0_i32_0 : i32, i32
  }
  func.func @transform_11(%arg0: i32) -> (i32, i32) {
    %c0_i32 = arith.constant 0 : i32
    %c0_i32_0 = arith.constant 0 : i32
    %c0_i32_1 = arith.constant 0 : i32
    return %c0_i32, %c0_i32_0 : i32, i32
  }
  func.func @transform_12(%arg0: i32) -> (i32, i32) {
    %c0_i32 = arith.constant 0 : i32
    %c0_i32_0 = arith.constant 0 : i32
    %c0_i32_1 = arith.constant 0 : i32
    return %c0_i32, %c0_i32_0 : i32, i32
  }
  func.func @transform_13(%arg0: i32) -> (i32, i32, i32) {
    %c0_i32 = arith.constant 0 : i32
    %c0_i32_0 = arith.constant 0 : i32
    %c0_i32_1 = arith.constant 0 : i32
    return %arg0, %c0_i32, %c0_i32_0 : i32, i32, i32
  }
}

module attributes {stable_mosaic.version = 11 : i64} {
  func.func @_resblock_kernel(%arg0: i32, %arg1: memref<2x8x32xf32, #tpu.memory_space<vmem>>, %arg2: memref<1x32xf32, #tpu.memory_space<vmem>>, %arg3: memref<1x32xf32, #tpu.memory_space<vmem>>, %arg4: memref<32x96xbf16, #tpu.memory_space<vmem>>, %arg5: memref<1x96xf32, #tpu.memory_space<vmem>>, %arg6: memref<32x32xbf16, #tpu.memory_space<vmem>>, %arg7: memref<1x32xf32, #tpu.memory_space<vmem>>, %arg8: memref<1x32xf32, #tpu.memory_space<vmem>>, %arg9: memref<1x32xf32, #tpu.memory_space<vmem>>, %arg10: memref<32x128xbf16, #tpu.memory_space<vmem>>, %arg11: memref<1x128xf32, #tpu.memory_space<vmem>>, %arg12: memref<128x32xbf16, #tpu.memory_space<vmem>>, %arg13: memref<1x32xf32, #tpu.memory_space<vmem>>, %arg14: memref<2x8x32xf32, #tpu.memory_space<vmem>>) attributes {dimension_semantics = [#tpu.dimension_semantics<parallel>], iteration_bounds = array<i64: 1>, scalar_prefetch = 0 : i64, scratch_operands = 0 : i64, tpu.core_type = #tpu.core_type<tc>, window_params = [{transform_indices = @transform_0, window_bounds = array<i64: 2, 8, 32>}, {pipeline_mode = #tpu.pipeline_mode<synchronous>, transform_indices = @transform_1, window_bounds = array<i64: 1, 32>}, {pipeline_mode = #tpu.pipeline_mode<synchronous>, transform_indices = @transform_2, window_bounds = array<i64: 1, 32>}, {pipeline_mode = #tpu.pipeline_mode<synchronous>, transform_indices = @transform_3, window_bounds = array<i64: 32, 96>}, {pipeline_mode = #tpu.pipeline_mode<synchronous>, transform_indices = @transform_4, window_bounds = array<i64: 1, 96>}, {pipeline_mode = #tpu.pipeline_mode<synchronous>, transform_indices = @transform_5, window_bounds = array<i64: 32, 32>}, {pipeline_mode = #tpu.pipeline_mode<synchronous>, transform_indices = @transform_6, window_bounds = array<i64: 1, 32>}, {pipeline_mode = #tpu.pipeline_mode<synchronous>, transform_indices = @transform_7, window_bounds = array<i64: 1, 32>}, {pipeline_mode = #tpu.pipeline_mode<synchronous>, transform_indices = @transform_8, window_bounds = array<i64: 1, 32>}, {pipeline_mode = #tpu.pipeline_mode<synchronous>, transform_indices = @transform_9, window_bounds = array<i64: 32, 128>}, {pipeline_mode = #tpu.pipeline_mode<synchronous>, transform_indices = @transform_10, window_bounds = array<i64: 1, 128>}, {pipeline_mode = #tpu.pipeline_mode<synchronous>, transform_indices = @transform_11, window_bounds = array<i64: 128, 32>}, {pipeline_mode = #tpu.pipeline_mode<synchronous>, transform_indices = @transform_12, window_bounds = array<i64: 1, 32>}, {transform_indices = @transform_13, window_bounds = array<i64: 2, 8, 32>}]} {
    %c0 = arith.constant 0 : index
    %c0_0 = arith.constant 0 : index
    %c0_1 = arith.constant 0 : index
    %0 = vector.load %arg1[%c0, %c0_0, %c0_1] : memref<2x8x32xf32, #tpu.memory_space<vmem>>, vector<2x8x32xf32>
    %1 = vector.shape_cast %0 : vector<2x8x32xf32> to vector<16x32xf32>
    %c0_2 = arith.constant 0 : index
    %c0_3 = arith.constant 0 : index
    %2 = vector.load %arg2[%c0_2, %c0_3] : memref<1x32xf32, #tpu.memory_space<vmem>>, vector<1x32xf32>
    %3 = vector.shape_cast %2 : vector<1x32xf32> to vector<32xf32>
    %c0_4 = arith.constant 0 : index
    %c0_5 = arith.constant 0 : index
    %4 = vector.load %arg3[%c0_4, %c0_5] : memref<1x32xf32, #tpu.memory_space<vmem>>, vector<1x32xf32>
    %5 = vector.shape_cast %4 : vector<1x32xf32> to vector<32xf32>
    %cst = arith.constant dense<0.000000e+00> : vector<16xf32>
    %6 = vector.multi_reduction <add>, %1, %cst [1] : vector<16x32xf32> to vector<16xf32>
    %7 = vector.shape_cast %6 : vector<16xf32> to vector<16x1xf32>
    %cst_6 = arith.constant 3.200000e+01 : f32
    %8 = vector.broadcast %cst_6 : f32 to vector<16x1xf32>
    %9 = arith.divf %7, %8 : vector<16x1xf32>
    %10 = vector.broadcast %9 : vector<16x1xf32> to vector<16x32xf32>
    %11 = arith.subf %1, %10 : vector<16x32xf32>
    %12 = arith.mulf %11, %11 : vector<16x32xf32>
    %cst_7 = arith.constant dense<0.000000e+00> : vector<16xf32>
    %13 = vector.multi_reduction <add>, %12, %cst_7 [1] : vector<16x32xf32> to vector<16xf32>
    %14 = vector.shape_cast %13 : vector<16xf32> to vector<16x1xf32>
    %cst_8 = arith.constant 3.200000e+01 : f32
    %15 = vector.broadcast %cst_8 : f32 to vector<16x1xf32>
    %16 = arith.divf %14, %15 : vector<16x1xf32>
    %cst_9 = arith.constant 9.99999974E-6 : f32
    %17 = vector.broadcast %cst_9 : f32 to vector<16x1xf32>
    %18 = arith.addf %16, %17 : vector<16x1xf32>
    %19 = math.rsqrt %18 : vector<16x1xf32>
    %20 = vector.broadcast %19 : vector<16x1xf32> to vector<16x32xf32>
    %21 = arith.mulf %11, %20 : vector<16x32xf32>
    %22 = vector.shape_cast %3 : vector<32xf32> to vector<1x32xf32>
    %23 = vector.broadcast %22 : vector<1x32xf32> to vector<16x32xf32>
    %24 = arith.mulf %21, %23 : vector<16x32xf32>
    %25 = vector.shape_cast %5 : vector<32xf32> to vector<1x32xf32>
    %26 = vector.broadcast %25 : vector<1x32xf32> to vector<16x32xf32>
    %27 = arith.addf %24, %26 : vector<16x32xf32>
    %28 = arith.truncf %27 : vector<16x32xf32> to vector<16x32xbf16>
    %c0_10 = arith.constant 0 : index
    %c0_11 = arith.constant 0 : index
    %29 = vector.load %arg4[%c0_10, %c0_11] : memref<32x96xbf16, #tpu.memory_space<vmem>>, vector<32x96xbf16>
    %cst_12 = arith.constant dense<0.000000e+00> : vector<16x96xf32>
    %30 = tpu.matmul %28, %29, %cst_12 {dimension_numbers = #tpu.dot_dimension_numbers<[1], [0], [0], [1], [0, 0, 1, 1], [], []>} : vector<16x32xbf16>, vector<32x96xbf16>, vector<16x96xf32> -> vector<16x96xf32>
    %c0_13 = arith.constant 0 : index
    %c0_14 = arith.constant 0 : index
    %31 = vector.load %arg5[%c0_13, %c0_14] : memref<1x96xf32, #tpu.memory_space<vmem>>, vector<1x96xf32>
    %32 = vector.shape_cast %31 : vector<1x96xf32> to vector<96xf32>
    %33 = vector.shape_cast %32 : vector<96xf32> to vector<1x96xf32>
    %34 = vector.broadcast %33 : vector<1x96xf32> to vector<16x96xf32>
    %35 = arith.addf %30, %34 : vector<16x96xf32>
    %36 = vector.extract_strided_slice %35 {offsets = [0, 0], sizes = [16, 32], strides = [1, 1]} : vector<16x96xf32> to vector<16x32xf32>
    %37 = vector.shape_cast %36 : vector<16x32xf32> to vector<2x8x4x8xf32>
    %38 = tpu.transpose %37, [0, 2, 1, 3] : vector<2x8x4x8xf32> -> vector<2x4x8x8xf32>
    %39 = vector.shape_cast %38 : vector<2x4x8x8xf32> to vector<8x8x8xf32>
    %40 = arith.truncf %39 : vector<8x8x8xf32> to vector<8x8x8xbf16>
    %41 = vector.extract_strided_slice %35 {offsets = [0, 32], sizes = [16, 32], strides = [1, 1]} : vector<16x96xf32> to vector<16x32xf32>
    %42 = vector.shape_cast %41 : vector<16x32xf32> to vector<2x8x4x8xf32>
    %43 = tpu.transpose %42, [0, 2, 1, 3] : vector<2x8x4x8xf32> -> vector<2x4x8x8xf32>
    %44 = vector.shape_cast %43 : vector<2x4x8x8xf32> to vector<8x8x8xf32>
    %45 = arith.truncf %44 : vector<8x8x8xf32> to vector<8x8x8xbf16>
    %46 = vector.extract_strided_slice %35 {offsets = [0, 64], sizes = [16, 32], strides = [1, 1]} : vector<16x96xf32> to vector<16x32xf32>
    %47 = vector.shape_cast %46 : vector<16x32xf32> to vector<2x8x4x8xf32>
    %48 = tpu.transpose %47, [0, 2, 1, 3] : vector<2x8x4x8xf32> -> vector<2x4x8x8xf32>
    %49 = vector.shape_cast %48 : vector<2x4x8x8xf32> to vector<8x8x8xf32>
    %50 = arith.truncf %49 : vector<8x8x8xf32> to vector<8x8x8xbf16>
    %cst_15 = arith.constant dense<0.000000e+00> : vector<8x8x8xf32>
    %51 = tpu.matmul %40, %45, %cst_15 {dimension_numbers = #tpu.dot_dimension_numbers<[2], [2], [1], [1], [0, 0, 0, 1, 1, 1], [0], [0]>} : vector<8x8x8xbf16>, vector<8x8x8xbf16>, vector<8x8x8xf32> -> vector<8x8x8xf32>
    %cst_16 = arith.constant dense<0xFF800000> : vector<8x8xf32>
    %52 = vector.multi_reduction <maximumf>, %51, %cst_16 [2] : vector<8x8x8xf32> to vector<8x8xf32>
    %53 = vector.shape_cast %52 : vector<8x8xf32> to vector<8x8x1xf32>
    %54 = vector.broadcast %53 : vector<8x8x1xf32> to vector<8x8x8xf32>
    %55 = arith.subf %51, %54 : vector<8x8x8xf32>
    %56 = math.exp %55 : vector<8x8x8xf32>
    %cst_17 = arith.constant dense<0.000000e+00> : vector<8x8xf32>
    %57 = vector.multi_reduction <add>, %56, %cst_17 [2] : vector<8x8x8xf32> to vector<8x8xf32>
    %58 = vector.shape_cast %57 : vector<8x8xf32> to vector<8x8x1xf32>
    %59 = tpu.reciprocal %58 {approx = true} : vector<8x8x1xf32> -> vector<8x8x1xf32>
    %60 = vector.broadcast %59 : vector<8x8x1xf32> to vector<8x8x8xf32>
    %61 = arith.mulf %56, %60 : vector<8x8x8xf32>
    %62 = arith.truncf %61 : vector<8x8x8xf32> to vector<8x8x8xbf16>
    %cst_18 = arith.constant dense<0.000000e+00> : vector<8x8x8xf32>
    %63 = tpu.matmul %62, %50, %cst_18 {dimension_numbers = #tpu.dot_dimension_numbers<[2], [1], [1], [2], [0, 0, 0, 1, 1, 2], [0], [0]>} : vector<8x8x8xbf16>, vector<8x8x8xbf16>, vector<8x8x8xf32> -> vector<8x8x8xf32>
    %64 = vector.shape_cast %63 : vector<8x8x8xf32> to vector<2x4x8x8xf32>
    %65 = tpu.transpose %64, [0, 2, 1, 3] : vector<2x4x8x8xf32> -> vector<2x8x4x8xf32>
    %66 = vector.shape_cast %65 : vector<2x8x4x8xf32> to vector<16x32xf32>
    %67 = arith.truncf %66 : vector<16x32xf32> to vector<16x32xbf16>
    %c0_19 = arith.constant 0 : index
    %c0_20 = arith.constant 0 : index
    %68 = vector.load %arg6[%c0_19, %c0_20] : memref<32x32xbf16, #tpu.memory_space<vmem>>, vector<32x32xbf16>
    %cst_21 = arith.constant dense<0.000000e+00> : vector<16x32xf32>
    %69 = tpu.matmul %67, %68, %cst_21 {dimension_numbers = #tpu.dot_dimension_numbers<[1], [0], [0], [1], [0, 0, 1, 1], [], []>} : vector<16x32xbf16>, vector<32x32xbf16>, vector<16x32xf32> -> vector<16x32xf32>
    %c0_22 = arith.constant 0 : index
    %c0_23 = arith.constant 0 : index
    %70 = vector.load %arg7[%c0_22, %c0_23] : memref<1x32xf32, #tpu.memory_space<vmem>>, vector<1x32xf32>
    %71 = vector.shape_cast %70 : vector<1x32xf32> to vector<32xf32>
    %72 = vector.shape_cast %71 : vector<32xf32> to vector<1x32xf32>
    %73 = vector.broadcast %72 : vector<1x32xf32> to vector<16x32xf32>
    %74 = arith.addf %69, %73 : vector<16x32xf32>
    %75 = arith.addf %1, %74 : vector<16x32xf32>
    %c0_24 = arith.constant 0 : index
    %c0_25 = arith.constant 0 : index
    %76 = vector.load %arg8[%c0_24, %c0_25] : memref<1x32xf32, #tpu.memory_space<vmem>>, vector<1x32xf32>
    %77 = vector.shape_cast %76 : vector<1x32xf32> to vector<32xf32>
    %c0_26 = arith.constant 0 : index
    %c0_27 = arith.constant 0 : index
    %78 = vector.load %arg9[%c0_26, %c0_27] : memref<1x32xf32, #tpu.memory_space<vmem>>, vector<1x32xf32>
    %79 = vector.shape_cast %78 : vector<1x32xf32> to vector<32xf32>
    %cst_28 = arith.constant dense<0.000000e+00> : vector<16xf32>
    %80 = vector.multi_reduction <add>, %75, %cst_28 [1] : vector<16x32xf32> to vector<16xf32>
    %81 = vector.shape_cast %80 : vector<16xf32> to vector<16x1xf32>
    %cst_29 = arith.constant 3.200000e+01 : f32
    %82 = vector.broadcast %cst_29 : f32 to vector<16x1xf32>
    %83 = arith.divf %81, %82 : vector<16x1xf32>
    %84 = vector.broadcast %83 : vector<16x1xf32> to vector<16x32xf32>
    %85 = arith.subf %75, %84 : vector<16x32xf32>
    %86 = arith.mulf %85, %85 : vector<16x32xf32>
    %cst_30 = arith.constant dense<0.000000e+00> : vector<16xf32>
    %87 = vector.multi_reduction <add>, %86, %cst_30 [1] : vector<16x32xf32> to vector<16xf32>
    %88 = vector.shape_cast %87 : vector<16xf32> to vector<16x1xf32>
    %cst_31 = arith.constant 3.200000e+01 : f32
    %89 = vector.broadcast %cst_31 : f32 to vector<16x1xf32>
    %90 = arith.divf %88, %89 : vector<16x1xf32>
    %cst_32 = arith.constant 9.99999974E-6 : f32
    %91 = vector.broadcast %cst_32 : f32 to vector<16x1xf32>
    %92 = arith.addf %90, %91 : vector<16x1xf32>
    %93 = math.rsqrt %92 : vector<16x1xf32>
    %94 = vector.broadcast %93 : vector<16x1xf32> to vector<16x32xf32>
    %95 = arith.mulf %85, %94 : vector<16x32xf32>
    %96 = vector.shape_cast %77 : vector<32xf32> to vector<1x32xf32>
    %97 = vector.broadcast %96 : vector<1x32xf32> to vector<16x32xf32>
    %98 = arith.mulf %95, %97 : vector<16x32xf32>
    %99 = vector.shape_cast %79 : vector<32xf32> to vector<1x32xf32>
    %100 = vector.broadcast %99 : vector<1x32xf32> to vector<16x32xf32>
    %101 = arith.addf %98, %100 : vector<16x32xf32>
    %102 = arith.truncf %101 : vector<16x32xf32> to vector<16x32xbf16>
    %cst_33 = arith.constant 0.000000e+00 : f32
    %103 = vector.broadcast %cst_33 : f32 to vector<16x32xf32>
    %c0_34 = arith.constant 0 : index
    %c0_35 = arith.constant 0 : index
    %104 = vector.load %arg10[%c0_34, %c0_35] : memref<32x128xbf16, #tpu.memory_space<vmem>>, vector<32x128xbf16>
    %cst_36 = arith.constant dense<0.000000e+00> : vector<16x128xf32>
    %105 = tpu.matmul %102, %104, %cst_36 {dimension_numbers = #tpu.dot_dimension_numbers<[1], [0], [0], [1], [0, 0, 1, 1], [], []>} : vector<16x32xbf16>, vector<32x128xbf16>, vector<16x128xf32> -> vector<16x128xf32>
    %c0_37 = arith.constant 0 : index
    %c0_38 = arith.constant 0 : index
    %106 = vector.load %arg11[%c0_37, %c0_38] : memref<1x128xf32, #tpu.memory_space<vmem>>, vector<1x128xf32>
    %107 = vector.shape_cast %106 : vector<1x128xf32> to vector<128xf32>
    %108 = vector.shape_cast %107 : vector<128xf32> to vector<1x128xf32>
    %109 = vector.broadcast %108 : vector<1x128xf32> to vector<16x128xf32>
    %110 = arith.addf %105, %109 : vector<16x128xf32>
    %111 = arith.truncf %110 : vector<16x128xf32> to vector<16x128xbf16>
    %cst_39 = arith.constant 1.703130e+00 : bf16
    %112 = vector.broadcast %cst_39 : bf16 to vector<16x128xbf16>
    %113 = arith.mulf %112, %111 : vector<16x128xbf16>
    %114 = arith.negf %113 : vector<16x128xbf16>
    %115 = math.exp %114 : vector<16x128xbf16>
    %cst_40 = arith.constant 1.000000e+00 : bf16
    %116 = vector.broadcast %cst_40 : bf16 to vector<16x128xbf16>
    %117 = arith.addf %116, %115 : vector<16x128xbf16>
    %118 = arith.divf %116, %117 : vector<16x128xbf16>
    %119 = arith.mulf %111, %118 : vector<16x128xbf16>
    %c0_41 = arith.constant 0 : index
    %c0_42 = arith.constant 0 : index
    %120 = vector.load %arg12[%c0_41, %c0_42] : memref<128x32xbf16, #tpu.memory_space<vmem>>, vector<128x32xbf16>
    %cst_43 = arith.constant dense<0.000000e+00> : vector<16x32xf32>
    %121 = tpu.matmul %119, %120, %cst_43 {dimension_numbers = #tpu.dot_dimension_numbers<[1], [0], [0], [1], [0, 0, 1, 1], [], []>} : vector<16x128xbf16>, vector<128x32xbf16>, vector<16x32xf32> -> vector<16x32xf32>
    %122 = arith.addf %103, %121 : vector<16x32xf32>
    %c0_44 = arith.constant 0 : index
    %c0_45 = arith.constant 0 : index
    %123 = vector.load %arg13[%c0_44, %c0_45] : memref<1x32xf32, #tpu.memory_space<vmem>>, vector<1x32xf32>
    %124 = vector.shape_cast %123 : vector<1x32xf32> to vector<32xf32>
    %125 = vector.shape_cast %124 : vector<32xf32> to vector<1x32xf32>
    %126 = vector.broadcast %125 : vector<1x32xf32> to vector<16x32xf32>
    %127 = arith.addf %122, %126 : vector<16x32xf32>
    %128 = arith.addf %75, %127 : vector<16x32xf32>
    %129 = vector.shape_cast %128 : vector<16x32xf32> to vector<2x8x32xf32>
    %c0_46 = arith.constant 0 : index
    %c0_47 = arith.constant 0 : index
    %c0_48 = arith.constant 0 : index
    %130 = vector.load %arg14[%c0_46, %c0_47, %c0_48] : memref<2x8x32xf32, #tpu.memory_space<vmem>>, vector<2x8x32xf32>
    tpu.vector_store %arg14[%c0_46, %c0_47, %c0_48], %129 {strides = array<i32>} : memref<2x8x32xf32, #tpu.memory_space<vmem>>, vector<2x8x32xf32>,
    return
  }
  func.func @transform_0(%arg0: i32) -> (i32, i32, i32) {
    %c0_i32 = arith.constant 0 : i32
    %c0_i32_0 = arith.constant 0 : i32
    %c0_i32_1 = arith.constant 0 : i32
    return %arg0, %c0_i32, %c0_i32_0 : i32, i32, i32
  }
  func.func @transform_1(%arg0: i32) -> (i32, i32) {
    %c0_i32 = arith.constant 0 : i32
    %c0_i32_0 = arith.constant 0 : i32
    %c0_i32_1 = arith.constant 0 : i32
    return %c0_i32, %c0_i32_0 : i32, i32
  }
  func.func @transform_2(%arg0: i32) -> (i32, i32) {
    %c0_i32 = arith.constant 0 : i32
    %c0_i32_0 = arith.constant 0 : i32
    %c0_i32_1 = arith.constant 0 : i32
    return %c0_i32, %c0_i32_0 : i32, i32
  }
  func.func @transform_3(%arg0: i32) -> (i32, i32) {
    %c0_i32 = arith.constant 0 : i32
    %c0_i32_0 = arith.constant 0 : i32
    %c0_i32_1 = arith.constant 0 : i32
    return %c0_i32, %c0_i32_0 : i32, i32
  }
  func.func @transform_4(%arg0: i32) -> (i32, i32) {
    %c0_i32 = arith.constant 0 : i32
    %c0_i32_0 = arith.constant 0 : i32
    %c0_i32_1 = arith.constant 0 : i32
    return %c0_i32, %c0_i32_0 : i32, i32
  }
  func.func @transform_5(%arg0: i32) -> (i32, i32) {
    %c0_i32 = arith.constant 0 : i32
    %c0_i32_0 = arith.constant 0 : i32
    %c0_i32_1 = arith.constant 0 : i32
    return %c0_i32, %c0_i32_0 : i32, i32
  }
  func.func @transform_6(%arg0: i32) -> (i32, i32) {
    %c0_i32 = arith.constant 0 : i32
    %c0_i32_0 = arith.constant 0 : i32
    %c0_i32_1 = arith.constant 0 : i32
    return %c0_i32, %c0_i32_0 : i32, i32
  }
  func.func @transform_7(%arg0: i32) -> (i32, i32) {
    %c0_i32 = arith.constant 0 : i32
    %c0_i32_0 = arith.constant 0 : i32
    %c0_i32_1 = arith.constant 0 : i32
    return %c0_i32, %c0_i32_0 : i32, i32
  }
  func.func @transform_8(%arg0: i32) -> (i32, i32) {
    %c0_i32 = arith.constant 0 : i32
    %c0_i32_0 = arith.constant 0 : i32
    %c0_i32_1 = arith.constant 0 : i32
    return %c0_i32, %c0_i32_0 : i32, i32
  }
  func.func @transform_9(%arg0: i32) -> (i32, i32) {
    %c0_i32 = arith.constant 0 : i32
    %c0_i32_0 = arith.constant 0 : i32
    %c0_i32_1 = arith.constant 0 : i32
    return %c0_i32, %c0_i32_0 : i32, i32
  }
  func.func @transform_10(%arg0: i32) -> (i32, i32) {
    %c0_i32 = arith.constant 0 : i32
    %c0_i32_0 = arith.constant 0 : i32
    %c0_i32_1 = arith.constant 0 : i32
    return %c0_i32, %c0_i32_0 : i32, i32
  }
  func.func @transform_11(%arg0: i32) -> (i32, i32) {
    %c0_i32 = arith.constant 0 : i32
    %c0_i32_0 = arith.constant 0 : i32
    %c0_i32_1 = arith.constant 0 : i32
    return %c0_i32, %c0_i32_0 : i32, i32
  }
  func.func @transform_12(%arg0: i32) -> (i32, i32) {
    %c0_i32 = arith.constant 0 : i32
    %c0_i32_0 = arith.constant 0 : i32
    %c0_i32_1 = arith.constant 0 : i32
    return %c0_i32, %c0_i32_0 : i32, i32
  }
  func.func @transform_13(%arg0: i32) -> (i32, i32, i32) {
    %c0_i32 = arith.constant 0 : i32
    %c0_i32_0 = arith.constant 0 : i32
    %c0_i32_1 = arith.constant 0 : i32
    return %arg0, %c0_i32, %c0_i32_0 : i32, i32, i32
  }
}

</mosaic_0001>

<bundles_post_ra>
// kernel: tpu_custom_call.1
= control target key start
LH: loop header
LB: loop body
LE: loop exit
PB: predicated region body
PF: predicated region fallthrough
CT: control target
= control target key end

     0   :  { %vm52_vm0 = vcmask 261120   ;;  %s3490_s0 = inlined_call_operand.vmem [shape: f32[2,8,32], index: 0, kind: input, shape index: {}]   ;;  %s3491_s1 = inlined_call_operand.vmem [shape: f32[1,32], index: 1, kind: input, shape index: {}]   ;;  %s3492_s2 = inlined_call_operand.vmem [shape: f32[1,32], index: 2, kind: input, shape index: {}]   ;;  %s3493_s3 = inlined_call_operand.vmem [shape: bf16[32,96], index: 3, kind: input, shape index: {}]   ;;  %s3494_s4 = inlined_call_operand.vmem [shape: f32[1,96], index: 4, kind: input, shape index: {}]   ;;  %s3495_s5 = inlined_call_operand.vmem [shape: bf16[32,32], index: 5, kind: input, shape index: {}]   ;;  %s3496_s6 = inlined_call_operand.vmem [shape: f32[1,32], index: 6, kind: input, shape index: {}]   ;;  %s3497_s7 = inlined_call_operand.vmem [shape: f32[1,32], index: 7, kind: input, shape index: {}]   ;;  %s3498_s8 = inlined_call_operand.vmem [shape: f32[1,32], index: 8, kind: input, shape index: {}]   ;;  %s3499_s9 = inlined_call_operand.vmem [shape: bf16[32,128], index: 9, kind: input, shape index: {}]   ;;  %s3500_s10 = inlined_call_operand.vmem [shape: f32[1,128], index: 10, kind: input, shape index: {}]   ;;  %s3501_s11 = inlined_call_operand.vmem [shape: bf16[128,32], index: 11, kind: input, shape index: {}]   ;;  %s3502_s12 = inlined_call_operand.vmem [shape: f32[1,32], index: 12, kind: input, shape index: {}]   ;;  %s3503_s13 = inlined_call_operand.hbm [shape: f32[2,8,32], index: 13, kind: output, shape index: {}]  }
   0x1   :  { %v48_v0 = vld [vmem:[%s3490_s0] sm:$0xff]  ;;  %v49_v1 = vld [vmem:[%s3490_s0 + $0x8] sm:$0xff] }
   0x2   :  { %v53_v2 = vsel %vm52_vm0, %v48_v0, 0.0  ;;  %v56_v3 = vsel %vm52_vm0, %v49_v1, 0.0 }
   0x3   :  { %54 = vadd.xlane.f32.xlu0 %v53_v2 }
   0x7   :  { %57 = vadd.xlane.f32.xlu0 %v56_v3 }
   0x8   :  { %18 = vsyncpa [#allocation3], 0  ;;  %v2811_v14 = vld [vmem:[%s3493_s3] sm:$0xff]   ;;  %v2895_v15 = vmov 0.0   ;;  %v2812_v16 = vld [vmem:[%s3493_s3 + $0x8] sm:$0xff]   ;;  %vm2896_vm1 = vmmov 0   ;;  %v189_v49 = vlaneseq }
   0x9   :  { %2642 = vmatprep.subr.bf16.mxu0 %v2895_v15  ;;  %2662 = vmatprep.subr.bf16.mxu1 %v2895_v15  ;;  %v2534_v25 = vld [vmem:[%s3491_s1] ss:$0 sm:$0xff]  ;;  %s2897_s1 = smov 112   ;;  %s2899_s21 = smov 104   ;;  %v2901_v47 = vmov 1983009808  }
   0xa   :  { %2643 = vmatpush3.bf16.msra.mxu0 %v2811_v14  ;;  %2646 = vmatprep.mubr.msk.bf16.mxu0 %vm2896_vm1, %v2895_v15  ;;  %v2535_v29 = vld [vmem:[%s3492_s2] ss:$0 sm:$0xff]  ;;  %s2898_s2 = smov 120   ;;  %v187_v48 = vunpack.c.l.s4 %v2901_v47  ;;  %v190_v51 = vshrl.u32 %v189_v49, 7  ;;  %v2902_v52 = vmov 1934713408  }
   0xb   :  { %2644 = vmatprep.subr.bf16.mxu0 %v2895_v15  ;;  %2664 = vmatprep.mubr.msk.bf16.mxu1 %vm2896_vm1, %v2895_v15  ;;  %v2536_v34 = vld [vmem:[%s3494_s4] ss:$0 sm:$0xff]  ;;  %s2900_s4 = smov 96   ;;  %v219_v53 = vunpack.c.l.s4 %v2902_v52  ;;  %vm1072_vm2 = vcmask 64512   ;;  %s2903_s22 = smov 64   ;;  %vm1540_vm3 = vcmask 1043456  }
   0xc   :  { %v188_v50 = vunpack.c.0.s8 %v187_v48  ;;  %s2904_s27 = smov 16   ;;  %s2906_s28 = smov 24   ;;  %vm2204_vm4 = vcmask 130048   ;;  %vm2207_vm5 = vcmask 195584  }
   0xd   :  { %v220_v59 = vunpack.c.0.s8 %v219_v53 }
   0xe   :  { %2645 = vmatpush3.bf16.msra.mxu0 %v2812_v16  ;;  %v3049_v56 = vsub.s32 %v188_v50, %v190_v51 }
   0xf   :  { %2650 = vmatprep.subr.bf16.mxu0 %v2895_v15 }
  0x90   :  { %v55_v4 = vpop.xlane.xlu0 %54 }
  0x91   :  { %v60_v5 = vmul.f32 0.03125, %v55_v4 }
  0x93   :  { %v62_v6 = vsub.f32 %v48_v0, %v60_v5  ;;  %v3059_v0 = vsub.s32 %v220_v59, %v190_v51 }
  0x94   :  { %v58_v7 = vpop.xlane.xlu0 %57 }
  0x95   :  { %v61_v8 = vmul.f32 0.03125, %v58_v7  ;;  %v64_v9 = vmul.f32 %v62_v6, %v62_v6 }
  0x97   :  { %v63_v10 = vsub.f32 %v49_v1, %v61_v8  ;;  %v66_v11 = vsel %vm52_vm0, %v64_v9, 0.0 }
  0x98   :  { %67 = vadd.xlane.f32.xlu1 %v66_v11 }
  0x99   :  { %v65_v12 = vmul.f32 %v63_v10, %v63_v10 }
  0x9b   :  { %v69_v13 = vsel %vm52_vm0, %v65_v12, 0.0 }
  0x9c   :  { %70 = vadd.xlane.f32.xlu1 %v69_v13 }
 0x125   :  { %v68_v17 = vpop.xlane.xlu1 %67 }
 0x126   :  { %v72_v18 = vmul.f32 0.03125, %v68_v17 }
 0x128   :  { %v74_v19 = vadd.f32 1e-05, %v72_v18 }
 0x129   :  { %v71_v20 = vpop.xlane.xlu1 %70 }
 0x12a   :  { %2825 = vrsqrt.f32 %v74_v19  ;;  %v73_v21 = vmul.f32 0.03125, %v71_v20 }
 0x12c   :  { %v75_v22 = vadd.f32 1e-05, %v73_v21 }
 0x12e   :  { %2827 = vrsqrt.f32 %v75_v22 }
 0x134   :  { %v2826_v23 = vpop.eup %2825 }
 0x135   :  { %v78_v24 = vmul.f32 %v2826_v23, %v62_v6 }
 0x137   :  { %v86_v28 = vmul.f32 %v2534_v25, %v78_v24 }
 0x138   :  { %v2828_v26 = vpop.eup %2827 }
 0x139   :  { %v79_v27 = vmul.f32 %v2828_v26, %v63_v10  ;;  %v94_v31 = vadd.f32 %v2535_v29, %v86_v28 }
 0x13b   :  { %v87_v30 = vmul.f32 %v2534_v25, %v79_v27 }
 0x13d   :  { %v95_v32 = vadd.f32 %v2535_v29, %v87_v30 }
 0x13f   :  { %v96_v33 = vpack.c.bf16 %v95_v32, %v94_v31 }
 0x141   :  { %2647 = vmatmul.mubr.msk.bf16.vlgmr.msra.gmra.mrb[0].mxu0 %vm52_vm0, %v96_v33 }
 0x142   :  { %2652 = vmatprep.mubr.msk.bf16.mxu0 %vm2896_vm1, %v2895_v15 }
 0x214   :  { %v157_v35 = vpop.f32.mrb[0].mxu0 }
 0x215   :  { %v3015_v36 = vadd.f32 %v2536_v34, %v157_v35  ;;  %v2648_v37 = vpop.f32.mrb[1].mxu0 }
 0x216   :  { %v160_v38 = vpop.f32.mrb[2].mxu0 }
 0x217   :  { %172 = vrot.lane.b32.xlu1 %v3015_v36, %s2897_s1  ;;  %166 = vrot.lane.b32.xlu0 %v3015_v36, %s2898_s2  ;;  %v2649_v39 = vpop.f32.mrb[3].mxu0  ;;  %v3019_v40 = vadd.f32 %v2536_v34, %v160_v38 }
 0x21b   :  { %178 = vrot.lane.b32.xlu1 %v3015_v36, %s2899_s21  ;;  %174 = vrot.lane.b32.xlu0 %v3019_v40, %s2897_s1 }
 0x21f   :  { %464 = vrot.lane.b32.xlu0 %v3015_v36, %s2900_s4  ;;  %168 = vrot.lane.b32.xlu1 %v3019_v40, %s2898_s2 }
 0x223   :  { %180 = vrot.lane.b32.xlu1 %v3019_v40, %s2899_s21 }
 0x289   :  { %v3026_v41 = vpop.permute.xlu1 %172  ;;  %v3028_v42 = vpop.permute.xlu0 %166 }
 0x28a   :  { %472 = vrot.lane.b32.xlu0 %v3026_v41, %s2900_s4  ;;  %468 = vrot.lane.b32.xlu1 %v3028_v42, %s2900_s4  ;;  %v184_v57 = vcombine.low %v3015_v36, %v3026_v41  ;;  %v185_v58 = vcombine.high %v3015_v36, %v3026_v41 }
 0x28c   :  { %v192_v62 = vrot.slane %v184_v57, %v3049_v56  ;;  %v199_v63 = vrot.slane %v185_v58, %v3049_v56 }
 0x28d   :  { %v3032_v43 = vpop.permute.xlu1 %178  ;;  %v3036_v44 = vpop.permute.xlu0 %174 }
 0x28e   :  { %466 = vrot.lane.b32.xlu0 %v3019_v40, %s2900_s4  ;;  %476 = vrot.lane.b32.xlu1 %v3032_v43, %s2900_s4  ;;  %v200_v54 = vcombine.low %v3028_v42, %v3032_v43  ;;  %v201_v55 = vcombine.high %v3028_v42, %v3032_v43  ;;  %v252_v16 = vcombine.low %v3019_v40, %v3036_v44 }
 0x28f   :  { %v253_v19 = vcombine.high %v3019_v40, %v3036_v44 }
 0x290   :  { %v208_v60 = vrot.slane %v200_v54, %v3049_v56  ;;  %v215_v61 = vrot.slane %v201_v55, %v3049_v56  ;;  %v260_v26 = vrot.slane %v252_v16, %v3049_v56 }
 0x291   :  { %v3038_v45 = vpop.permute.xlu1 %168  ;;  %v465_v10 = vpop.permute.xlu0 %464  ;;  %v267_v28 = vrot.slane %v253_v19, %v3049_v56 }
 0x292   :  { %474 = vrot.lane.b32.xlu0 %v3036_v44, %s2900_s4  ;;  %470 = vrot.lane.b32.xlu1 %v3038_v45, %s2900_s4  ;;  %v216_v1 = vcombine.low %v192_v62, %v208_v60  ;;  %v217_v2 = vcombine.high %v192_v62, %v208_v60  ;;  %v232_v3 = vcombine.low %v199_v63, %v215_v61 }
 0x293   :  { %v233_v4 = vcombine.high %v199_v63, %v215_v61 }
 0x294   :  { %v224_v5 = vrot.slane %v216_v1, %v3059_v0  ;;  %v231_v6 = vrot.slane %v217_v2, %v3059_v0  ;;  %v240_v7 = vrot.slane %v232_v3, %v3059_v0 }
 0x295   :  { %v3042_v46 = vpop.permute.xlu1 %180  ;;  %v247_v8 = vrot.slane %v233_v4, %v3059_v0 }
 0x296   :  { %478 = vrot.lane.b32.xlu1 %v3042_v46, %s2900_s4  ;;  %v320_v9 = vcombine.low %v224_v5, %v231_v6  ;;  %v2540_v11 = vcombine.high %v224_v5, %v231_v6  ;;  %v268_v14 = vcombine.low %v3038_v45, %v3042_v46  ;;  %v269_v17 = vcombine.high %v3038_v45, %v3042_v46 }
 0x297   :  { %v336_v12 = vcombine.low %v240_v7, %v247_v8  ;;  %v2541_v13 = vcombine.high %v240_v7, %v247_v8 }
 0x298   :  { %v327_v18 = vrot.slane %v320_v9, %v3049_v56  ;;  %v335_v22 = vrot.slane %v2540_v11, %v3049_v56  ;;  %v276_v25 = vrot.slane %v268_v14, %v3049_v56  ;;  %v283_v27 = vrot.slane %v269_v17, %v3049_v56 }
 0x299   :  { %v343_v23 = vrot.slane %v336_v12, %v3049_v56  ;;  %v351_v24 = vrot.slane %v2541_v13, %v3049_v56 }
 0x29a   :  { %v284_v32 = vcombine.low %v260_v26, %v276_v25  ;;  %v285_v33 = vcombine.high %v260_v26, %v276_v25  ;;  %v352_v35 = vcombine.low %v327_v18, %v335_v22  ;;  %v300_v47 = vcombine.low %v267_v28, %v283_v27 }
 0x29b   :  { %v368_v37 = vcombine.low %v343_v23, %v351_v24  ;;  %v301_v48 = vcombine.high %v267_v28, %v283_v27  ;;  %v353_v49 = vcombine.high %v327_v18, %v335_v22  ;;  %v369_v50 = vcombine.high %v343_v23, %v351_v24 }
 0x29c   :  { %v292_v55 = vrot.slane %v284_v32, %v3059_v0  ;;  %v299_v57 = vrot.slane %v285_v33, %v3059_v0  ;;  %v3088_v59 = vrot.slane %v352_v35, %v3059_v0  ;;  %v308_v3 = vrot.slane %v300_v47, %v3059_v0 }
 0x29d   :  { %v3091_v60 = vrot.slane %v368_v37, %v3059_v0  ;;  %v315_v4 = vrot.slane %v301_v48, %v3059_v0  ;;  %v3096_v5 = vrot.slane %v353_v49, %v3059_v0  ;;  %v3099_v6 = vrot.slane %v369_v50, %v3059_v0 }
 0x29e   :  { %v388_v11 = vcombine.low %v292_v55, %v299_v57  ;;  %v2542_v12 = vcombine.high %v292_v55, %v299_v57 }
 0x29f   :  { %v2543_v22 = vcombine.high %v308_v3, %v315_v4 }
 0x2fc   :  { %v473_v20 = vpop.permute.xlu0 %472  ;;  %v469_v21 = vpop.permute.xlu1 %468 }
 0x2fd   :  { %v488_v29 = vcombine.low %v465_v10, %v473_v20  ;;  %v489_v30 = vcombine.high %v465_v10, %v473_v20 }
 0x2ff   :  { %v496_v51 = vrot.slane %v488_v29, %v3049_v56  ;;  %v503_v52 = vrot.slane %v489_v30, %v3049_v56 }
 0x300   :  { %v467_v31 = vpop.permute.xlu0 %466  ;;  %v477_v34 = vpop.permute.xlu1 %476 }
 0x301   :  { %v504_v38 = vcombine.low %v469_v21, %v477_v34  ;;  %v505_v39 = vcombine.high %v469_v21, %v477_v34  ;;  %v404_v21 = vcombine.low %v308_v3, %v315_v4 }
 0x303   :  { %v512_v53 = vrot.slane %v504_v38, %v3049_v56  ;;  %v519_v54 = vrot.slane %v505_v39, %v3049_v56 }
 0x304   :  { %v471_v58 = vpop.permute.xlu1 %470  ;;  %v475_v2 = vpop.permute.xlu0 %474 }
 0x305   :  { %v520_v61 = vcombine.low %v496_v51, %v512_v53  ;;  %v521_v62 = vcombine.high %v496_v51, %v512_v53  ;;  %v536_v63 = vcombine.low %v503_v52, %v519_v54  ;;  %v537_v1 = vcombine.high %v503_v52, %v519_v54 }
 0x306   :  { %v556_v13 = vcombine.low %v467_v31, %v475_v2  ;;  %v557_v14 = vcombine.high %v467_v31, %v475_v2 }
 0x307   :  { %v528_v7 = vrot.slane %v520_v61, %v3059_v0  ;;  %v535_v8 = vrot.slane %v521_v62, %v3059_v0  ;;  %v544_v9 = vrot.slane %v536_v63, %v3059_v0  ;;  %v551_v10 = vrot.slane %v537_v1, %v3059_v0 }
 0x308   :  { %v479_v16 = vpop.permute.xlu1 %478  ;;  %v564_v29 = vrot.slane %v556_v13, %v3049_v56  ;;  %v571_v30 = vrot.slane %v557_v14, %v3049_v56  ;;  %v403_v61 = vrot.slane %v2542_v12, %v3049_v56 }
 0x309   :  { %v624_v17 = vcombine.low %v528_v7, %v535_v8  ;;  %v2544_v18 = vcombine.high %v528_v7, %v535_v8  ;;  %v640_v19 = vcombine.low %v544_v9, %v551_v10  ;;  %v2545_v20 = vcombine.high %v544_v9, %v551_v10 }
 0x30a   :  { %v572_v23 = vcombine.low %v471_v58, %v479_v16  ;;  %v573_v24 = vcombine.high %v471_v58, %v479_v16  ;;  %v3122_v58 = vrot.slane %v388_v11, %v3049_v56  ;;  %v411_v7 = vrot.slane %v404_v21, %v3049_v56 }
 0x30b   :  { %v631_v25 = vrot.slane %v624_v17, %v3049_v56  ;;  %v639_v26 = vrot.slane %v2544_v18, %v3049_v56  ;;  %v647_v27 = vrot.slane %v640_v19, %v3049_v56  ;;  %v655_v28 = vrot.slane %v2545_v20, %v3049_v56 }
 0x30c   :  { %v580_v31 = vrot.slane %v572_v23, %v3049_v56  ;;  %v587_v32 = vrot.slane %v573_v24, %v3049_v56  ;;  %v419_v8 = vrot.slane %v2543_v22, %v3049_v56  ;;  %v384_v22 = vcombine.low %v3088_v59, %v3091_v60 }
 0x30d   :  { %v656_v33 = vcombine.low %v631_v25, %v639_v26  ;;  %v672_v34 = vcombine.low %v647_v27, %v655_v28  ;;  %v657_v35 = vcombine.high %v631_v25, %v639_v26  ;;  %v673_v37 = vcombine.high %v647_v27, %v655_v28 }
 0x30e   :  { %v588_v38 = vcombine.low %v564_v29, %v580_v31  ;;  %v589_v39 = vcombine.high %v564_v29, %v580_v31  ;;  %v604_v47 = vcombine.low %v571_v30, %v587_v32  ;;  %v605_v48 = vcombine.high %v571_v30, %v587_v32 }
 0x30f   :  { %v664_v49 = vrot.slane %v656_v33, %v3059_v0  ;;  %v680_v50 = vrot.slane %v672_v34, %v3059_v0  ;;  %v671_v51 = vrot.slane %v657_v35, %v3059_v0  ;;  %v687_v52 = vrot.slane %v673_v37, %v3059_v0 }
 0x310   :  { %v596_v53 = vrot.slane %v588_v38, %v3059_v0  ;;  %v603_v54 = vrot.slane %v589_v39, %v3059_v0  ;;  %v612_v55 = vrot.slane %v604_v47, %v3059_v0  ;;  %v619_v57 = vrot.slane %v605_v48, %v3059_v0 }
 0x311   :  { %v688_v62 = vcombine.low %v664_v49, %v680_v50  ;;  %v690_v63 = vcombine.low %v671_v51, %v687_v52  ;;  %v689_v18 = vcombine.high %v664_v49, %v680_v50  ;;  %v386_v23 = vcombine.low %v3096_v5, %v3099_v6 }
 0x312   :  { %v692_v1 = vcombine.low %v596_v53, %v603_v54  ;;  %v2546_v2 = vcombine.high %v596_v53, %v603_v54  ;;  %v708_v3 = vcombine.low %v612_v55, %v619_v57  ;;  %v2547_v4 = vcombine.high %v612_v55, %v619_v57 }
 0x313   :  { %v760_v9 = vpack.c.bf16 %v688_v62, %v688_v62  ;;  %v762_v10 = vpack.c.bf16 %v690_v63, %v690_v63  ;;  %v420_v27 = vcombine.low %v3122_v58, %v403_v61  ;;  %v436_v28 = vcombine.low %v411_v7, %v419_v8 }
 0x314   :  { %v699_v13 = vrot.slane %v692_v1, %v3049_v56  ;;  %v707_v14 = vrot.slane %v2546_v2, %v3049_v56  ;;  %v715_v11 = vrot.slane %v708_v3, %v3049_v56  ;;  %v723_v12 = vrot.slane %v2547_v4, %v3049_v56 }
 0x315   :  { %v1077_v16 = vsel %vm1072_vm2, %v760_v9, 0  ;;  %v1169_v17 = vsel %vm1072_vm2, %v762_v10, 0  ;;  %v761_v29 = vpack.c.bf16 %v689_v18, %v689_v18  ;;  %v456_v33 = vpack.c.bf16 %v384_v22, %v384_v22 }
 0x316   :  { %2651 = vmatpush3.bf16.xpose.msra.mxu0 %v1077_v16  ;;  %2663 = vmatpush3.bf16.xpose.msra.mxu1 %v1169_v17  ;;  %v724_v19 = vcombine.low %v699_v13, %v707_v14  ;;  %v740_v20 = vcombine.low %v715_v11, %v723_v12  ;;  %v725_v21 = vcombine.high %v699_v13, %v707_v14 }
 0x317   :  { %2656 = vmatprep.subr.bf16.mxu0 %v2895_v15  ;;  %2674 = vmatprep.subr.bf16.mxu1 %v2895_v15  ;;  %v741_v24 = vcombine.high %v715_v11, %v723_v12  ;;  %v458_v34 = vpack.c.bf16 %v386_v23, %v386_v23  ;;  %v428_v37 = vrot.slane %v420_v27, %v3059_v0  ;;  %v1123_v39 = vsel %vm1072_vm2, %v761_v29, 0 }
 0x318   :  { %v732_v25 = vrot.slane %v724_v19, %v3059_v0  ;;  %v748_v26 = vrot.slane %v740_v20, %v3059_v0  ;;  %v739_v31 = vrot.slane %v725_v21, %v3059_v0  ;;  %v444_v38 = vrot.slane %v436_v28, %v3059_v0 }
 0x319   :  { %v755_v32 = vrot.slane %v741_v24, %v3059_v0  ;;  %v691_v47 = vcombine.high %v671_v51, %v687_v52  ;;  %v385_v50 = vcombine.high %v3088_v59, %v3091_v60  ;;  %v421_v51 = vcombine.high %v3122_v58, %v403_v61 }
 0x31a   :  { %v756_v30 = vcombine.low %v732_v25, %v748_v26  ;;  %v452_v53 = vcombine.low %v428_v37, %v444_v38  ;;  %v437_v52 = vcombine.high %v411_v7, %v419_v8  ;;  %v757_v60 = vcombine.high %v732_v25, %v748_v26 }
 0x31b   :  { %v758_v49 = vcombine.low %v739_v31, %v755_v32  ;;  %v763_v54 = vpack.c.bf16 %v691_v47, %v691_v47  ;;  %v457_v57 = vpack.c.bf16 %v385_v50, %v385_v50  ;;  %v435_v63 = vrot.slane %v421_v51, %v3059_v0 }
 0x31c   :  { %v764_v35 = vpack.c.bf16 %v756_v30, %v756_v30  ;;  %v460_v62 = vpack.c.bf16 %v452_v53, %v452_v53  ;;  %v451_v1 = vrot.slane %v437_v52, %v3059_v0  ;;  %v387_v58 = vcombine.high %v3096_v5, %v3099_v6 }
 0x31d   :  { %2653 = vmatmul.mubr.msk.bf16.vlgmr.msra.gmra.mrb[4].mxu0 %vm1072_vm2, %v456_v33  ;;  %2665 = vmatmul.mubr.msk.bf16.vlgmr.msra.gmra.mrb[0].mxu1 %vm1072_vm2, %v458_v34  ;;  %v766_v55 = vpack.c.bf16 %v758_v49, %v758_v49  ;;  %v1215_v59 = vsel %vm1072_vm2, %v763_v54, 0  ;;  %v765_v3 = vpack.c.bf16 %v757_v60, %v757_v60  ;;  %v759_v5 = vcombine.high %v739_v31, %v755_v32 }
 0x31e   :  { %2657 = vmatpush3.bf16.xpose.msra.mxu0 %v1123_v39  ;;  %v1261_v48 = vsel %vm1072_vm2, %v764_v35, 0  ;;  %2658 = vmatprep.mubr.msk.bf16.mxu0 %vm2896_vm1, %v2895_v15  ;;  %v454_v61 = vcombine.low %v435_v63, %v451_v1  ;;  %v459_v4 = vpack.c.bf16 %v387_v58, %v387_v58  ;;  %v453_v6 = vcombine.high %v428_v37, %v444_v38 }
 0x31f   :  { %2675 = vmatpush3.bf16.xpose.msra.mxu1 %v1261_v48  ;;  %2676 = vmatprep.mubr.msk.bf16.mxu1 %vm2896_vm1, %v2895_v15  ;;  %v1353_v2 = vsel %vm1072_vm2, %v766_v55, 0  ;;  %v1307_v8 = vsel %vm1072_vm2, %v765_v3, 0  ;;  %v767_v9 = vpack.c.bf16 %v759_v5, %v759_v5  ;;  %v455_v14 = vcombine.high %v435_v63, %v451_v1 }
 0x320   :  { %2668 = vmatprep.subr.bf16.mxu0 %v2895_v15  ;;  %2686 = vmatprep.subr.bf16.mxu1 %v2895_v15  ;;  %v462_v7 = vpack.c.bf16 %v454_v61, %v454_v61  ;;  %v461_v10 = vpack.c.bf16 %v453_v6, %v453_v6 }
 0x321   :  { %v1399_v13 = vsel %vm1072_vm2, %v767_v9, 0  ;;  %v463_v11 = vpack.c.bf16 %v455_v14, %v455_v14 }
 0x325   :  { %2659 = vmatmul.mubr.msk.bf16.vlgmr.msra.gmra.mrb[8].mxu0 %vm1072_vm2, %v457_v57 }
 0x326   :  { %2677 = vmatmul.mubr.msk.bf16.vlgmr.msra.gmra.mrb[4].mxu1 %vm1072_vm2, %v460_v62  ;;  %2669 = vmatpush3.bf16.xpose.msra.mxu0 %v1215_v59 }
 0x327   :  { %2687 = vmatpush3.bf16.xpose.msra.mxu1 %v1353_v2  ;;  %2670 = vmatprep.mubr.msk.bf16.mxu0 %vm2896_vm1, %v2895_v15 }
 0x328   :  { %2688 = vmatprep.mubr.msk.bf16.mxu1 %vm2896_vm1, %v2895_v15  ;;  %2680 = vmatprep.subr.bf16.mxu0 %v2895_v15 }
 0x329   :  { %2698 = vmatprep.subr.bf16.mxu1 %v2895_v15 }
 0x32d   :  { %2671 = vmatmul.mubr.msk.bf16.vlgmr.msra.gmra.mrb[12].mxu0 %vm1072_vm2, %v459_v4 }
 0x32e   :  { %2689 = vmatmul.mubr.msk.bf16.vlgmr.msra.gmra.mrb[8].mxu1 %vm1072_vm2, %v462_v7  ;;  %2681 = vmatpush3.bf16.xpose.msra.mxu0 %v1307_v8 }
 0x32f   :  { %2682 = vmatprep.mubr.msk.bf16.mxu0 %vm2896_vm1, %v2895_v15  ;;  %2692 = vmatprep.subr.bf16.mxu0 %v2895_v15 }
 0x330   :  { %2700 = vmatprep.mubr.msk.bf16.mxu1 %vm2896_vm1, %v2895_v15 }
 0x335   :  { %2683 = vmatmul.mubr.msk.bf16.vlgmr.msra.gmra.mrb[16].mxu0 %vm1072_vm2, %v461_v10 }
 0x336   :  { %2693 = vmatpush3.bf16.xpose.msra.mxu0 %v1399_v13  ;;  %2694 = vmatprep.mubr.msk.bf16.mxu0 %vm2896_vm1, %v2895_v15 }
 0x337   :  { %2704 = vmatprep.subr.bf16.mxu0 %v2895_v15 }
 0x33d   :  { %2695 = vmatmul.mubr.msk.bf16.vlgmr.msra.gmra.mrb[20].mxu0 %vm1072_vm2, %v463_v11 }
 0x33e   :  { %2706 = vmatprep.mubr.msk.bf16.mxu0 %vm2896_vm1, %v2895_v15 }
 0x3f0   :  { %v1113_v12 = vpop.f32.mrb[4].mxu0  ;;  %v1205_v16 = vpop.f32.mrb[0].mxu1 }
 0x3f1   :  { %v2654_v17 = vpop.f32.mrb[5].mxu0  ;;  %v2666_v18 = vpop.f32.mrb[1].mxu1  ;;  %v1441_v19 = vsel %vm1072_vm2, %v1113_v12, -inf  ;;  %v1447_v24 = vsel %vm1072_vm2, %v1205_v16, -inf }
 0x3f2   :  { %v1208_v20 = vpop.f32.mrb[2].mxu1  ;;  %1442 = vmax.xlane.f32.xlu0 %v1441_v19  ;;  %v1116_v21 = vpop.f32.mrb[6].mxu0 }
 0x3f3   :  { %v2655_v22 = vpop.f32.mrb[7].mxu0  ;;  %v2667_v23 = vpop.f32.mrb[3].mxu1 }
 0x3f6   :  { %1448 = vmax.xlane.f32.xlu0 %v1447_v24 }
 0x3f8   :  { %v1159_v25 = vpop.f32.mrb[8].mxu0 }
 0x3f9   :  { %v1297_v26 = vpop.f32.mrb[4].mxu1  ;;  %v2660_v27 = vpop.f32.mrb[9].mxu0  ;;  %v1444_v28 = vsel %vm1072_vm2, %v1159_v25, -inf }
 0x3fa   :  { %v2678_v29 = vpop.f32.mrb[5].mxu1  ;;  %v1453_v30 = vsel %vm1072_vm2, %v1297_v26, -inf  ;;  %1445 = vmax.xlane.f32.xlu1 %v1444_v28  ;;  %v1162_v31 = vpop.f32.mrb[10].mxu0 }
 0x3fb   :  { %v1300_v32 = vpop.f32.mrb[6].mxu1  ;;  %1454 = vmax.xlane.f32.xlu0 %v1453_v30  ;;  %v2661_v33 = vpop.f32.mrb[11].mxu0 }
 0x3fc   :  { %v2679_v34 = vpop.f32.mrb[7].mxu1 }
 0x400   :  { %v1251_v35 = vpop.f32.mrb[12].mxu0 }
 0x401   :  { %v3193_v37 = vpop.f32.mrb[8].mxu1  ;;  %v2672_v38 = vpop.f32.mrb[13].mxu0  ;;  %v1450_v39 = vsel %vm1072_vm2, %v1251_v35, -inf }
 0x402   :  { %v2690_v47 = vpop.f32.mrb[9].mxu1  ;;  %1451 = vmax.xlane.f32.xlu0 %v1450_v39  ;;  %v1254_v48 = vpop.f32.mrb[14].mxu0  ;;  %v1459_v51 = vsel %vm1072_vm2, %v3193_v37, -inf }
 0x403   :  { %v1392_v49 = vpop.f32.mrb[10].mxu1  ;;  %v2673_v50 = vpop.f32.mrb[15].mxu0 }
 0x404   :  { %v2691_v53 = vpop.f32.mrb[11].mxu1 }
 0x406   :  { %1460 = vmax.xlane.f32.xlu0 %v1459_v51 }
 0x408   :  { %v1343_v52 = vpop.f32.mrb[16].mxu0 }
 0x409   :  { %v2684_v54 = vpop.f32.mrb[17].mxu0  ;;  %v1456_v60 = vsel %vm1072_vm2, %v1343_v52, -inf }
 0x40a   :  { %v1346_v55 = vpop.f32.mrb[18].mxu0 }
 0x40b   :  { %772 = vrot.lane.b32.xlu1 %v3028_v42, %s2903_s22  ;;  %v2685_v57 = vpop.f32.mrb[19].mxu0 }
 0x40f   :  { %776 = vrot.lane.b32.xlu1 %v3026_v41, %s2903_s22 }
 0x410   :  { %v3202_v62 = vpop.f32.mrb[20].mxu0 }
 0x411   :  { %v2696_v63 = vpop.f32.mrb[21].mxu0  ;;  %v1462_v2 = vsel %vm1072_vm2, %v3202_v62, -inf }
 0x412   :  { %v1438_v1 = vpop.f32.mrb[22].mxu0 }
 0x413   :  { %v2697_v59 = vpop.f32.mrb[23].mxu0 }
 0x41c   :  { %768 = vrot.lane.b32.xlu0 %v3015_v36, %s2903_s22 }
 0x433   :  { %1457 = vmax.xlane.f32.xlu1 %v1456_v60 }
 0x437   :  { %1463 = vmax.xlane.f32.xlu1 %v1462_v2 }
 0x448   :  { %780 = vrot.lane.b32.xlu1 %v3032_v43, %s2903_s22 }
 0x47f   :  { %v1443_v42 = vpop.xlane.xlu0 %1442 }
 0x480   :  { %v1465_v41 = vsub.f32 %v1113_v12, %v1443_v42 }
 0x482   :  { %v1473_v58 = vmul.f32 1.442695, %v1465_v41 }
 0x483   :  { %v1449_v61 = vpop.xlane.xlu0 %1448 }
 0x484   :  { %2829 = vpow2.f32 %v1473_v58  ;;  %v1467_v3 = vsub.f32 %v1205_v16, %v1449_v61 }
 0x486   :  { %v1477_v4 = vmul.f32 1.442695, %v1467_v3 }
 0x487   :  { %v1446_v7 = vpop.xlane.xlu1 %1445 }
 0x488   :  { %2831 = vpow2.f32 %v1477_v4  ;;  %v1455_v36 = vpop.xlane.xlu0 %1454  ;;  %v1466_v8 = vsub.f32 %v1159_v25, %v1446_v7 }
 0x489   :  { %v1469_v5 = vsub.f32 %v1297_v26, %v1455_v36 }
 0x48a   :  { %v1475_v6 = vmul.f32 1.442695, %v1466_v8 }
 0x48b   :  { %v1481_v9 = vmul.f32 1.442695, %v1469_v5  ;;  %v773_v23 = vpop.permute.xlu1 %772 }
 0x48c   :  { %2833 = vpow2.f32 %v1475_v6 }
 0x48d   :  { %2835 = vpow2.f32 %v1481_v9 }
 0x48e   :  { %v3211_v10 = vpop.eup %2829 }
 0x48f   :  { %v1452_v13 = vpop.xlane.xlu0 %1451  ;;  %v1489_v43 = vsel %vm1072_vm2, %v3211_v10, 0.0  ;;  %v777_v24 = vpop.permute.xlu1 %776 }
 0x490   :  { %v1468_v14 = vsub.f32 %v1251_v35, %v1452_v13  ;;  %1490 = vadd.xlane.f32.xlu0 %v1489_v43 }
 0x492   :  { %v3215_v11 = vpop.eup %2831  ;;  %v1479_v12 = vmul.f32 1.442695, %v1468_v14 }
 0x493   :  { %v1495_v16 = vsel %vm1072_vm2, %v3215_v11, 0.0  ;;  %v3237_v25 = vpop.xlane.xlu0 %1460 }
 0x494   :  { %2837 = vpow2.f32 %v1479_v12  ;;  %1496 = vadd.xlane.f32.xlu0 %v1495_v16 }
 0x496   :  { %v3219_v17 = vpop.eup %2833 }
 0x497   :  { %v3221_v18 = vpop.eup %2835  ;;  %v1492_v19 = vsel %vm1072_vm2, %v3219_v17, 0.0  ;;  %v769_v29 = vpop.permute.xlu0 %768 }
 0x498   :  { %v1501_v20 = vsel %vm1072_vm2, %v3221_v18, 0.0  ;;  %1493 = vadd.xlane.f32.xlu1 %v1492_v19  ;;  %v792_v32 = vcombine.low %v769_v29, %v777_v24 }
 0x499   :  { %1502 = vadd.xlane.f32.xlu0 %v1501_v20 }
 0x49a   :  { %v800_v38 = vrot.slane %v792_v32, %v3049_v56 }
 0x49e   :  { %v3227_v21 = vpop.eup %2837 }
 0x49f   :  { %v1498_v22 = vsel %vm1072_vm2, %v3227_v21, 0.0 }
 0x4a0   :  { %1499 = vadd.xlane.f32.xlu1 %v1498_v22 }
 0x4b1   :  { %774 = vrot.lane.b32.xlu1 %v3038_v45, %s2903_s22  ;;  %v793_v45 = vcombine.high %v769_v29, %v777_v24  ;;  %v1471_v24 = vsub.f32 %v3193_v37, %v3237_v25 }
 0x4b5   :  { %778 = vrot.lane.b32.xlu1 %v3036_v44, %s2903_s22 }
 0x4b9   :  { %782 = vrot.lane.b32.xlu1 %v3042_v46, %s2903_s22  ;;  %v807_v46 = vrot.slane %v793_v45, %v3049_v56 }
 0x4c0   :  { %v1458_v26 = vpop.xlane.xlu1 %1457 }
 0x4c1   :  { %v1470_v27 = vsub.f32 %v1343_v52, %v1458_v26  ;;  %v1485_v26 = vmul.f32 1.442695, %v1471_v24 }
 0x4c3   :  { %v1483_v28 = vmul.f32 1.442695, %v1470_v27 }
 0x4c4   :  { %v1464_v30 = vpop.xlane.xlu1 %1463 }
 0x4c5   :  { %2839 = vpow2.f32 %v1483_v28  ;;  %v1472_v31 = vsub.f32 %v3202_v62, %v1464_v30 }
 0x4c7   :  { %v1487_v35 = vmul.f32 1.442695, %v1472_v31 }
 0x4c8   :  { %v781_v33 = vpop.permute.xlu1 %780 }
 0x4c9   :  { %v808_v34 = vcombine.low %v773_v23, %v781_v33  ;;  %v809_v44 = vcombine.high %v773_v23, %v781_v33  ;;  %2841 = vpow2.f32 %v1487_v35 }
 0x4ca   :  { %2843 = vpow2.f32 %v1485_v26 }
 0x4cb   :  { %v816_v39 = vrot.slane %v808_v34, %v3049_v56  ;;  %v823_v47 = vrot.slane %v809_v44, %v3049_v56 }
 0x4cd   :  { %v824_v48 = vcombine.low %v800_v38, %v816_v39  ;;  %v825_v49 = vcombine.high %v800_v38, %v816_v39  ;;  %v840_v50 = vcombine.low %v807_v46, %v823_v47  ;;  %v841_v53 = vcombine.high %v807_v46, %v823_v47 }
 0x4cf   :  { %v3244_v51 = vpop.eup %2839  ;;  %v832_v52 = vrot.slane %v824_v48, %v3059_v0  ;;  %v839_v54 = vrot.slane %v825_v49, %v3059_v0  ;;  %v848_v55 = vrot.slane %v840_v50, %v3059_v0  ;;  %v855_v57 = vrot.slane %v841_v53, %v3059_v0 }
 0x4d0   :  { %v1504_v62 = vsel %vm1072_vm2, %v3244_v51, 0.0 }
 0x4d1   :  { %v928_v63 = vcombine.low %v832_v52, %v839_v54  ;;  %v2548_v1 = vcombine.high %v832_v52, %v839_v54  ;;  %v944_v59 = vcombine.low %v848_v55, %v855_v57  ;;  %v2549_v60 = vcombine.high %v848_v55, %v855_v57  ;;  %1505 = vadd.xlane.f32.xlu0 %v1504_v62 }
 0x4d3   :  { %v935_v2 = vrot.slane %v928_v63, %v3049_v56  ;;  %v943_v42 = vrot.slane %v2548_v1, %v3049_v56  ;;  %v951_v41 = vrot.slane %v944_v59, %v3049_v56  ;;  %v959_v58 = vrot.slane %v2549_v60, %v3049_v56  ;;  %v3260_v9 = vpop.eup %2841 }
 0x4d4   :  { %v1510_v20 = vsel %vm1072_vm2, %v3260_v9, 0.0  ;;  %v3272_v27 = vpop.eup %2843 }
 0x4d5   :  { %v960_v61 = vcombine.low %v935_v2, %v943_v42  ;;  %v976_v3 = vcombine.low %v951_v41, %v959_v58  ;;  %v961_v4 = vcombine.high %v935_v2, %v943_v42  ;;  %v977_v7 = vcombine.high %v951_v41, %v959_v58 }
 0x4d6   :  { %v1507_v28 = vsel %vm1072_vm2, %v3272_v27, 0.0 }
 0x4d7   :  { %v968_v36 = vrot.slane %v960_v61, %v3059_v0  ;;  %v984_v8 = vrot.slane %v976_v3, %v3059_v0  ;;  %v975_v5 = vrot.slane %v961_v4, %v3059_v0  ;;  %v991_v6 = vrot.slane %v977_v7, %v3059_v0 }
 0x4d9   :  { %v992_v13 = vcombine.low %v968_v36, %v984_v8  ;;  %v993_v43 = vcombine.high %v968_v36, %v984_v8  ;;  %v994_v14 = vcombine.low %v975_v5, %v991_v6  ;;  %v995_v12 = vcombine.high %v975_v5, %v991_v6 }
 0x4db   :  { %v1064_v16 = vpack.c.bf16 %v992_v13, %v992_v13  ;;  %v1065_v19 = vpack.c.bf16 %v993_v43, %v993_v43  ;;  %v1066_v45 = vpack.c.bf16 %v994_v14, %v994_v14  ;;  %v1067_v38 = vpack.c.bf16 %v995_v12, %v995_v12 }
 0x4dd   :  { %1511 = vadd.xlane.f32.xlu1 %v1510_v20  ;;  %v1542_v22 = vsel %vm1540_vm3, %v1064_v16, 0  ;;  %v1588_v23 = vsel %vm1540_vm3, %v1065_v19, 0  ;;  %v1634_v25 = vsel %vm1540_vm3, %v1066_v45, 0  ;;  %v1680_v47 = vsel %vm1540_vm3, %v1067_v38, 0 }
 0x4de   :  { %2699 = vmatpush3.bf16.msra.mxu1 %v1542_v22  ;;  %2705 = vmatpush3.bf16.msra.mxu0 %v1588_v23 }
 0x4df   :  { %2710 = vmatprep.subr.bf16.mxu1 %v2895_v15  ;;  %2716 = vmatprep.subr.bf16.mxu0 %v2895_v15 }
 0x4e7   :  { %770 = vrot.lane.b32.xlu0 %v3019_v40, %s2903_s22 }
 0x506   :  { %1508 = vadd.xlane.f32.xlu0 %v1507_v28 }
 0x51d   :  { %v1491_v29 = vpop.xlane.xlu0 %1490 }
 0x51e   :  { %2845 = vrcp.f32 %v1491_v29 }
 0x521   :  { %v1497_v30 = vpop.xlane.xlu0 %1496 }
 0x522   :  { %2847 = vrcp.f32 %v1497_v30 }
 0x525   :  { %v1494_v31 = vpop.xlane.xlu1 %1493 }
 0x526   :  { %2849 = vrcp.f32 %v1494_v31  ;;  %v1503_v53 = vpop.xlane.xlu0 %1502 }
 0x528   :  { %v2846_v32 = vpop.eup %2845 }
 0x529   :  { %v1521_v40 = vmul.f32 %v2846_v32, %v3211_v10 }
 0x52b   :  { %v1529_v33 = vpack.c.bf16 %v1521_v40, %v1521_v40 }
 0x52c   :  { %v2848_v37 = vpop.eup %2847 }
 0x52d   :  { %2701 = vmatmul.mubr.msk.bf16.vlgmr.msra.gmra.mrb[12].mxu1 %vm1072_vm2, %v1529_v33  ;;  %v1500_v34 = vpop.xlane.xlu1 %1499  ;;  %v1523_v44 = vmul.f32 %v2848_v37, %v3215_v11 }
 0x52e   :  { %2711 = vmatpush3.bf16.msra.mxu1 %v1634_v25  ;;  %2851 = vrcp.f32 %v1500_v34  ;;  %2712 = vmatprep.mubr.msk.bf16.mxu1 %vm2896_vm1, %v2895_v15 }
 0x52f   :  { %2722 = vmatprep.subr.bf16.mxu1 %v2895_v15  ;;  %v1531_v39 = vpack.c.bf16 %v1523_v44, %v1523_v44  ;;  %2853 = vrcp.f32 %v1503_v53 }
 0x530   :  { %v2850_v35 = vpop.eup %2849 }
 0x531   :  { %v1522_v10 = vmul.f32 %v2850_v35, %v3219_v17  ;;  %v775_v49 = vpop.permute.xlu1 %774 }
 0x533   :  { %v1530_v46 = vpack.c.bf16 %v1522_v10, %v1522_v10 }
 0x535   :  { %2707 = vmatmul.mubr.msk.bf16.vlgmr.msra.gmra.mrb[24].mxu0 %vm1072_vm2, %v1530_v46  ;;  %2713 = vmatmul.mubr.msk.bf16.vlgmr.msra.gmra.mrb[16].mxu1 %vm1072_vm2, %v1531_v39  ;;  %v779_v50 = vpop.permute.xlu1 %778 }
 0x536   :  { %2717 = vmatpush3.bf16.msra.mxu0 %v1680_v47  ;;  %2718 = vmatprep.mubr.msk.bf16.mxu0 %vm2896_vm1, %v2895_v15 }
 0x537   :  { %2728 = vmatprep.subr.bf16.mxu0 %v2895_v15  ;;  %2724 = vmatprep.mubr.msk.bf16.mxu1 %vm2896_vm1, %v2895_v15 }
 0x538   :  { %v2852_v11 = vpop.eup %2851 }
 0x539   :  { %v1524_v17 = vmul.f32 %v2852_v11, %v3227_v21  ;;  %v783_v52 = vpop.permute.xlu1 %782  ;;  %v2854_v26 = vpop.eup %2853 }
 0x53a   :  { %v876_v55 = vcombine.low %v775_v49, %v783_v52  ;;  %v877_v57 = vcombine.high %v775_v49, %v783_v52  ;;  %v1525_v25 = vmul.f32 %v2854_v26, %v3221_v18 }
 0x53b   :  { %v1532_v48 = vpack.c.bf16 %v1524_v17, %v1524_v17 }
 0x53c   :  { %v884_v59 = vrot.slane %v876_v55, %v3049_v56  ;;  %v891_v21 = vrot.slane %v877_v57, %v3049_v56  ;;  %v1533_v47 = vpack.c.bf16 %v1525_v25, %v1525_v25 }
 0x53d   :  { %2719 = vmatmul.mubr.msk.bf16.vlgmr.msra.gmra.mrb[28].mxu0 %vm1072_vm2, %v1532_v48 }
 0x53e   :  { %2730 = vmatprep.mubr.msk.bf16.mxu0 %vm2896_vm1, %v2895_v15 }
 0x55e   :  { %v1506_v54 = vpop.xlane.xlu0 %1505 }
 0x55f   :  { %2855 = vrcp.f32 %v1506_v54 }
 0x562   :  { %v771_v62 = vpop.permute.xlu0 %770 }
 0x563   :  { %v860_v63 = vcombine.low %v771_v62, %v779_v50  ;;  %v861_v1 = vcombine.high %v771_v62, %v779_v50 }
 0x565   :  { %v868_v60 = vrot.slane %v860_v63, %v3049_v56  ;;  %v875_v2 = vrot.slane %v861_v1, %v3049_v56 }
 0x567   :  { %v892_v42 = vcombine.low %v868_v60, %v884_v59  ;;  %v893_v41 = vcombine.high %v868_v60, %v884_v59  ;;  %v908_v58 = vcombine.low %v875_v2, %v891_v21  ;;  %v909_v61 = vcombine.high %v875_v2, %v891_v21 }
 0x569   :  { %v900_v3 = vrot.slane %v892_v42, %v3059_v0  ;;  %v907_v4 = vrot.slane %v893_v41, %v3059_v0  ;;  %v916_v7 = vrot.slane %v908_v58, %v3059_v0  ;;  %v923_v36 = vrot.slane %v909_v61, %v3059_v0  ;;  %v2856_v32 = vpop.eup %2855 }
 0x56a   :  { %v1512_v19 = vpop.xlane.xlu1 %1511  ;;  %v1526_v34 = vmul.f32 %v2856_v32, %v3244_v51 }
 0x56b   :  { %v996_v8 = vcombine.low %v900_v3, %v907_v4  ;;  %v2550_v5 = vcombine.high %v900_v3, %v907_v4  ;;  %v1012_v6 = vcombine.low %v916_v7, %v923_v36  ;;  %v2551_v13 = vcombine.high %v916_v7, %v923_v36 }
 0x56c   :  { %2857 = vrcp.f32 %v1512_v19  ;;  %v1534_v11 = vpack.c.bf16 %v1526_v34, %v1526_v34 }
 0x56d   :  { %v1003_v43 = vrot.slane %v996_v8, %v3049_v56  ;;  %v1011_v14 = vrot.slane %v2550_v5, %v3049_v56  ;;  %v1019_v12 = vrot.slane %v1012_v6, %v3049_v56  ;;  %v1027_v16 = vrot.slane %v2551_v13, %v3049_v56 }
 0x56f   :  { %v1028_v20 = vcombine.low %v1003_v43, %v1011_v14  ;;  %v1044_v22 = vcombine.low %v1019_v12, %v1027_v16  ;;  %v1029_v23 = vcombine.high %v1003_v43, %v1011_v14  ;;  %v1045_v24 = vcombine.high %v1019_v12, %v1027_v16 }
 0x571   :  { %v1036_v28 = vrot.slane %v1028_v20, %v3059_v0  ;;  %v1052_v29 = vrot.slane %v1044_v22, %v3059_v0  ;;  %v1043_v30 = vrot.slane %v1029_v23, %v3059_v0  ;;  %v1059_v31 = vrot.slane %v1045_v24, %v3059_v0 }
 0x573   :  { %v1060_v40 = vcombine.low %v1036_v28, %v1052_v29  ;;  %v1061_v45 = vcombine.high %v1036_v28, %v1052_v29  ;;  %v1062_v33 = vcombine.low %v1043_v30, %v1059_v31  ;;  %v1063_v37 = vcombine.high %v1043_v30, %v1059_v31 }
 0x575   :  { %v1068_v44 = vpack.c.bf16 %v1060_v40, %v1060_v40  ;;  %v1069_v35 = vpack.c.bf16 %v1061_v45, %v1061_v45  ;;  %v1070_v46 = vpack.c.bf16 %v1062_v33, %v1062_v33  ;;  %v1071_v39 = vpack.c.bf16 %v1063_v37, %v1063_v37 }
 0x576   :  { %v2858_v17 = vpop.eup %2857 }
 0x577   :  { %v1726_v10 = vsel %vm1540_vm3, %v1068_v44, 0  ;;  %v1772_v38 = vsel %vm1540_vm3, %v1069_v35, 0  ;;  %v1818_v18 = vsel %vm1540_vm3, %v1070_v46, 0  ;;  %v1864_v51 = vsel %vm1540_vm3, %v1071_v39, 0 }
 0x578   :  { %2723 = vmatpush3.bf16.msra.mxu1 %v1726_v10  ;;  %2729 = vmatpush3.bf16.msra.mxu0 %v1772_v38  ;;  %v1528_v48 = vmul.f32 %v2858_v17, %v3260_v9 }
 0x579   :  { %2734 = vmatprep.subr.bf16.mxu1 %v2895_v15  ;;  %2740 = vmatprep.subr.bf16.mxu0 %v2895_v15 }
 0x57a   :  { %v1536_v49 = vpack.c.bf16 %v1528_v48, %v1528_v48 }
 0x57b   :  { %2725 = vmatmul.mubr.msk.bf16.vlgmr.msra.gmra.mrb[20].mxu1 %vm1072_vm2, %v1533_v47  ;;  %2731 = vmatmul.mubr.msk.bf16.vlgmr.msra.gmra.mrb[32].mxu0 %vm1072_vm2, %v1534_v11 }
 0x57c   :  { %2735 = vmatpush3.bf16.msra.mxu1 %v1818_v18  ;;  %2741 = vmatpush3.bf16.msra.mxu0 %v1864_v51 }
 0x57d   :  { %2742 = vmatprep.mubr.msk.bf16.mxu0 %vm2896_vm1, %v2895_v15  ;;  %2736 = vmatprep.mubr.msk.bf16.mxu1 %vm2896_vm1, %v2895_v15 }
 0x57e   :  { %2746 = vmatprep.subr.bf16.mxu1 %v2895_v15  ;;  %2754 = vmatprep.subr.bf16.mxu0 %v2895_v15 }
 0x583   :  { %2743 = vmatmul.mubr.msk.bf16.vlgmr.msra.gmra.mrb[36].mxu0 %vm1072_vm2, %v1536_v49 }
 0x584   :  { %2758 = vmatprep.mubr.msk.bf16.mxu0 %vm2896_vm1, %v2895_v15 }
 0x593   :  { %v1509_v50 = vpop.xlane.xlu0 %1508 }
 0x594   :  { %2859 = vrcp.f32 %v1509_v50 }
 0x59e   :  { %v2860_v53 = vpop.eup %2859 }
 0x59f   :  { %v1527_v9 = vmul.f32 %v2860_v53, %v3272_v27 }
 0x5a1   :  { %v1535_v52 = vpack.c.bf16 %v1527_v9, %v1527_v9 }
 0x5a3   :  { %2737 = vmatmul.mubr.msk.bf16.vlgmr.msra.gmra.mrb[24].mxu1 %vm1072_vm2, %v1535_v52 }
 0x5a4   :  { %2750 = vmatprep.mubr.msk.bf16.mxu1 %vm2896_vm1, %v2895_v15 }
 0x600   :  { %v1578_v54 = vpop.f32.mrb[12].mxu1 }
 0x601   :  { %v2702_v55 = vpop.f32.mrb[13].mxu1 }
 0x602   :  { %v1581_v57 = vpop.f32.mrb[14].mxu1 }
 0x603   :  { %v2703_v62 = vpop.f32.mrb[15].mxu1 }
 0x608   :  { %v1624_v63 = vpop.f32.mrb[24].mxu0  ;;  %v1670_v1 = vpop.f32.mrb[16].mxu1 }
 0x609   :  { %v1906_v59 = vcombine.low %v1578_v54, %v1670_v1  ;;  %v1907_v21 = vcombine.high %v1578_v54, %v1670_v1  ;;  %v2708_v60 = vpop.f32.mrb[25].mxu0  ;;  %v2714_v2 = vpop.f32.mrb[17].mxu1 }
 0x60a   :  { %v1627_v42 = vpop.f32.mrb[26].mxu0  ;;  %v1673_v41 = vpop.f32.mrb[18].mxu1 }
 0x60b   :  { %v2709_v58 = vpop.f32.mrb[27].mxu0  ;;  %v2715_v27 = vpop.f32.mrb[19].mxu1  ;;  %v1914_v8 = vrot.slane %v1906_v59, %v3049_v56  ;;  %v1921_v5 = vrot.slane %v1907_v21, %v3049_v56 }
 0x610   :  { %v1716_v61 = vpop.f32.mrb[28].mxu0 }
 0x611   :  { %v1922_v3 = vcombine.low %v1624_v63, %v1716_v61  ;;  %v1923_v4 = vcombine.high %v1624_v63, %v1716_v61  ;;  %v2720_v7 = vpop.f32.mrb[29].mxu0 }
 0x612   :  { %v1719_v36 = vpop.f32.mrb[30].mxu0 }
 0x613   :  { %v1930_v6 = vrot.slane %v1922_v3, %v3049_v56  ;;  %v1937_v13 = vrot.slane %v1923_v4, %v3049_v56  ;;  %v2721_v43 = vpop.f32.mrb[31].mxu0 }
 0x615   :  { %v1938_v14 = vcombine.low %v1914_v8, %v1930_v6  ;;  %v1939_v12 = vcombine.high %v1914_v8, %v1930_v6  ;;  %v1954_v16 = vcombine.low %v1921_v5, %v1937_v13  ;;  %v1955_v19 = vcombine.high %v1921_v5, %v1937_v13 }
 0x617   :  { %v1946_v20 = vrot.slane %v1938_v14, %v3059_v0  ;;  %v1953_v22 = vrot.slane %v1939_v12, %v3059_v0  ;;  %v1962_v23 = vrot.slane %v1954_v16, %v3059_v0  ;;  %v1969_v24 = vrot.slane %v1955_v19, %v3059_v0  ;;  %v2813_v19 = vld [vmem:[%s3495_s5] sm:$0xff]  }
 0x618   :  { %2747 = vmatpush3.bf16.msra.mxu1 %v2813_v19 }
 0x619   :  { %v2042_v26 = vcombine.low %v1946_v20, %v1953_v22  ;;  %v2568_v28 = vcombine.high %v1946_v20, %v1953_v22  ;;  %v2058_v29 = vcombine.low %v1962_v23, %v1969_v24  ;;  %v2569_v30 = vcombine.high %v1962_v23, %v1969_v24  ;;  %2748 = vmatprep.subr.bf16.mxu1 %v2895_v15 }
 0x61b   :  { %v2049_v31 = vrot.slane %v2042_v26, %v3049_v56  ;;  %v2057_v32 = vrot.slane %v2568_v28, %v3049_v56  ;;  %v2065_v40 = vrot.slane %v2058_v29, %v3049_v56  ;;  %v2073_v45 = vrot.slane %v2569_v30, %v3049_v56 }
 0x61d   :  { %v2075_v33 = vcombine.high %v2049_v31, %v2057_v32  ;;  %v2091_v37 = vcombine.high %v2065_v40, %v2073_v45  ;;  %v2074_v25 = vcombine.low %v2049_v31, %v2057_v32  ;;  %v2090_v34 = vcombine.low %v2065_v40, %v2073_v45  ;;  %v2814_v31 = vld [vmem:[%s3495_s5 + $0x8] sm:$0xff]   ;;  %s2905_s5 = smov 8  }
 0x61e   :  { %2749 = vmatpush3.bf16.msra.mxu1 %v2814_v31 }
 0x61f   :  { %v3349_v44 = vrot.slane %v2075_v33, %v3059_v0  ;;  %v3352_v35 = vrot.slane %v2091_v37, %v3059_v0  ;;  %v3355_v10 = vrot.slane %v2074_v25, %v3059_v0  ;;  %v3358_v38 = vrot.slane %v2090_v34, %v3059_v0  ;;  %2762 = vmatprep.subr.bf16.mxu1 %v2895_v15 }
 0x621   :  { %v2108_v46 = vcombine.low %v3349_v44, %v3352_v35  ;;  %v2106_v39 = vcombine.low %v3355_v10, %v3358_v38  ;;  %v2107_v47 = vcombine.high %v3355_v10, %v3358_v38  ;;  %v2109_v11 = vcombine.high %v3349_v44, %v3352_v35  ;;  %v2572_v10 = vld [vmem:[%s3496_s6] ss:$0 sm:$0xff] }
 0x64e   :  { %v1762_v17 = vpop.f32.mrb[20].mxu1  ;;  %v1808_v18 = vpop.f32.mrb[32].mxu0 }
 0x64f   :  { %v2726_v51 = vpop.f32.mrb[21].mxu1  ;;  %v2732_v48 = vpop.f32.mrb[33].mxu0 }
 0x650   :  { %v1765_v49 = vpop.f32.mrb[22].mxu1  ;;  %v1811_v50 = vpop.f32.mrb[34].mxu0 }
 0x651   :  { %v2727_v53 = vpop.f32.mrb[23].mxu1  ;;  %v2733_v9 = vpop.f32.mrb[35].mxu0 }
 0x656   :  { %v1900_v52 = vpop.f32.mrb[36].mxu0 }
 0x657   :  { %v1990_v54 = vcombine.low %v1808_v18, %v1900_v52  ;;  %v1991_v55 = vcombine.high %v1808_v18, %v1900_v52  ;;  %v2744_v57 = vpop.f32.mrb[37].mxu0 }
 0x658   :  { %v1903_v62 = vpop.f32.mrb[38].mxu0 }
 0x659   :  { %v2745_v63 = vpop.f32.mrb[39].mxu0  ;;  %v1998_v42 = vrot.slane %v1990_v54, %v3049_v56  ;;  %v2005_v41 = vrot.slane %v1991_v55, %v3049_v56 }
 0x676   :  { %v1854_v1 = vpop.f32.mrb[24].mxu1 }
 0x677   :  { %v1974_v59 = vcombine.low %v1762_v17, %v1854_v1  ;;  %v1975_v21 = vcombine.high %v1762_v17, %v1854_v1  ;;  %v2738_v60 = vpop.f32.mrb[25].mxu1 }
 0x678   :  { %v1857_v2 = vpop.f32.mrb[26].mxu1 }
 0x679   :  { %v1982_v58 = vrot.slane %v1974_v59, %v3049_v56  ;;  %v1989_v27 = vrot.slane %v1975_v21, %v3049_v56  ;;  %v2739_v61 = vpop.f32.mrb[27].mxu1  ;;  %v2869_v59 = vld [vmem:[%s3490_s0] sm:$0xff] }
 0x67b   :  { %v2006_v3 = vcombine.low %v1982_v58, %v1998_v42  ;;  %v2007_v4 = vcombine.high %v1982_v58, %v1998_v42  ;;  %v2022_v7 = vcombine.low %v1989_v27, %v2005_v41  ;;  %v2023_v36 = vcombine.high %v1989_v27, %v2005_v41  ;;  %v2870_v42 = vld [vmem:[%s3490_s0 + $0x8] sm:$0xff] }
 0x67d   :  { %v2014_v8 = vrot.slane %v2006_v3, %v3059_v0  ;;  %v2021_v5 = vrot.slane %v2007_v4, %v3059_v0  ;;  %v2030_v6 = vrot.slane %v2022_v7, %v3059_v0  ;;  %v2037_v13 = vrot.slane %v2023_v36, %v3059_v0 }
 0x67f   :  { %v2110_v43 = vcombine.low %v2014_v8, %v2021_v5  ;;  %v2570_v14 = vcombine.high %v2014_v8, %v2021_v5  ;;  %v2126_v12 = vcombine.low %v2030_v6, %v2037_v13  ;;  %v2571_v16 = vcombine.high %v2030_v6, %v2037_v13 }
 0x681   :  { %v2117_v20 = vrot.slane %v2110_v43, %v3049_v56  ;;  %v2125_v22 = vrot.slane %v2570_v14, %v3049_v56  ;;  %v2133_v23 = vrot.slane %v2126_v12, %v3049_v56  ;;  %v2141_v24 = vrot.slane %v2571_v16, %v3049_v56  ;;  %v2815_v14 = vld [vmem:[%s3499_s9] sm:$0xff]   ;;  %v2816_v12 = vld [vmem:[%s3499_s9 + $0x8] sm:$0xff]  }
 0x682   :  { %2755 = vmatpush3.bf16.msra.mxu0 %v2815_v14 }
 0x683   :  { %v2143_v26 = vcombine.high %v2117_v20, %v2125_v22  ;;  %v2159_v28 = vcombine.high %v2133_v23, %v2141_v24  ;;  %v2142_v29 = vcombine.low %v2117_v20, %v2125_v22  ;;  %v2158_v30 = vcombine.low %v2133_v23, %v2141_v24  ;;  %2756 = vmatprep.subr.bf16.mxu0 %v2895_v15 }
 0x685   :  { %v2157_v32 = vrot.slane %v2143_v26, %v3059_v0  ;;  %v2173_v40 = vrot.slane %v2159_v28, %v3059_v0  ;;  %v2150_v45 = vrot.slane %v2142_v29, %v3059_v0  ;;  %v2166_v33 = vrot.slane %v2158_v30, %v3059_v0  ;;  %v2576_v29 = vld [vmem:[%s3497_s7] ss:$0 sm:$0xff] }
 0x686   :  { %2757 = vmatpush3.bf16.msra.mxu0 %v2816_v12 }
 0x687   :  { %v2176_v56 = vcombine.low %v2157_v32, %v2173_v40  ;;  %v2175_v37 = vcombine.high %v2150_v45, %v2166_v33  ;;  %v2174_v25 = vcombine.low %v2150_v45, %v2166_v33  ;;  %v2177_v34 = vcombine.high %v2157_v32, %v2173_v40  ;;  %v2577_v40 = vld [vmem:[%s3498_s8] ss:$0 sm:$0xff] }
 0x689   :  { %v2801_v44 = vpack.i.bf16 %v2176_v56, %v2108_v46  ;;  %v2796_v35 = vpack.i.bf16 %v2175_v37, %v2107_v47  ;;  %v2806_v17 = vpack.i.bf16 %v2177_v34, %v2109_v11  ;;  %v2818_v34 = vld [vmem:[%s3501_s11 + $0x8] sm:$0xff]  }
 0x68b   :  { %2802 = vrot.lane.b32.xlu1 %v2801_v44, %s2904_s27  ;;  %2797 = vrot.lane.b32.xlu0 %v2796_v35, %s2905_s5  ;;  %v2819_v44 = vld [vmem:[%s3501_s11 + $0x10] sm:$0xff]   ;;  %v2820_v35 = vld [vmem:[%s3501_s11 + $0x18] sm:$0xff]  }
 0x68f   :  { %2807 = vrot.lane.b32.xlu0 %v2806_v17, %s2906_s28  ;;  %v2821_v17 = vld [vmem:[%s3501_s11 + $0x20] sm:$0xff]  }
 0x6fd   :  { %v2803_v18 = vpop.permute.xlu1 %2802  ;;  %v2798_v51 = vpop.permute.xlu0 %2797 }
 0x6fe   :  { %v2800_v0 = vunpack.i.h.bf16 %v2798_v51  ;;  %v2799_v48 = vunpack.i.l.bf16 %v2798_v51  ;;  %v2805_v49 = vunpack.i.h.bf16 %v2803_v18  ;;  %v2804_v50 = vunpack.i.l.bf16 %v2803_v18  ;;  %v2822_v18 = vld [vmem:[%s3501_s11 + $0x28] sm:$0xff]   ;;  %v2823_v51 = vld [vmem:[%s3501_s11 + $0x30] sm:$0xff]  }
 0x700   :  { %v2202_v46 = vsel %vm1072_vm2, %v2106_v39, %v2799_v48  ;;  %v2203_v47 = vsel %vm1072_vm2, %v2174_v25, %v2800_v0  ;;  %v2817_v25 = vld [vmem:[%s3501_s11] sm:$0xff]   ;;  %v2824_v0 = vld [vmem:[%s3501_s11 + $0x38] sm:$0xff]  }
 0x701   :  { %v2808_v11 = vpop.permute.xlu0 %2807  ;;  %v2205_v52 = vsel %vm2204_vm4, %v2202_v46, %v2804_v50  ;;  %v2206_v54 = vsel %vm2204_vm4, %v2203_v47, %v2805_v49  ;;  %v2578_v48 = vld [vmem:[%s3500_s10] ss:$0 sm:$0xff]  ;;  %s2907_s10 = smov [#allocation2]  }
 0x702   :  { %v2810_v53 = vunpack.i.h.bf16 %v2808_v11  ;;  %v2809_v9 = vunpack.i.l.bf16 %v2808_v11  ;;  %s2523_s6 = sshll.u32 %s2907_s10, 4  ;;  %s2524_s6 = int_to_ptr.vmem [resolvable:$true] %s2523_s6 }
 0x703   :  { %s2871_s17 = scalar_lea.vmem %s2524_s6, 256  ;;  %p2876_p1 = scmp.lt.s32.totalorder %s2524_s6, %s2524_s6 }
 0x704   :  { %v2208_v55 = vsel %vm2207_vm5, %v2205_v52, %v2809_v9  ;;  %v2209_v57 = vsel %vm2207_vm5, %v2206_v54, %v2810_v53  ;;  %p2872_p0 = scmp.ne.s32.totalorder %s2524_s6, %s2871_s17  ;;  %p2877_p2 = scmp.lt.s32.totalorder %s2871_s17, %s2871_s17 }
 0x705   :  { %v2210_v62 = vpack.c.bf16 %v2209_v57, %v2208_v55 }
 0x706   :  { %p2878_p3 = por %p2877_p2, %p2876_p1 }
 0x707   :  { %2751 = vmatmul.mubr.msk.bf16.vlgmr.msra.gmra.mrb[28].mxu1 %vm52_vm0, %v2210_v62 }
 0x708   :  { %2778 = vmatprep.mubr.msk.bf16.mxu1 %vm2896_vm1, %v2895_v15  ;;  %2763 = vmatpush3.bf16.msra.mxu1 %v2817_v25  ;;  %p2879_p4 = pnand %p2878_p3, %p2872_p0 }
 0x709   :  { %2764 = vmatprep.subr.bf16.mxu1 %v2895_v15 }
 0x70c   :  { %2765 = vmatpush3.bf16.msra.mxu1 %v2818_v34 }
 0x70d   :  { %2766 = vmatprep.subr.bf16.mxu1 %v2895_v15 }
 0x710   :  { %2767 = vmatpush3.bf16.msra.mxu1 %v2819_v44 }
 0x711   :  { %2768 = vmatprep.subr.bf16.mxu1 %v2895_v15 }
 0x714   :  { %2769 = vmatpush3.bf16.msra.mxu1 %v2820_v35 }
 0x715   :  { %2770 = vmatprep.subr.bf16.mxu1 %v2895_v15 }
 0x718   :  { %2771 = vmatpush3.bf16.msra.mxu1 %v2821_v17 }
 0x719   :  { %2772 = vmatprep.subr.bf16.mxu1 %v2895_v15 }
 0x71c   :  { %2773 = vmatpush3.bf16.msra.mxu1 %v2822_v18 }
 0x71d   :  { %2774 = vmatprep.subr.bf16.mxu1 %v2895_v15 }
 0x720   :  { %2775 = vmatpush3.bf16.msra.mxu1 %v2823_v51 }
 0x721   :  { %2776 = vmatprep.subr.bf16.mxu1 %v2895_v15 }
 0x724   :  { %2777 = vmatpush3.bf16.msra.mxu1 %v2824_v0 }
 0x7da   :  { %v2271_v38 = vpop.f32.mrb[28].mxu1 }
 0x7db   :  { %v2272_v39 = vadd.f32 %v2572_v10, %v2271_v38  ;;  %v2752_v63 = vpop.f32.mrb[29].mxu1  ;;  %v2583_v38 = vld [vmem:[%s3502_s12] ss:$0 sm:$0xff] }
 0x7dc   :  { %v2274_v1 = vpop.f32.mrb[30].mxu1 }
 0x7dd   :  { %v3407_v21 = vadd.f32 %v2869_v59, %v2272_v39  ;;  %v2275_v60 = vadd.f32 %v2572_v10, %v2274_v1  ;;  %v2753_v2 = vpop.f32.mrb[31].mxu1 }
 0x7df   :  { %v3412_v41 = vadd.f32 %v2870_v42, %v2275_v60  ;;  %v2282_v58 = vsel %vm52_vm0, %v3407_v21, 0.0 }
 0x7e0   :  { %2283 = vadd.xlane.f32.xlu1 %v2282_v58 }
 0x7e1   :  { %v2285_v27 = vsel %vm52_vm0, %v3412_v41, 0.0 }
 0x7e2   :  { %2286 = vadd.xlane.f32.xlu0 %v2285_v27 }
 0x86d   :  { %v2284_v61 = vpop.xlane.xlu1 %2283 }
 0x86e   :  { %v2288_v3 = vmul.f32 0.03125, %v2284_v61 }
 0x86f   :  { %v2287_v4 = vpop.xlane.xlu0 %2286 }
 0x870   :  { %v2290_v7 = vsub.f32 %v3407_v21, %v2288_v3  ;;  %v2289_v36 = vmul.f32 0.03125, %v2287_v4 }
 0x872   :  { %v2291_v8 = vsub.f32 %v3412_v41, %v2289_v36  ;;  %v2292_v5 = vmul.f32 %v2290_v7, %v2290_v7 }
 0x874   :  { %v2294_v6 = vsel %vm52_vm0, %v2292_v5, 0.0  ;;  %v2293_v13 = vmul.f32 %v2291_v8, %v2291_v8 }
 0x875   :  { %2295 = vadd.xlane.f32.xlu0 %v2294_v6 }
 0x876   :  { %v2297_v43 = vsel %vm52_vm0, %v2293_v13, 0.0 }
 0x879   :  { %2298 = vadd.xlane.f32.xlu0 %v2297_v43 }
 0x902   :  { %v2296_v16 = vpop.xlane.xlu0 %2295 }
 0x903   :  { %v2300_v19 = vmul.f32 0.03125, %v2296_v16 }
 0x905   :  { %v2302_v20 = vadd.f32 1e-05, %v2300_v19 }
 0x906   :  { %v2299_v22 = vpop.xlane.xlu0 %2298 }
 0x907   :  { %2861 = vrsqrt.f32 %v2302_v20  ;;  %v2301_v23 = vmul.f32 0.03125, %v2299_v22 }
 0x909   :  { %v2303_v24 = vadd.f32 1e-05, %v2301_v23 }
 0x90b   :  { %2863 = vrsqrt.f32 %v2303_v24 }
 0x911   :  { %v2862_v26 = vpop.eup %2861 }
 0x912   :  { %v2306_v28 = vmul.f32 %v2862_v26, %v2290_v7 }
 0x914   :  { %v2314_v31 = vmul.f32 %v2576_v29, %v2306_v28 }
 0x915   :  { %v2864_v30 = vpop.eup %2863 }
 0x916   :  { %v2307_v32 = vmul.f32 %v2864_v30, %v2291_v8  ;;  %v2322_v33 = vadd.f32 %v2577_v40, %v2314_v31 }
 0x918   :  { %v2315_v45 = vmul.f32 %v2576_v29, %v2307_v32 }
 0x91a   :  { %v2323_v56 = vadd.f32 %v2577_v40, %v2315_v45 }
 0x91c   :  { %v2324_v37 = vpack.c.bf16 %v2323_v56, %v2322_v33 }
 0x91e   :  { %2759 = vmatmul.mubr.msk.bf16.vlgmr.msra.gmra.mrb[40].mxu0 %vm52_vm0, %v2324_v37 }
 0x9f1   :  { %v2385_v49 = vpop.f32.mrb[40].mxu0 }
 0x9f2   :  { %v2760_v50 = vpop.f32.mrb[41].mxu0  ;;  %v2386_v47 = vadd.f32 %v2578_v48, %v2385_v49 }
 0x9f3   :  { %v2388_v46 = vpop.f32.mrb[42].mxu0 }
 0x9f4   :  { %v2389_v11 = vadd.f32 %v2578_v48, %v2388_v46  ;;  %v2761_v53 = vpop.f32.mrb[43].mxu0 }
 0x9f6   :  { %v2392_v9 = vpack.c.bf16 %v2389_v11, %v2386_v47 }
 0x9f8   :  { %v2582_v52 = vmul.bf16 3218784218, %v2392_v9 }
 0x9fa   :  { %v2396_v54 = vmul.bf16 1069105081, %v2582_v52 }
 0x9fc   :  { %2865 = vpow.bf16 %v2396_v54 }
 0xa07   :  { %v2866_v15 = vpop.eup %2865 }
 0xa08   :  { %v2398_v55 = vadd.bf16 1065369472, %v2866_v15 }
 0xa0a   :  { %2867 = vrcp.bf16 %v2398_v55 }
 0xa15   :  { %v2868_v57 = vpop.eup %2867 }
 0xa16   :  { %v2400_v62 = vmul.bf16 1065369472, %v2868_v57 }
 0xa18   :  { %v2401_v10 = vmul.bf16 %v2400_v62, %v2392_v9 }
 0xa1a   :  { %2779 = vmatmul.mubr.bf16.vlgmr.msra.gmra.mrb[32].mxu1 %v2401_v10 }
 0xaed   :  { %v2507_v39 = vpop.f32.mrb[32].mxu1 }
 0xaee   :  { %v2508_v63 = vadd.f32 %v2583_v38, %v2507_v39  ;;  %v2780_v1 = vpop.f32.mrb[33].mxu1 }
 0xaef   :  { %v2510_v59 = vpop.f32.mrb[34].mxu1 }
 0xaf0   :  { %v2514_v60 = vadd.f32 %v2508_v63, %v3407_v21  ;;  %v2511_v2 = vadd.f32 %v2583_v38, %v2510_v59  ;;  %v2781_v42 = vpop.f32.mrb[35].mxu1 }
 0xaf2   :  { %2516 = vst.msk [vmem:[#allocation2] sm:$0xff] %vm52_vm0, %v2514_v60  ;;  %v2515_v58 = vadd.f32 %v2511_v2, %v3412_v41 }
 0xaf4   :  { %2517 = vst.msk [vmem:[#allocation2 + $0x8] sm:$0xff] %vm52_vm0, %v2515_v58 }
 0xaf5   :  { %2882 = shalt.err (!%p2879_p4)
}
 0xaf6   :  { %s2883_s19 = scalar_lea.hbm %s3503_s13, 256 }
 0xaf7   :  { %p2884_p5 = scmp.ne.s32.totalorder %s3503_s13, %s2883_s19  ;;  %p2887_p6 = scmp.lt.u32.totalorder %s2883_s19, %s3503_s13 }
 0xaf9   :  { %p2889_p7 = pnand %p2887_p6, %p2884_p5 }
 0xafb   :  { %2892 = shalt.err (!%p2889_p7)
}
 0xafc   :  { %s2908_s21 = smov 128  }
 0xafd   :  { %2529 = dma.vmem_to_hbm [thread:$0]  %s2524_s6, 256, %s3503_s13, [#allocation3], %s2908_s21, %s2908_s21, %s2905_s5  }
 0xafe   :  { %2893 = dma.done.wait [#allocation3], 256  }
 0xaff   :  { %2894 = vsyncadd [#allocation3], 4294967040 }
 0xb00   :  { %2533 = vsyncpa [#allocation3], 1 }

// kernel: tpu_custom_call.1
= control target key start
LH: loop header
LB: loop body
LE: loop exit
PB: predicated region body
PF: predicated region fallthrough
CT: control target
= control target key end

     0   :  { %vm52_vm0 = vcmask 261120   ;;  %s3490_s0 = inlined_call_operand.vmem [shape: f32[2,8,32], index: 0, kind: input, shape index: {}]   ;;  %s3491_s1 = inlined_call_operand.vmem [shape: f32[1,32], index: 1, kind: input, shape index: {}]   ;;  %s3492_s2 = inlined_call_operand.vmem [shape: f32[1,32], index: 2, kind: input, shape index: {}]   ;;  %s3493_s3 = inlined_call_operand.vmem [shape: bf16[32,96], index: 3, kind: input, shape index: {}]   ;;  %s3494_s4 = inlined_call_operand.vmem [shape: f32[1,96], index: 4, kind: input, shape index: {}]   ;;  %s3495_s5 = inlined_call_operand.vmem [shape: bf16[32,32], index: 5, kind: input, shape index: {}]   ;;  %s3496_s6 = inlined_call_operand.vmem [shape: f32[1,32], index: 6, kind: input, shape index: {}]   ;;  %s3497_s7 = inlined_call_operand.vmem [shape: f32[1,32], index: 7, kind: input, shape index: {}]   ;;  %s3498_s8 = inlined_call_operand.vmem [shape: f32[1,32], index: 8, kind: input, shape index: {}]   ;;  %s3499_s9 = inlined_call_operand.vmem [shape: bf16[32,128], index: 9, kind: input, shape index: {}]   ;;  %s3500_s10 = inlined_call_operand.vmem [shape: f32[1,128], index: 10, kind: input, shape index: {}]   ;;  %s3501_s11 = inlined_call_operand.vmem [shape: bf16[128,32], index: 11, kind: input, shape index: {}]   ;;  %s3502_s12 = inlined_call_operand.vmem [shape: f32[1,32], index: 12, kind: input, shape index: {}]   ;;  %s3503_s13 = inlined_call_operand.hbm [shape: f32[2,8,32], index: 13, kind: output, shape index: {}]  }
   0x1   :  { %v48_v0 = vld [vmem:[%s3490_s0] sm:$0xff]  ;;  %v49_v1 = vld [vmem:[%s3490_s0 + $0x8] sm:$0xff] }
   0x2   :  { %v53_v2 = vsel %vm52_vm0, %v48_v0, 0.0  ;;  %v56_v3 = vsel %vm52_vm0, %v49_v1, 0.0 }
   0x3   :  { %54 = vadd.xlane.f32.xlu0 %v53_v2 }
   0x7   :  { %57 = vadd.xlane.f32.xlu0 %v56_v3 }
   0x8   :  { %18 = vsyncpa [#allocation3], 0  ;;  %v2811_v14 = vld [vmem:[%s3493_s3] sm:$0xff]   ;;  %v2895_v15 = vmov 0.0   ;;  %v2812_v16 = vld [vmem:[%s3493_s3 + $0x8] sm:$0xff]   ;;  %vm2896_vm1 = vmmov 0   ;;  %v189_v49 = vlaneseq }
   0x9   :  { %2642 = vmatprep.subr.bf16.mxu0 %v2895_v15  ;;  %2662 = vmatprep.subr.bf16.mxu1 %v2895_v15  ;;  %v2534_v25 = vld [vmem:[%s3491_s1] ss:$0 sm:$0xff]  ;;  %s2897_s1 = smov 112   ;;  %s2899_s21 = smov 104   ;;  %v2901_v47 = vmov 1983009808  }
   0xa   :  { %2643 = vmatpush3.bf16.msra.mxu0 %v2811_v14  ;;  %2646 = vmatprep.mubr.msk.bf16.mxu0 %vm2896_vm1, %v2895_v15  ;;  %v2535_v29 = vld [vmem:[%s3492_s2] ss:$0 sm:$0xff]  ;;  %s2898_s2 = smov 120   ;;  %v187_v48 = vunpack.c.l.s4 %v2901_v47  ;;  %v190_v51 = vshrl.u32 %v189_v49, 7  ;;  %v2902_v52 = vmov 1934713408  }
   0xb   :  { %2644 = vmatprep.subr.bf16.mxu0 %v2895_v15  ;;  %2664 = vmatprep.mubr.msk.bf16.mxu1 %vm2896_vm1, %v2895_v15  ;;  %v2536_v34 = vld [vmem:[%s3494_s4] ss:$0 sm:$0xff]  ;;  %s2900_s4 = smov 96   ;;  %v219_v53 = vunpack.c.l.s4 %v2902_v52  ;;  %vm1072_vm2 = vcmask 64512   ;;  %s2903_s22 = smov 64   ;;  %vm1540_vm3 = vcmask 1043456  }
   0xc   :  { %v188_v50 = vunpack.c.0.s8 %v187_v48  ;;  %s2904_s27 = smov 16   ;;  %s2906_s28 = smov 24   ;;  %vm2204_vm4 = vcmask 130048   ;;  %vm2207_vm5 = vcmask 195584  }
   0xd   :  { %v220_v59 = vunpack.c.0.s8 %v219_v53 }
   0xe   :  { %2645 = vmatpush3.bf16.msra.mxu0 %v2812_v16  ;;  %v3049_v56 = vsub.s32 %v188_v50, %v190_v51 }
   0xf   :  { %2650 = vmatprep.subr.bf16.mxu0 %v2895_v15 }
  0x90   :  { %v55_v4 = vpop.xlane.xlu0 %54 }
  0x91   :  { %v60_v5 = vmul.f32 0.03125, %v55_v4 }
  0x93   :  { %v62_v6 = vsub.f32 %v48_v0, %v60_v5  ;;  %v3059_v0 = vsub.s32 %v220_v59, %v190_v51 }
  0x94   :  { %v58_v7 = vpop.xlane.xlu0 %57 }
  0x95   :  { %v61_v8 = vmul.f32 0.03125, %v58_v7  ;;  %v64_v9 = vmul.f32 %v62_v6, %v62_v6 }
  0x97   :  { %v63_v10 = vsub.f32 %v49_v1, %v61_v8  ;;  %v66_v11 = vsel %vm52_vm0, %v64_v9, 0.0 }
  0x98   :  { %67 = vadd.xlane.f32.xlu1 %v66_v11 }
  0x99   :  { %v65_v12 = vmul.f32 %v63_v10, %v63_v10 }
  0x9b   :  { %v69_v13 = vsel %vm52_vm0, %v65_v12, 0.0 }
  0x9c   :  { %70 = vadd.xlane.f32.xlu1 %v69_v13 }
 0x125   :  { %v68_v17 = vpop.xlane.xlu1 %67 }
 0x126   :  { %v72_v18 = vmul.f32 0.03125, %v68_v17 }
 0x128   :  { %v74_v19 = vadd.f32 1e-05, %v72_v18 }
 0x129   :  { %v71_v20 = vpop.xlane.xlu1 %70 }
 0x12a   :  { %2825 = vrsqrt.f32 %v74_v19  ;;  %v73_v21 = vmul.f32 0.03125, %v71_v20 }
 0x12c   :  { %v75_v22 = vadd.f32 1e-05, %v73_v21 }
 0x12e   :  { %2827 = vrsqrt.f32 %v75_v22 }
 0x134   :  { %v2826_v23 = vpop.eup %2825 }
 0x135   :  { %v78_v24 = vmul.f32 %v2826_v23, %v62_v6 }
 0x137   :  { %v86_v28 = vmul.f32 %v2534_v25, %v78_v24 }
 0x138   :  { %v2828_v26 = vpop.eup %2827 }
 0x139   :  { %v79_v27 = vmul.f32 %v2828_v26, %v63_v10  ;;  %v94_v31 = vadd.f32 %v2535_v29, %v86_v28 }
 0x13b   :  { %v87_v30 = vmul.f32 %v2534_v25, %v79_v27 }
 0x13d   :  { %v95_v32 = vadd.f32 %v2535_v29, %v87_v30 }
 0x13f   :  { %v96_v33 = vpack.c.bf16 %v95_v32, %v94_v31 }
 0x141   :  { %2647 = vmatmul.mubr.msk.bf16.vlgmr.msra.gmra.mrb[0].mxu0 %vm52_vm0, %v96_v33 }
 0x142   :  { %2652 = vmatprep.mubr.msk.bf16.mxu0 %vm2896_vm1, %v2895_v15 }
 0x214   :  { %v157_v35 = vpop.f32.mrb[0].mxu0 }
 0x215   :  { %v3015_v36 = vadd.f32 %v2536_v34, %v157_v35  ;;  %v2648_v37 = vpop.f32.mrb[1].mxu0 }
 0x216   :  { %v160_v38 = vpop.f32.mrb[2].mxu0 }
 0x217   :  { %172 = vrot.lane.b32.xlu1 %v3015_v36, %s2897_s1  ;;  %166 = vrot.lane.b32.xlu0 %v3015_v36, %s2898_s2  ;;  %v2649_v39 = vpop.f32.mrb[3].mxu0  ;;  %v3019_v40 = vadd.f32 %v2536_v34, %v160_v38 }
 0x21b   :  { %178 = vrot.lane.b32.xlu1 %v3015_v36, %s2899_s21  ;;  %174 = vrot.lane.b32.xlu0 %v3019_v40, %s2897_s1 }
 0x21f   :  { %464 = vrot.lane.b32.xlu0 %v3015_v36, %s2900_s4  ;;  %168 = vrot.lane.b32.xlu1 %v3019_v40, %s2898_s2 }
 0x223   :  { %180 = vrot.lane.b32.xlu1 %v3019_v40, %s2899_s21 }
 0x289   :  { %v3026_v41 = vpop.permute.xlu1 %172  ;;  %v3028_v42 = vpop.permute.xlu0 %166 }
 0x28a   :  { %472 = vrot.lane.b32.xlu0 %v3026_v41, %s2900_s4  ;;  %468 = vrot.lane.b32.xlu1 %v3028_v42, %s2900_s4  ;;  %v184_v57 = vcombine.low %v3015_v36, %v3026_v41  ;;  %v185_v58 = vcombine.high %v3015_v36, %v3026_v41 }
 0x28c   :  { %v192_v62 = vrot.slane %v184_v57, %v3049_v56  ;;  %v199_v63 = vrot.slane %v185_v58, %v3049_v56 }
 0x28d   :  { %v3032_v43 = vpop.permute.xlu1 %178  ;;  %v3036_v44 = vpop.permute.xlu0 %174 }
 0x28e   :  { %466 = vrot.lane.b32.xlu0 %v3019_v40, %s2900_s4  ;;  %476 = vrot.lane.b32.xlu1 %v3032_v43, %s2900_s4  ;;  %v200_v54 = vcombine.low %v3028_v42, %v3032_v43  ;;  %v201_v55 = vcombine.high %v3028_v42, %v3032_v43  ;;  %v252_v16 = vcombine.low %v3019_v40, %v3036_v44 }
 0x28f   :  { %v253_v19 = vcombine.high %v3019_v40, %v3036_v44 }
 0x290   :  { %v208_v60 = vrot.slane %v200_v54, %v3049_v56  ;;  %v215_v61 = vrot.slane %v201_v55, %v3049_v56  ;;  %v260_v26 = vrot.slane %v252_v16, %v3049_v56 }
 0x291   :  { %v3038_v45 = vpop.permute.xlu1 %168  ;;  %v465_v10 = vpop.permute.xlu0 %464  ;;  %v267_v28 = vrot.slane %v253_v19, %v3049_v56 }
 0x292   :  { %474 = vrot.lane.b32.xlu0 %v3036_v44, %s2900_s4  ;;  %470 = vrot.lane.b32.xlu1 %v3038_v45, %s2900_s4  ;;  %v216_v1 = vcombine.low %v192_v62, %v208_v60  ;;  %v217_v2 = vcombine.high %v192_v62, %v208_v60  ;;  %v232_v3 = vcombine.low %v199_v63, %v215_v61 }
 0x293   :  { %v233_v4 = vcombine.high %v199_v63, %v215_v61 }
 0x294   :  { %v224_v5 = vrot.slane %v216_v1, %v3059_v0  ;;  %v231_v6 = vrot.slane %v217_v2, %v3059_v0  ;;  %v240_v7 = vrot.slane %v232_v3, %v3059_v0 }
 0x295   :  { %v3042_v46 = vpop.permute.xlu1 %180  ;;  %v247_v8 = vrot.slane %v233_v4, %v3059_v0 }
 0x296   :  { %478 = vrot.lane.b32.xlu1 %v3042_v46, %s2900_s4  ;;  %v320_v9 = vcombine.low %v224_v5, %v231_v6  ;;  %v2540_v11 = vcombine.high %v224_v5, %v231_v6  ;;  %v268_v14 = vcombine.low %v3038_v45, %v3042_v46  ;;  %v269_v17 = vcombine.high %v3038_v45, %v3042_v46 }
 0x297   :  { %v336_v12 = vcombine.low %v240_v7, %v247_v8  ;;  %v2541_v13 = vcombine.high %v240_v7, %v247_v8 }
 0x298   :  { %v327_v18 = vrot.slane %v320_v9, %v3049_v56  ;;  %v335_v22 = vrot.slane %v2540_v11, %v3049_v56  ;;  %v276_v25 = vrot.slane %v268_v14, %v3049_v56  ;;  %v283_v27 = vrot.slane %v269_v17, %v3049_v56 }
 0x299   :  { %v343_v23 = vrot.slane %v336_v12, %v3049_v56  ;;  %v351_v24 = vrot.slane %v2541_v13, %v3049_v56 }
 0x29a   :  { %v284_v32 = vcombine.low %v260_v26, %v276_v25  ;;  %v285_v33 = vcombine.high %v260_v26, %v276_v25  ;;  %v352_v35 = vcombine.low %v327_v18, %v335_v22  ;;  %v300_v47 = vcombine.low %v267_v28, %v283_v27 }
 0x29b   :  { %v368_v37 = vcombine.low %v343_v23, %v351_v24  ;;  %v301_v48 = vcombine.high %v267_v28, %v283_v27  ;;  %v353_v49 = vcombine.high %v327_v18, %v335_v22  ;;  %v369_v50 = vcombine.high %v343_v23, %v351_v24 }
 0x29c   :  { %v292_v55 = vrot.slane %v284_v32, %v3059_v0  ;;  %v299_v57 = vrot.slane %v285_v33, %v3059_v0  ;;  %v3088_v59 = vrot.slane %v352_v35, %v3059_v0  ;;  %v308_v3 = vrot.slane %v300_v47, %v3059_v0 }
 0x29d   :  { %v3091_v60 = vrot.slane %v368_v37, %v3059_v0  ;;  %v315_v4 = vrot.slane %v301_v48, %v3059_v0  ;;  %v3096_v5 = vrot.slane %v353_v49, %v3059_v0  ;;  %v3099_v6 = vrot.slane %v369_v50, %v3059_v0 }
 0x29e   :  { %v388_v11 = vcombine.low %v292_v55, %v299_v57  ;;  %v2542_v12 = vcombine.high %v292_v55, %v299_v57 }
 0x29f   :  { %v2543_v22 = vcombine.high %v308_v3, %v315_v4 }
 0x2fc   :  { %v473_v20 = vpop.permute.xlu0 %472  ;;  %v469_v21 = vpop.permute.xlu1 %468 }
 0x2fd   :  { %v488_v29 = vcombine.low %v465_v10, %v473_v20  ;;  %v489_v30 = vcombine.high %v465_v10, %v473_v20 }
 0x2ff   :  { %v496_v51 = vrot.slane %v488_v29, %v3049_v56  ;;  %v503_v52 = vrot.slane %v489_v30, %v3049_v56 }
 0x300   :  { %v467_v31 = vpop.permute.xlu0 %466  ;;  %v477_v34 = vpop.permute.xlu1 %476 }
 0x301   :  { %v504_v38 = vcombine.low %v469_v21, %v477_v34  ;;  %v505_v39 = vcombine.high %v469_v21, %v477_v34  ;;  %v404_v21 = vcombine.low %v308_v3, %v315_v4 }
 0x303   :  { %v512_v53 = vrot.slane %v504_v38, %v3049_v56  ;;  %v519_v54 = vrot.slane %v505_v39, %v3049_v56 }
 0x304   :  { %v471_v58 = vpop.permute.xlu1 %470  ;;  %v475_v2 = vpop.permute.xlu0 %474 }
 0x305   :  { %v520_v61 = vcombine.low %v496_v51, %v512_v53  ;;  %v521_v62 = vcombine.high %v496_v51, %v512_v53  ;;  %v536_v63 = vcombine.low %v503_v52, %v519_v54  ;;  %v537_v1 = vcombine.high %v503_v52, %v519_v54 }
 0x306   :  { %v556_v13 = vcombine.low %v467_v31, %v475_v2  ;;  %v557_v14 = vcombine.high %v467_v31, %v475_v2 }
 0x307   :  { %v528_v7 = vrot.slane %v520_v61, %v3059_v0  ;;  %v535_v8 = vrot.slane %v521_v62, %v3059_v0  ;;  %v544_v9 = vrot.slane %v536_v63, %v3059_v0  ;;  %v551_v10 = vrot.slane %v537_v1, %v3059_v0 }
 0x308   :  { %v479_v16 = vpop.permute.xlu1 %478  ;;  %v564_v29 = vrot.slane %v556_v13, %v3049_v56  ;;  %v571_v30 = vrot.slane %v557_v14, %v3049_v56  ;;  %v403_v61 = vrot.slane %v2542_v12, %v3049_v56 }
 0x309   :  { %v624_v17 = vcombine.low %v528_v7, %v535_v8  ;;  %v2544_v18 = vcombine.high %v528_v7, %v535_v8  ;;  %v640_v19 = vcombine.low %v544_v9, %v551_v10  ;;  %v2545_v20 = vcombine.high %v544_v9, %v551_v10 }
 0x30a   :  { %v572_v23 = vcombine.low %v471_v58, %v479_v16  ;;  %v573_v24 = vcombine.high %v471_v58, %v479_v16  ;;  %v3122_v58 = vrot.slane %v388_v11, %v3049_v56  ;;  %v411_v7 = vrot.slane %v404_v21, %v3049_v56 }
 0x30b   :  { %v631_v25 = vrot.slane %v624_v17, %v3049_v56  ;;  %v639_v26 = vrot.slane %v2544_v18, %v3049_v56  ;;  %v647_v27 = vrot.slane %v640_v19, %v3049_v56  ;;  %v655_v28 = vrot.slane %v2545_v20, %v3049_v56 }
 0x30c   :  { %v580_v31 = vrot.slane %v572_v23, %v3049_v56  ;;  %v587_v32 = vrot.slane %v573_v24, %v3049_v56  ;;  %v419_v8 = vrot.slane %v2543_v22, %v3049_v56  ;;  %v384_v22 = vcombine.low %v3088_v59, %v3091_v60 }
 0x30d   :  { %v656_v33 = vcombine.low %v631_v25, %v639_v26  ;;  %v672_v34 = vcombine.low %v647_v27, %v655_v28  ;;  %v657_v35 = vcombine.high %v631_v25, %v639_v26  ;;  %v673_v37 = vcombine.high %v647_v27, %v655_v28 }
 0x30e   :  { %v588_v38 = vcombine.low %v564_v29, %v580_v31  ;;  %v589_v39 = vcombine.high %v564_v29, %v580_v31  ;;  %v604_v47 = vcombine.low %v571_v30, %v587_v32  ;;  %v605_v48 = vcombine.high %v571_v30, %v587_v32 }
 0x30f   :  { %v664_v49 = vrot.slane %v656_v33, %v3059_v0  ;;  %v680_v50 = vrot.slane %v672_v34, %v3059_v0  ;;  %v671_v51 = vrot.slane %v657_v35, %v3059_v0  ;;  %v687_v52 = vrot.slane %v673_v37, %v3059_v0 }
 0x310   :  { %v596_v53 = vrot.slane %v588_v38, %v3059_v0  ;;  %v603_v54 = vrot.slane %v589_v39, %v3059_v0  ;;  %v612_v55 = vrot.slane %v604_v47, %v3059_v0  ;;  %v619_v57 = vrot.slane %v605_v48, %v3059_v0 }
 0x311   :  { %v688_v62 = vcombine.low %v664_v49, %v680_v50  ;;  %v690_v63 = vcombine.low %v671_v51, %v687_v52  ;;  %v689_v18 = vcombine.high %v664_v49, %v680_v50  ;;  %v386_v23 = vcombine.low %v3096_v5, %v3099_v6 }
 0x312   :  { %v692_v1 = vcombine.low %v596_v53, %v603_v54  ;;  %v2546_v2 = vcombine.high %v596_v53, %v603_v54  ;;  %v708_v3 = vcombine.low %v612_v55, %v619_v57  ;;  %v2547_v4 = vcombine.high %v612_v55, %v619_v57 }
 0x313   :  { %v760_v9 = vpack.c.bf16 %v688_v62, %v688_v62  ;;  %v762_v10 = vpack.c.bf16 %v690_v63, %v690_v63  ;;  %v420_v27 = vcombine.low %v3122_v58, %v403_v61  ;;  %v436_v28 = vcombine.low %v411_v7, %v419_v8 }
 0x314   :  { %v699_v13 = vrot.slane %v692_v1, %v3049_v56  ;;  %v707_v14 = vrot.slane %v2546_v2, %v3049_v56  ;;  %v715_v11 = vrot.slane %v708_v3, %v3049_v56  ;;  %v723_v12 = vrot.slane %v2547_v4, %v3049_v56 }
 0x315   :  { %v1077_v16 = vsel %vm1072_vm2, %v760_v9, 0  ;;  %v1169_v17 = vsel %vm1072_vm2, %v762_v10, 0  ;;  %v761_v29 = vpack.c.bf16 %v689_v18, %v689_v18  ;;  %v456_v33 = vpack.c.bf16 %v384_v22, %v384_v22 }
 0x316   :  { %2651 = vmatpush3.bf16.xpose.msra.mxu0 %v1077_v16  ;;  %2663 = vmatpush3.bf16.xpose.msra.mxu1 %v1169_v17  ;;  %v724_v19 = vcombine.low %v699_v13, %v707_v14  ;;  %v740_v20 = vcombine.low %v715_v11, %v723_v12  ;;  %v725_v21 = vcombine.high %v699_v13, %v707_v14 }
 0x317   :  { %2656 = vmatprep.subr.bf16.mxu0 %v2895_v15  ;;  %2674 = vmatprep.subr.bf16.mxu1 %v2895_v15  ;;  %v741_v24 = vcombine.high %v715_v11, %v723_v12  ;;  %v458_v34 = vpack.c.bf16 %v386_v23, %v386_v23  ;;  %v428_v37 = vrot.slane %v420_v27, %v3059_v0  ;;  %v1123_v39 = vsel %vm1072_vm2, %v761_v29, 0 }
 0x318   :  { %v732_v25 = vrot.slane %v724_v19, %v3059_v0  ;;  %v748_v26 = vrot.slane %v740_v20, %v3059_v0  ;;  %v739_v31 = vrot.slane %v725_v21, %v3059_v0  ;;  %v444_v38 = vrot.slane %v436_v28, %v3059_v0 }
 0x319   :  { %v755_v32 = vrot.slane %v741_v24, %v3059_v0  ;;  %v691_v47 = vcombine.high %v671_v51, %v687_v52  ;;  %v385_v50 = vcombine.high %v3088_v59, %v3091_v60  ;;  %v421_v51 = vcombine.high %v3122_v58, %v403_v61 }
 0x31a   :  { %v756_v30 = vcombine.low %v732_v25, %v748_v26  ;;  %v452_v53 = vcombine.low %v428_v37, %v444_v38  ;;  %v437_v52 = vcombine.high %v411_v7, %v419_v8  ;;  %v757_v60 = vcombine.high %v732_v25, %v748_v26 }
 0x31b   :  { %v758_v49 = vcombine.low %v739_v31, %v755_v32  ;;  %v763_v54 = vpack.c.bf16 %v691_v47, %v691_v47  ;;  %v457_v57 = vpack.c.bf16 %v385_v50, %v385_v50  ;;  %v435_v63 = vrot.slane %v421_v51, %v3059_v0 }
 0x31c   :  { %v764_v35 = vpack.c.bf16 %v756_v30, %v756_v30  ;;  %v460_v62 = vpack.c.bf16 %v452_v53, %v452_v53  ;;  %v451_v1 = vrot.slane %v437_v52, %v3059_v0  ;;  %v387_v58 = vcombine.high %v3096_v5, %v3099_v6 }
 0x31d   :  { %2653 = vmatmul.mubr.msk.bf16.vlgmr.msra.gmra.mrb[4].mxu0 %vm1072_vm2, %v456_v33  ;;  %2665 = vmatmul.mubr.msk.bf16.vlgmr.msra.gmra.mrb[0].mxu1 %vm1072_vm2, %v458_v34  ;;  %v766_v55 = vpack.c.bf16 %v758_v49, %v758_v49  ;;  %v1215_v59 = vsel %vm1072_vm2, %v763_v54, 0  ;;  %v765_v3 = vpack.c.bf16 %v757_v60, %v757_v60  ;;  %v759_v5 = vcombine.high %v739_v31, %v755_v32 }
 0x31e   :  { %2657 = vmatpush3.bf16.xpose.msra.mxu0 %v1123_v39  ;;  %v1261_v48 = vsel %vm1072_vm2, %v764_v35, 0  ;;  %2658 = vmatprep.mubr.msk.bf16.mxu0 %vm2896_vm1, %v2895_v15  ;;  %v454_v61 = vcombine.low %v435_v63, %v451_v1  ;;  %v459_v4 = vpack.c.bf16 %v387_v58, %v387_v58  ;;  %v453_v6 = vcombine.high %v428_v37, %v444_v38 }
 0x31f   :  { %2675 = vmatpush3.bf16.xpose.msra.mxu1 %v1261_v48  ;;  %2676 = vmatprep.mubr.msk.bf16.mxu1 %vm2896_vm1, %v2895_v15  ;;  %v1353_v2 = vsel %vm1072_vm2, %v766_v55, 0  ;;  %v1307_v8 = vsel %vm1072_vm2, %v765_v3, 0  ;;  %v767_v9 = vpack.c.bf16 %v759_v5, %v759_v5  ;;  %v455_v14 = vcombine.high %v435_v63, %v451_v1 }
 0x320   :  { %2668 = vmatprep.subr.bf16.mxu0 %v2895_v15  ;;  %2686 = vmatprep.subr.bf16.mxu1 %v2895_v15  ;;  %v462_v7 = vpack.c.bf16 %v454_v61, %v454_v61  ;;  %v461_v10 = vpack.c.bf16 %v453_v6, %v453_v6 }
 0x321   :  { %v1399_v13 = vsel %vm1072_vm2, %v767_v9, 0  ;;  %v463_v11 = vpack.c.bf16 %v455_v14, %v455_v14 }
 0x325   :  { %2659 = vmatmul.mubr.msk.bf16.vlgmr.msra.gmra.mrb[8].mxu0 %vm1072_vm2, %v457_v57 }
 0x326   :  { %2677 = vmatmul.mubr.msk.bf16.vlgmr.msra.gmra.mrb[4].mxu1 %vm1072_vm2, %v460_v62  ;;  %2669 = vmatpush3.bf16.xpose.msra.mxu0 %v1215_v59 }
 0x327   :  { %2687 = vmatpush3.bf16.xpose.msra.mxu1 %v1353_v2  ;;  %2670 = vmatprep.mubr.msk.bf16.mxu0 %vm2896_vm1, %v2895_v15 }
 0x328   :  { %2688 = vmatprep.mubr.msk.bf16.mxu1 %vm2896_vm1, %v2895_v15  ;;  %2680 = vmatprep.subr.bf16.mxu0 %v2895_v15 }
 0x329   :  { %2698 = vmatprep.subr.bf16.mxu1 %v2895_v15 }
 0x32d   :  { %2671 = vmatmul.mubr.msk.bf16.vlgmr.msra.gmra.mrb[12].mxu0 %vm1072_vm2, %v459_v4 }
 0x32e   :  { %2689 = vmatmul.mubr.msk.bf16.vlgmr.msra.gmra.mrb[8].mxu1 %vm1072_vm2, %v462_v7  ;;  %2681 = vmatpush3.bf16.xpose.msra.mxu0 %v1307_v8 }
 0x32f   :  { %2682 = vmatprep.mubr.msk.bf16.mxu0 %vm2896_vm1, %v2895_v15  ;;  %2692 = vmatprep.subr.bf16.mxu0 %v2895_v15 }
 0x330   :  { %2700 = vmatprep.mubr.msk.bf16.mxu1 %vm2896_vm1, %v2895_v15 }
 0x335   :  { %2683 = vmatmul.mubr.msk.bf16.vlgmr.msra.gmra.mrb[16].mxu0 %vm1072_vm2, %v461_v10 }
 0x336   :  { %2693 = vmatpush3.bf16.xpose.msra.mxu0 %v1399_v13  ;;  %2694 = vmatprep.mubr.msk.bf16.mxu0 %vm2896_vm1, %v2895_v15 }
 0x337   :  { %2704 = vmatprep.subr.bf16.mxu0 %v2895_v15 }
 0x33d   :  { %2695 = vmatmul.mubr.msk.bf16.vlgmr.msra.gmra.mrb[20].mxu0 %vm1072_vm2, %v463_v11 }
 0x33e   :  { %2706 = vmatprep.mubr.msk.bf16.mxu0 %vm2896_vm1, %v2895_v15 }
 0x3f0   :  { %v1113_v12 = vpop.f32.mrb[4].mxu0  ;;  %v1205_v16 = vpop.f32.mrb[0].mxu1 }
 0x3f1   :  { %v2654_v17 = vpop.f32.mrb[5].mxu0  ;;  %v2666_v18 = vpop.f32.mrb[1].mxu1  ;;  %v1441_v19 = vsel %vm1072_vm2, %v1113_v12, -inf  ;;  %v1447_v24 = vsel %vm1072_vm2, %v1205_v16, -inf }
 0x3f2   :  { %v1208_v20 = vpop.f32.mrb[2].mxu1  ;;  %1442 = vmax.xlane.f32.xlu0 %v1441_v19  ;;  %v1116_v21 = vpop.f32.mrb[6].mxu0 }
 0x3f3   :  { %v2655_v22 = vpop.f32.mrb[7].mxu0  ;;  %v2667_v23 = vpop.f32.mrb[3].mxu1 }
 0x3f6   :  { %1448 = vmax.xlane.f32.xlu0 %v1447_v24 }
 0x3f8   :  { %v1159_v25 = vpop.f32.mrb[8].mxu0 }
 0x3f9   :  { %v1297_v26 = vpop.f32.mrb[4].mxu1  ;;  %v2660_v27 = vpop.f32.mrb[9].mxu0  ;;  %v1444_v28 = vsel %vm1072_vm2, %v1159_v25, -inf }
 0x3fa   :  { %v2678_v29 = vpop.f32.mrb[5].mxu1  ;;  %v1453_v30 = vsel %vm1072_vm2, %v1297_v26, -inf  ;;  %1445 = vmax.xlane.f32.xlu1 %v1444_v28  ;;  %v1162_v31 = vpop.f32.mrb[10].mxu0 }
 0x3fb   :  { %v1300_v32 = vpop.f32.mrb[6].mxu1  ;;  %1454 = vmax.xlane.f32.xlu0 %v1453_v30  ;;  %v2661_v33 = vpop.f32.mrb[11].mxu0 }
 0x3fc   :  { %v2679_v34 = vpop.f32.mrb[7].mxu1 }
 0x400   :  { %v1251_v35 = vpop.f32.mrb[12].mxu0 }
 0x401   :  { %v3193_v37 = vpop.f32.mrb[8].mxu1  ;;  %v2672_v38 = vpop.f32.mrb[13].mxu0  ;;  %v1450_v39 = vsel %vm1072_vm2, %v1251_v35, -inf }
 0x402   :  { %v2690_v47 = vpop.f32.mrb[9].mxu1  ;;  %1451 = vmax.xlane.f32.xlu0 %v1450_v39  ;;  %v1254_v48 = vpop.f32.mrb[14].mxu0  ;;  %v1459_v51 = vsel %vm1072_vm2, %v3193_v37, -inf }
 0x403   :  { %v1392_v49 = vpop.f32.mrb[10].mxu1  ;;  %v2673_v50 = vpop.f32.mrb[15].mxu0 }
 0x404   :  { %v2691_v53 = vpop.f32.mrb[11].mxu1 }
 0x406   :  { %1460 = vmax.xlane.f32.xlu0 %v1459_v51 }
 0x408   :  { %v1343_v52 = vpop.f32.mrb[16].mxu0 }
 0x409   :  { %v2684_v54 = vpop.f32.mrb[17].mxu0  ;;  %v1456_v60 = vsel %vm1072_vm2, %v1343_v52, -inf }
 0x40a   :  { %v1346_v55 = vpop.f32.mrb[18].mxu0 }
 0x40b   :  { %772 = vrot.lane.b32.xlu1 %v3028_v42, %s2903_s22  ;;  %v2685_v57 = vpop.f32.mrb[19].mxu0 }
 0x40f   :  { %776 = vrot.lane.b32.xlu1 %v3026_v41, %s2903_s22 }
 0x410   :  { %v3202_v62 = vpop.f32.mrb[20].mxu0 }
 0x411   :  { %v2696_v63 = vpop.f32.mrb[21].mxu0  ;;  %v1462_v2 = vsel %vm1072_vm2, %v3202_v62, -inf }
 0x412   :  { %v1438_v1 = vpop.f32.mrb[22].mxu0 }
 0x413   :  { %v2697_v59 = vpop.f32.mrb[23].mxu0 }
 0x41c   :  { %768 = vrot.lane.b32.xlu0 %v3015_v36, %s2903_s22 }
 0x433   :  { %1457 = vmax.xlane.f32.xlu1 %v1456_v60 }
 0x437   :  { %1463 = vmax.xlane.f32.xlu1 %v1462_v2 }
 0x448   :  { %780 = vrot.lane.b32.xlu1 %v3032_v43, %s2903_s22 }
 0x47f   :  { %v1443_v42 = vpop.xlane.xlu0 %1442 }
 0x480   :  { %v1465_v41 = vsub.f32 %v1113_v12, %v1443_v42 }
 0x482   :  { %v1473_v58 = vmul.f32 1.442695, %v1465_v41 }
 0x483   :  { %v1449_v61 = vpop.xlane.xlu0 %1448 }
 0x484   :  { %2829 = vpow2.f32 %v1473_v58  ;;  %v1467_v3 = vsub.f32 %v1205_v16, %v1449_v61 }
 0x486   :  { %v1477_v4 = vmul.f32 1.442695, %v1467_v3 }
 0x487   :  { %v1446_v7 = vpop.xlane.xlu1 %1445 }
 0x488   :  { %2831 = vpow2.f32 %v1477_v4  ;;  %v1455_v36 = vpop.xlane.xlu0 %1454  ;;  %v1466_v8 = vsub.f32 %v1159_v25, %v1446_v7 }
 0x489   :  { %v1469_v5 = vsub.f32 %v1297_v26, %v1455_v36 }
 0x48a   :  { %v1475_v6 = vmul.f32 1.442695, %v1466_v8 }
 0x48b   :  { %v1481_v9 = vmul.f32 1.442695, %v1469_v5  ;;  %v773_v23 = vpop.permute.xlu1 %772 }
 0x48c   :  { %2833 = vpow2.f32 %v1475_v6 }
 0x48d   :  { %2835 = vpow2.f32 %v1481_v9 }
 0x48e   :  { %v3211_v10 = vpop.eup %2829 }
 0x48f   :  { %v1452_v13 = vpop.xlane.xlu0 %1451  ;;  %v1489_v43 = vsel %vm1072_vm2, %v3211_v10, 0.0  ;;  %v777_v24 = vpop.permute.xlu1 %776 }
 0x490   :  { %v1468_v14 = vsub.f32 %v1251_v35, %v1452_v13  ;;  %1490 = vadd.xlane.f32.xlu0 %v1489_v43 }
 0x492   :  { %v3215_v11 = vpop.eup %2831  ;;  %v1479_v12 = vmul.f32 1.442695, %v1468_v14 }
 0x493   :  { %v1495_v16 = vsel %vm1072_vm2, %v3215_v11, 0.0  ;;  %v3237_v25 = vpop.xlane.xlu0 %1460 }
 0x494   :  { %2837 = vpow2.f32 %v1479_v12  ;;  %1496 = vadd.xlane.f32.xlu0 %v1495_v16 }
 0x496   :  { %v3219_v17 = vpop.eup %2833 }
 0x497   :  { %v3221_v18 = vpop.eup %2835  ;;  %v1492_v19 = vsel %vm1072_vm2, %v3219_v17, 0.0  ;;  %v769_v29 = vpop.permute.xlu0 %768 }
 0x498   :  { %v1501_v20 = vsel %vm1072_vm2, %v3221_v18, 0.0  ;;  %1493 = vadd.xlane.f32.xlu1 %v1492_v19  ;;  %v792_v32 = vcombine.low %v769_v29, %v777_v24 }
 0x499   :  { %1502 = vadd.xlane.f32.xlu0 %v1501_v20 }
 0x49a   :  { %v800_v38 = vrot.slane %v792_v32, %v3049_v56 }
 0x49e   :  { %v3227_v21 = vpop.eup %2837 }
 0x49f   :  { %v1498_v22 = vsel %vm1072_vm2, %v3227_v21, 0.0 }
 0x4a0   :  { %1499 = vadd.xlane.f32.xlu1 %v1498_v22 }
 0x4b1   :  { %774 = vrot.lane.b32.xlu1 %v3038_v45, %s2903_s22  ;;  %v793_v45 = vcombine.high %v769_v29, %v777_v24  ;;  %v1471_v24 = vsub.f32 %v3193_v37, %v3237_v25 }
 0x4b5   :  { %778 = vrot.lane.b32.xlu1 %v3036_v44, %s2903_s22 }
 0x4b9   :  { %782 = vrot.lane.b32.xlu1 %v3042_v46, %s2903_s22  ;;  %v807_v46 = vrot.slane %v793_v45, %v3049_v56 }
 0x4c0   :  { %v1458_v26 = vpop.xlane.xlu1 %1457 }
 0x4c1   :  { %v1470_v27 = vsub.f32 %v1343_v52, %v1458_v26  ;;  %v1485_v26 = vmul.f32 1.442695, %v1471_v24 }
 0x4c3   :  { %v1483_v28 = vmul.f32 1.442695, %v1470_v27 }
 0x4c4   :  { %v1464_v30 = vpop.xlane.xlu1 %1463 }
 0x4c5   :  { %2839 = vpow2.f32 %v1483_v28  ;;  %v1472_v31 = vsub.f32 %v3202_v62, %v1464_v30 }
 0x4c7   :  { %v1487_v35 = vmul.f32 1.442695, %v1472_v31 }
 0x4c8   :  { %v781_v33 = vpop.permute.xlu1 %780 }
 0x4c9   :  { %v808_v34 = vcombine.low %v773_v23, %v781_v33  ;;  %v809_v44 = vcombine.high %v773_v23, %v781_v33  ;;  %2841 = vpow2.f32 %v1487_v35 }
 0x4ca   :  { %2843 = vpow2.f32 %v1485_v26 }
 0x4cb   :  { %v816_v39 = vrot.slane %v808_v34, %v3049_v56  ;;  %v823_v47 = vrot.slane %v809_v44, %v3049_v56 }
 0x4cd   :  { %v824_v48 = vcombine.low %v800_v38, %v816_v39  ;;  %v825_v49 = vcombine.high %v800_v38, %v816_v39  ;;  %v840_v50 = vcombine.low %v807_v46, %v823_v47  ;;  %v841_v53 = vcombine.high %v807_v46, %v823_v47 }
 0x4cf   :  { %v3244_v51 = vpop.eup %2839  ;;  %v832_v52 = vrot.slane %v824_v48, %v3059_v0  ;;  %v839_v54 = vrot.slane %v825_v49, %v3059_v0  ;;  %v848_v55 = vrot.slane %v840_v50, %v3059_v0  ;;  %v855_v57 = vrot.slane %v841_v53, %v3059_v0 }
 0x4d0   :  { %v1504_v62 = vsel %vm1072_vm2, %v3244_v51, 0.0 }
 0x4d1   :  { %v928_v63 = vcombine.low %v832_v52, %v839_v54  ;;  %v2548_v1 = vcombine.high %v832_v52, %v839_v54  ;;  %v944_v59 = vcombine.low %v848_v55, %v855_v57  ;;  %v2549_v60 = vcombine.high %v848_v55, %v855_v57  ;;  %1505 = vadd.xlane.f32.xlu0 %v1504_v62 }
 0x4d3   :  { %v935_v2 = vrot.slane %v928_v63, %v3049_v56  ;;  %v943_v42 = vrot.slane %v2548_v1, %v3049_v56  ;;  %v951_v41 = vrot.slane %v944_v59, %v3049_v56  ;;  %v959_v58 = vrot.slane %v2549_v60, %v3049_v56  ;;  %v3260_v9 = vpop.eup %2841 }
 0x4d4   :  { %v1510_v20 = vsel %vm1072_vm2, %v3260_v9, 0.0  ;;  %v3272_v27 = vpop.eup %2843 }
 0x4d5   :  { %v960_v61 = vcombine.low %v935_v2, %v943_v42  ;;  %v976_v3 = vcombine.low %v951_v41, %v959_v58  ;;  %v961_v4 = vcombine.high %v935_v2, %v943_v42  ;;  %v977_v7 = vcombine.high %v951_v41, %v959_v58 }
 0x4d6   :  { %v1507_v28 = vsel %vm1072_vm2, %v3272_v27, 0.0 }
 0x4d7   :  { %v968_v36 = vrot.slane %v960_v61, %v3059_v0  ;;  %v984_v8 = vrot.slane %v976_v3, %v3059_v0  ;;  %v975_v5 = vrot.slane %v961_v4, %v3059_v0  ;;  %v991_v6 = vrot.slane %v977_v7, %v3059_v0 }
 0x4d9   :  { %v992_v13 = vcombine.low %v968_v36, %v984_v8  ;;  %v993_v43 = vcombine.high %v968_v36, %v984_v8  ;;  %v994_v14 = vcombine.low %v975_v5, %v991_v6  ;;  %v995_v12 = vcombine.high %v975_v5, %v991_v6 }
 0x4db   :  { %v1064_v16 = vpack.c.bf16 %v992_v13, %v992_v13  ;;  %v1065_v19 = vpack.c.bf16 %v993_v43, %v993_v43  ;;  %v1066_v45 = vpack.c.bf16 %v994_v14, %v994_v14  ;;  %v1067_v38 = vpack.c.bf16 %v995_v12, %v995_v12 }
 0x4dd   :  { %1511 = vadd.xlane.f32.xlu1 %v1510_v20  ;;  %v1542_v22 = vsel %vm1540_vm3, %v1064_v16, 0  ;;  %v1588_v23 = vsel %vm1540_vm3, %v1065_v19, 0  ;;  %v1634_v25 = vsel %vm1540_vm3, %v1066_v45, 0  ;;  %v1680_v47 = vsel %vm1540_vm3, %v1067_v38, 0 }
 0x4de   :  { %2699 = vmatpush3.bf16.msra.mxu1 %v1542_v22  ;;  %2705 = vmatpush3.bf16.msra.mxu0 %v1588_v23 }
 0x4df   :  { %2710 = vmatprep.subr.bf16.mxu1 %v2895_v15  ;;  %2716 = vmatprep.subr.bf16.mxu0 %v2895_v15 }
 0x4e7   :  { %770 = vrot.lane.b32.xlu0 %v3019_v40, %s2903_s22 }
 0x506   :  { %1508 = vadd.xlane.f32.xlu0 %v1507_v28 }
 0x51d   :  { %v1491_v29 = vpop.xlane.xlu0 %1490 }
 0x51e   :  { %2845 = vrcp.f32 %v1491_v29 }
 0x521   :  { %v1497_v30 = vpop.xlane.xlu0 %1496 }
 0x522   :  { %2847 = vrcp.f32 %v1497_v30 }
 0x525   :  { %v1494_v31 = vpop.xlane.xlu1 %1493 }
 0x526   :  { %2849 = vrcp.f32 %v1494_v31  ;;  %v1503_v53 = vpop.xlane.xlu0 %1502 }
 0x528   :  { %v2846_v32 = vpop.eup %2845 }
 0x529   :  { %v1521_v40 = vmul.f32 %v2846_v32, %v3211_v10 }
 0x52b   :  { %v1529_v33 = vpack.c.bf16 %v1521_v40, %v1521_v40 }
 0x52c   :  { %v2848_v37 = vpop.eup %2847 }
 0x52d   :  { %2701 = vmatmul.mubr.msk.bf16.vlgmr.msra.gmra.mrb[12].mxu1 %vm1072_vm2, %v1529_v33  ;;  %v1500_v34 = vpop.xlane.xlu1 %1499  ;;  %v1523_v44 = vmul.f32 %v2848_v37, %v3215_v11 }
 0x52e   :  { %2711 = vmatpush3.bf16.msra.mxu1 %v1634_v25  ;;  %2851 = vrcp.f32 %v1500_v34  ;;  %2712 = vmatprep.mubr.msk.bf16.mxu1 %vm2896_vm1, %v2895_v15 }
 0x52f   :  { %2722 = vmatprep.subr.bf16.mxu1 %v2895_v15  ;;  %v1531_v39 = vpack.c.bf16 %v1523_v44, %v1523_v44  ;;  %2853 = vrcp.f32 %v1503_v53 }
 0x530   :  { %v2850_v35 = vpop.eup %2849 }
 0x531   :  { %v1522_v10 = vmul.f32 %v2850_v35, %v3219_v17  ;;  %v775_v49 = vpop.permute.xlu1 %774 }
 0x533   :  { %v1530_v46 = vpack.c.bf16 %v1522_v10, %v1522_v10 }
 0x535   :  { %2707 = vmatmul.mubr.msk.bf16.vlgmr.msra.gmra.mrb[24].mxu0 %vm1072_vm2, %v1530_v46  ;;  %2713 = vmatmul.mubr.msk.bf16.vlgmr.msra.gmra.mrb[16].mxu1 %vm1072_vm2, %v1531_v39  ;;  %v779_v50 = vpop.permute.xlu1 %778 }
 0x536   :  { %2717 = vmatpush3.bf16.msra.mxu0 %v1680_v47  ;;  %2718 = vmatprep.mubr.msk.bf16.mxu0 %vm2896_vm1, %v2895_v15 }
 0x537   :  { %2728 = vmatprep.subr.bf16.mxu0 %v2895_v15  ;;  %2724 = vmatprep.mubr.msk.bf16.mxu1 %vm2896_vm1, %v2895_v15 }
 0x538   :  { %v2852_v11 = vpop.eup %2851 }
 0x539   :  { %v1524_v17 = vmul.f32 %v2852_v11, %v3227_v21  ;;  %v783_v52 = vpop.permute.xlu1 %782  ;;  %v2854_v26 = vpop.eup %2853 }
 0x53a   :  { %v876_v55 = vcombine.low %v775_v49, %v783_v52  ;;  %v877_v57 = vcombine.high %v775_v49, %v783_v52  ;;  %v1525_v25 = vmul.f32 %v2854_v26, %v3221_v18 }
 0x53b   :  { %v1532_v48 = vpack.c.bf16 %v1524_v17, %v1524_v17 }
 0x53c   :  { %v884_v59 = vrot.slane %v876_v55, %v3049_v56  ;;  %v891_v21 = vrot.slane %v877_v57, %v3049_v56  ;;  %v1533_v47 = vpack.c.bf16 %v1525_v25, %v1525_v25 }
 0x53d   :  { %2719 = vmatmul.mubr.msk.bf16.vlgmr.msra.gmra.mrb[28].mxu0 %vm1072_vm2, %v1532_v48 }
 0x53e   :  { %2730 = vmatprep.mubr.msk.bf16.mxu0 %vm2896_vm1, %v2895_v15 }
 0x55e   :  { %v1506_v54 = vpop.xlane.xlu0 %1505 }
 0x55f   :  { %2855 = vrcp.f32 %v1506_v54 }
 0x562   :  { %v771_v62 = vpop.permute.xlu0 %770 }
 0x563   :  { %v860_v63 = vcombine.low %v771_v62, %v779_v50  ;;  %v861_v1 = vcombine.high %v771_v62, %v779_v50 }
 0x565   :  { %v868_v60 = vrot.slane %v860_v63, %v3049_v56  ;;  %v875_v2 = vrot.slane %v861_v1, %v3049_v56 }
 0x567   :  { %v892_v42 = vcombine.low %v868_v60, %v884_v59  ;;  %v893_v41 = vcombine.high %v868_v60, %v884_v59  ;;  %v908_v58 = vcombine.low %v875_v2, %v891_v21  ;;  %v909_v61 = vcombine.high %v875_v2, %v891_v21 }
 0x569   :  { %v900_v3 = vrot.slane %v892_v42, %v3059_v0  ;;  %v907_v4 = vrot.slane %v893_v41, %v3059_v0  ;;  %v916_v7 = vrot.slane %v908_v58, %v3059_v0  ;;  %v923_v36 = vrot.slane %v909_v61, %v3059_v0  ;;  %v2856_v32 = vpop.eup %2855 }
 0x56a   :  { %v1512_v19 = vpop.xlane.xlu1 %1511  ;;  %v1526_v34 = vmul.f32 %v2856_v32, %v3244_v51 }
 0x56b   :  { %v996_v8 = vcombine.low %v900_v3, %v907_v4  ;;  %v2550_v5 = vcombine.high %v900_v3, %v907_v4  ;;  %v1012_v6 = vcombine.low %v916_v7, %v923_v36  ;;  %v2551_v13 = vcombine.high %v916_v7, %v923_v36 }
 0x56c   :  { %2857 = vrcp.f32 %v1512_v19  ;;  %v1534_v11 = vpack.c.bf16 %v1526_v34, %v1526_v34 }
 0x56d   :  { %v1003_v43 = vrot.slane %v996_v8, %v3049_v56  ;;  %v1011_v14 = vrot.slane %v2550_v5, %v3049_v56  ;;  %v1019_v12 = vrot.slane %v1012_v6, %v3049_v56  ;;  %v1027_v16 = vrot.slane %v2551_v13, %v3049_v56 }
 0x56f   :  { %v1028_v20 = vcombine.low %v1003_v43, %v1011_v14  ;;  %v1044_v22 = vcombine.low %v1019_v12, %v1027_v16  ;;  %v1029_v23 = vcombine.high %v1003_v43, %v1011_v14  ;;  %v1045_v24 = vcombine.high %v1019_v12, %v1027_v16 }
 0x571   :  { %v1036_v28 = vrot.slane %v1028_v20, %v3059_v0  ;;  %v1052_v29 = vrot.slane %v1044_v22, %v3059_v0  ;;  %v1043_v30 = vrot.slane %v1029_v23, %v3059_v0  ;;  %v1059_v31 = vrot.slane %v1045_v24, %v3059_v0 }
 0x573   :  { %v1060_v40 = vcombine.low %v1036_v28, %v1052_v29  ;;  %v1061_v45 = vcombine.high %v1036_v28, %v1052_v29  ;;  %v1062_v33 = vcombine.low %v1043_v30, %v1059_v31  ;;  %v1063_v37 = vcombine.high %v1043_v30, %v1059_v31 }
 0x575   :  { %v1068_v44 = vpack.c.bf16 %v1060_v40, %v1060_v40  ;;  %v1069_v35 = vpack.c.bf16 %v1061_v45, %v1061_v45  ;;  %v1070_v46 = vpack.c.bf16 %v1062_v33, %v1062_v33  ;;  %v1071_v39 = vpack.c.bf16 %v1063_v37, %v1063_v37 }
 0x576   :  { %v2858_v17 = vpop.eup %2857 }
 0x577   :  { %v1726_v10 = vsel %vm1540_vm3, %v1068_v44, 0  ;;  %v1772_v38 = vsel %vm1540_vm3, %v1069_v35, 0  ;;  %v1818_v18 = vsel %vm1540_vm3, %v1070_v46, 0  ;;  %v1864_v51 = vsel %vm1540_vm3, %v1071_v39, 0 }
 0x578   :  { %2723 = vmatpush3.bf16.msra.mxu1 %v1726_v10  ;;  %2729 = vmatpush3.bf16.msra.mxu0 %v1772_v38  ;;  %v1528_v48 = vmul.f32 %v2858_v17, %v3260_v9 }
 0x579   :  { %2734 = vmatprep.subr.bf16.mxu1 %v2895_v15  ;;  %2740 = vmatprep.subr.bf16.mxu0 %v2895_v15 }
 0x57a   :  { %v1536_v49 = vpack.c.bf16 %v1528_v48, %v1528_v48 }
 0x57b   :  { %2725 = vmatmul.mubr.msk.bf16.vlgmr.msra.gmra.mrb[20].mxu1 %vm1072_vm2, %v1533_v47  ;;  %2731 = vmatmul.mubr.msk.bf16.vlgmr.msra.gmra.mrb[32].mxu0 %vm1072_vm2, %v1534_v11 }
 0x57c   :  { %2735 = vmatpush3.bf16.msra.mxu1 %v1818_v18  ;;  %2741 = vmatpush3.bf16.msra.mxu0 %v1864_v51 }
 0x57d   :  { %2742 = vmatprep.mubr.msk.bf16.mxu0 %vm2896_vm1, %v2895_v15  ;;  %2736 = vmatprep.mubr.msk.bf16.mxu1 %vm2896_vm1, %v2895_v15 }
 0x57e   :  { %2746 = vmatprep.subr.bf16.mxu1 %v2895_v15  ;;  %2754 = vmatprep.subr.bf16.mxu0 %v2895_v15 }
 0x583   :  { %2743 = vmatmul.mubr.msk.bf16.vlgmr.msra.gmra.mrb[36].mxu0 %vm1072_vm2, %v1536_v49 }
 0x584   :  { %2758 = vmatprep.mubr.msk.bf16.mxu0 %vm2896_vm1, %v2895_v15 }
 0x593   :  { %v1509_v50 = vpop.xlane.xlu0 %1508 }
 0x594   :  { %2859 = vrcp.f32 %v1509_v50 }
 0x59e   :  { %v2860_v53 = vpop.eup %2859 }
 0x59f   :  { %v1527_v9 = vmul.f32 %v2860_v53, %v3272_v27 }
 0x5a1   :  { %v1535_v52 = vpack.c.bf16 %v1527_v9, %v1527_v9 }
 0x5a3   :  { %2737 = vmatmul.mubr.msk.bf16.vlgmr.msra.gmra.mrb[24].mxu1 %vm1072_vm2, %v1535_v52 }
 0x5a4   :  { %2750 = vmatprep.mubr.msk.bf16.mxu1 %vm2896_vm1, %v2895_v15 }
 0x600   :  { %v1578_v54 = vpop.f32.mrb[12].mxu1 }
 0x601   :  { %v2702_v55 = vpop.f32.mrb[13].mxu1 }
 0x602   :  { %v1581_v57 = vpop.f32.mrb[14].mxu1 }
 0x603   :  { %v2703_v62 = vpop.f32.mrb[15].mxu1 }
 0x608   :  { %v1624_v63 = vpop.f32.mrb[24].mxu0  ;;  %v1670_v1 = vpop.f32.mrb[16].mxu1 }
 0x609   :  { %v1906_v59 = vcombine.low %v1578_v54, %v1670_v1  ;;  %v1907_v21 = vcombine.high %v1578_v54, %v1670_v1  ;;  %v2708_v60 = vpop.f32.mrb[25].mxu0  ;;  %v2714_v2 = vpop.f32.mrb[17].mxu1 }
 0x60a   :  { %v1627_v42 = vpop.f32.mrb[26].mxu0  ;;  %v1673_v41 = vpop.f32.mrb[18].mxu1 }
 0x60b   :  { %v2709_v58 = vpop.f32.mrb[27].mxu0  ;;  %v2715_v27 = vpop.f32.mrb[19].mxu1  ;;  %v1914_v8 = vrot.slane %v1906_v59, %v3049_v56  ;;  %v1921_v5 = vrot.slane %v1907_v21, %v3049_v56 }
 0x610   :  { %v1716_v61 = vpop.f32.mrb[28].mxu0 }
 0x611   :  { %v1922_v3 = vcombine.low %v1624_v63, %v1716_v61  ;;  %v1923_v4 = vcombine.high %v1624_v63, %v1716_v61  ;;  %v2720_v7 = vpop.f32.mrb[29].mxu0 }
 0x612   :  { %v1719_v36 = vpop.f32.mrb[30].mxu0 }
 0x613   :  { %v1930_v6 = vrot.slane %v1922_v3, %v3049_v56  ;;  %v1937_v13 = vrot.slane %v1923_v4, %v3049_v56  ;;  %v2721_v43 = vpop.f32.mrb[31].mxu0 }
 0x615   :  { %v1938_v14 = vcombine.low %v1914_v8, %v1930_v6  ;;  %v1939_v12 = vcombine.high %v1914_v8, %v1930_v6  ;;  %v1954_v16 = vcombine.low %v1921_v5, %v1937_v13  ;;  %v1955_v19 = vcombine.high %v1921_v5, %v1937_v13 }
 0x617   :  { %v1946_v20 = vrot.slane %v1938_v14, %v3059_v0  ;;  %v1953_v22 = vrot.slane %v1939_v12, %v3059_v0  ;;  %v1962_v23 = vrot.slane %v1954_v16, %v3059_v0  ;;  %v1969_v24 = vrot.slane %v1955_v19, %v3059_v0  ;;  %v2813_v19 = vld [vmem:[%s3495_s5] sm:$0xff]  }
 0x618   :  { %2747 = vmatpush3.bf16.msra.mxu1 %v2813_v19 }
 0x619   :  { %v2042_v26 = vcombine.low %v1946_v20, %v1953_v22  ;;  %v2568_v28 = vcombine.high %v1946_v20, %v1953_v22  ;;  %v2058_v29 = vcombine.low %v1962_v23, %v1969_v24  ;;  %v2569_v30 = vcombine.high %v1962_v23, %v1969_v24  ;;  %2748 = vmatprep.subr.bf16.mxu1 %v2895_v15 }
 0x61b   :  { %v2049_v31 = vrot.slane %v2042_v26, %v3049_v56  ;;  %v2057_v32 = vrot.slane %v2568_v28, %v3049_v56  ;;  %v2065_v40 = vrot.slane %v2058_v29, %v3049_v56  ;;  %v2073_v45 = vrot.slane %v2569_v30, %v3049_v56 }
 0x61d   :  { %v2075_v33 = vcombine.high %v2049_v31, %v2057_v32  ;;  %v2091_v37 = vcombine.high %v2065_v40, %v2073_v45  ;;  %v2074_v25 = vcombine.low %v2049_v31, %v2057_v32  ;;  %v2090_v34 = vcombine.low %v2065_v40, %v2073_v45  ;;  %v2814_v31 = vld [vmem:[%s3495_s5 + $0x8] sm:$0xff]   ;;  %s2905_s5 = smov 8  }
 0x61e   :  { %2749 = vmatpush3.bf16.msra.mxu1 %v2814_v31 }
 0x61f   :  { %v3349_v44 = vrot.slane %v2075_v33, %v3059_v0  ;;  %v3352_v35 = vrot.slane %v2091_v37, %v3059_v0  ;;  %v3355_v10 = vrot.slane %v2074_v25, %v3059_v0  ;;  %v3358_v38 = vrot.slane %v2090_v34, %v3059_v0  ;;  %2762 = vmatprep.subr.bf16.mxu1 %v2895_v15 }
 0x621   :  { %v2108_v46 = vcombine.low %v3349_v44, %v3352_v35  ;;  %v2106_v39 = vcombine.low %v3355_v10, %v3358_v38  ;;  %v2107_v47 = vcombine.high %v3355_v10, %v3358_v38  ;;  %v2109_v11 = vcombine.high %v3349_v44, %v3352_v35  ;;  %v2572_v10 = vld [vmem:[%s3496_s6] ss:$0 sm:$0xff] }
 0x64e   :  { %v1762_v17 = vpop.f32.mrb[20].mxu1  ;;  %v1808_v18 = vpop.f32.mrb[32].mxu0 }
 0x64f   :  { %v2726_v51 = vpop.f32.mrb[21].mxu1  ;;  %v2732_v48 = vpop.f32.mrb[33].mxu0 }
 0x650   :  { %v1765_v49 = vpop.f32.mrb[22].mxu1  ;;  %v1811_v50 = vpop.f32.mrb[34].mxu0 }
 0x651   :  { %v2727_v53 = vpop.f32.mrb[23].mxu1  ;;  %v2733_v9 = vpop.f32.mrb[35].mxu0 }
 0x656   :  { %v1900_v52 = vpop.f32.mrb[36].mxu0 }
 0x657   :  { %v1990_v54 = vcombine.low %v1808_v18, %v1900_v52  ;;  %v1991_v55 = vcombine.high %v1808_v18, %v1900_v52  ;;  %v2744_v57 = vpop.f32.mrb[37].mxu0 }
 0x658   :  { %v1903_v62 = vpop.f32.mrb[38].mxu0 }
 0x659   :  { %v2745_v63 = vpop.f32.mrb[39].mxu0  ;;  %v1998_v42 = vrot.slane %v1990_v54, %v3049_v56  ;;  %v2005_v41 = vrot.slane %v1991_v55, %v3049_v56 }
 0x676   :  { %v1854_v1 = vpop.f32.mrb[24].mxu1 }
 0x677   :  { %v1974_v59 = vcombine.low %v1762_v17, %v1854_v1  ;;  %v1975_v21 = vcombine.high %v1762_v17, %v1854_v1  ;;  %v2738_v60 = vpop.f32.mrb[25].mxu1 }
 0x678   :  { %v1857_v2 = vpop.f32.mrb[26].mxu1 }
 0x679   :  { %v1982_v58 = vrot.slane %v1974_v59, %v3049_v56  ;;  %v1989_v27 = vrot.slane %v1975_v21, %v3049_v56  ;;  %v2739_v61 = vpop.f32.mrb[27].mxu1  ;;  %v2869_v59 = vld [vmem:[%s3490_s0] sm:$0xff] }
 0x67b   :  { %v2006_v3 = vcombine.low %v1982_v58, %v1998_v42  ;;  %v2007_v4 = vcombine.high %v1982_v58, %v1998_v42  ;;  %v2022_v7 = vcombine.low %v1989_v27, %v2005_v41  ;;  %v2023_v36 = vcombine.high %v1989_v27, %v2005_v41  ;;  %v2870_v42 = vld [vmem:[%s3490_s0 + $0x8] sm:$0xff] }
 0x67d   :  { %v2014_v8 = vrot.slane %v2006_v3, %v3059_v0  ;;  %v2021_v5 = vrot.slane %v2007_v4, %v3059_v0  ;;  %v2030_v6 = vrot.slane %v2022_v7, %v3059_v0  ;;  %v2037_v13 = vrot.slane %v2023_v36, %v3059_v0 }
 0x67f   :  { %v2110_v43 = vcombine.low %v2014_v8, %v2021_v5  ;;  %v2570_v14 = vcombine.high %v2014_v8, %v2021_v5  ;;  %v2126_v12 = vcombine.low %v2030_v6, %v2037_v13  ;;  %v2571_v16 = vcombine.high %v2030_v6, %v2037_v13 }
 0x681   :  { %v2117_v20 = vrot.slane %v2110_v43, %v3049_v56  ;;  %v2125_v22 = vrot.slane %v2570_v14, %v3049_v56  ;;  %v2133_v23 = vrot.slane %v2126_v12, %v3049_v56  ;;  %v2141_v24 = vrot.slane %v2571_v16, %v3049_v56  ;;  %v2815_v14 = vld [vmem:[%s3499_s9] sm:$0xff]   ;;  %v2816_v12 = vld [vmem:[%s3499_s9 + $0x8] sm:$0xff]  }
 0x682   :  { %2755 = vmatpush3.bf16.msra.mxu0 %v2815_v14 }
 0x683   :  { %v2143_v26 = vcombine.high %v2117_v20, %v2125_v22  ;;  %v2159_v28 = vcombine.high %v2133_v23, %v2141_v24  ;;  %v2142_v29 = vcombine.low %v2117_v20, %v2125_v22  ;;  %v2158_v30 = vcombine.low %v2133_v23, %v2141_v24  ;;  %2756 = vmatprep.subr.bf16.mxu0 %v2895_v15 }
 0x685   :  { %v2157_v32 = vrot.slane %v2143_v26, %v3059_v0  ;;  %v2173_v40 = vrot.slane %v2159_v28, %v3059_v0  ;;  %v2150_v45 = vrot.slane %v2142_v29, %v3059_v0  ;;  %v2166_v33 = vrot.slane %v2158_v30, %v3059_v0  ;;  %v2576_v29 = vld [vmem:[%s3497_s7] ss:$0 sm:$0xff] }
 0x686   :  { %2757 = vmatpush3.bf16.msra.mxu0 %v2816_v12 }
 0x687   :  { %v2176_v56 = vcombine.low %v2157_v32, %v2173_v40  ;;  %v2175_v37 = vcombine.high %v2150_v45, %v2166_v33  ;;  %v2174_v25 = vcombine.low %v2150_v45, %v2166_v33  ;;  %v2177_v34 = vcombine.high %v2157_v32, %v2173_v40  ;;  %v2577_v40 = vld [vmem:[%s3498_s8] ss:$0 sm:$0xff] }
 0x689   :  { %v2801_v44 = vpack.i.bf16 %v2176_v56, %v2108_v46  ;;  %v2796_v35 = vpack.i.bf16 %v2175_v37, %v2107_v47  ;;  %v2806_v17 = vpack.i.bf16 %v2177_v34, %v2109_v11  ;;  %v2818_v34 = vld [vmem:[%s3501_s11 + $0x8] sm:$0xff]  }
 0x68b   :  { %2802 = vrot.lane.b32.xlu1 %v2801_v44, %s2904_s27  ;;  %2797 = vrot.lane.b32.xlu0 %v2796_v35, %s2905_s5  ;;  %v2819_v44 = vld [vmem:[%s3501_s11 + $0x10] sm:$0xff]   ;;  %v2820_v35 = vld [vmem:[%s3501_s11 + $0x18] sm:$0xff]  }
 0x68f   :  { %2807 = vrot.lane.b32.xlu0 %v2806_v17, %s2906_s28  ;;  %v2821_v17 = vld [vmem:[%s3501_s11 + $0x20] sm:$0xff]  }
 0x6fd   :  { %v2803_v18 = vpop.permute.xlu1 %2802  ;;  %v2798_v51 = vpop.permute.xlu0 %2797 }
 0x6fe   :  { %v2800_v0 = vunpack.i.h.bf16 %v2798_v51  ;;  %v2799_v48 = vunpack.i.l.bf16 %v2798_v51  ;;  %v2805_v49 = vunpack.i.h.bf16 %v2803_v18  ;;  %v2804_v50 = vunpack.i.l.bf16 %v2803_v18  ;;  %v2822_v18 = vld [vmem:[%s3501_s11 + $0x28] sm:$0xff]   ;;  %v2823_v51 = vld [vmem:[%s3501_s11 + $0x30] sm:$0xff]  }
 0x700   :  { %v2202_v46 = vsel %vm1072_vm2, %v2106_v39, %v2799_v48  ;;  %v2203_v47 = vsel %vm1072_vm2, %v2174_v25, %v2800_v0  ;;  %v2817_v25 = vld [vmem:[%s3501_s11] sm:$0xff]   ;;  %v2824_v0 = vld [vmem:[%s3501_s11 + $0x38] sm:$0xff]  }
 0x701   :  { %v2808_v11 = vpop.permute.xlu0 %2807  ;;  %v2205_v52 = vsel %vm2204_vm4, %v2202_v46, %v2804_v50  ;;  %v2206_v54 = vsel %vm2204_vm4, %v2203_v47, %v2805_v49  ;;  %v2578_v48 = vld [vmem:[%s3500_s10] ss:$0 sm:$0xff]  ;;  %s2907_s10 = smov [#allocation2]  }
 0x702   :  { %v2810_v53 = vunpack.i.h.bf16 %v2808_v11  ;;  %v2809_v9 = vunpack.i.l.bf16 %v2808_v11  ;;  %s2523_s6 = sshll.u32 %s2907_s10, 4  ;;  %s2524_s6 = int_to_ptr.vmem [resolvable:$true] %s2523_s6 }
 0x703   :  { %s2871_s17 = scalar_lea.vmem %s2524_s6, 256  ;;  %p2876_p1 = scmp.lt.s32.totalorder %s2524_s6, %s2524_s6 }
 0x704   :  { %v2208_v55 = vsel %vm2207_vm5, %v2205_v52, %v2809_v9  ;;  %v2209_v57 = vsel %vm2207_vm5, %v2206_v54, %v2810_v53  ;;  %p2872_p0 = scmp.ne.s32.totalorder %s2524_s6, %s2871_s17  ;;  %p2877_p2 = scmp.lt.s32.totalorder %s2871_s17, %s2871_s17 }
 0x705   :  { %v2210_v62 = vpack.c.bf16 %v2209_v57, %v2208_v55 }
 0x706   :  { %p2878_p3 = por %p2877_p2, %p2876_p1 }
 0x707   :  { %2751 = vmatmul.mubr.msk.bf16.vlgmr.msra.gmra.mrb[28].mxu1 %vm52_vm0, %v2210_v62 }
 0x708   :  { %2778 = vmatprep.mubr.msk.bf16.mxu1 %vm2896_vm1, %v2895_v15  ;;  %2763 = vmatpush3.bf16.msra.mxu1 %v2817_v25  ;;  %p2879_p4 = pnand %p2878_p3, %p2872_p0 }
 0x709   :  { %2764 = vmatprep.subr.bf16.mxu1 %v2895_v15 }
 0x70c   :  { %2765 = vmatpush3.bf16.msra.mxu1 %v2818_v34 }
 0x70d   :  { %2766 = vmatprep.subr.bf16.mxu1 %v2895_v15 }
 0x710   :  { %2767 = vmatpush3.bf16.msra.mxu1 %v2819_v44 }
 0x711   :  { %2768 = vmatprep.subr.bf16.mxu1 %v2895_v15 }
 0x714   :  { %2769 = vmatpush3.bf16.msra.mxu1 %v2820_v35 }
 0x715   :  { %2770 = vmatprep.subr.bf16.mxu1 %v2895_v15 }
 0x718   :  { %2771 = vmatpush3.bf16.msra.mxu1 %v2821_v17 }
 0x719   :  { %2772 = vmatprep.subr.bf16.mxu1 %v2895_v15 }
 0x71c   :  { %2773 = vmatpush3.bf16.msra.mxu1 %v2822_v18 }
 0x71d   :  { %2774 = vmatprep.subr.bf16.mxu1 %v2895_v15 }
 0x720   :  { %2775 = vmatpush3.bf16.msra.mxu1 %v2823_v51 }
 0x721   :  { %2776 = vmatprep.subr.bf16.mxu1 %v2895_v15 }
 0x724   :  { %2777 = vmatpush3.bf16.msra.mxu1 %v2824_v0 }
 0x7da   :  { %v2271_v38 = vpop.f32.mrb[28].mxu1 }
 0x7db   :  { %v2272_v39 = vadd.f32 %v2572_v10, %v2271_v38  ;;  %v2752_v63 = vpop.f32.mrb[29].mxu1  ;;  %v2583_v38 = vld [vmem:[%s3502_s12] ss:$0 sm:$0xff] }
 0x7dc   :  { %v2274_v1 = vpop.f32.mrb[30].mxu1 }
 0x7dd   :  { %v3407_v21 = vadd.f32 %v2869_v59, %v2272_v39  ;;  %v2275_v60 = vadd.f32 %v2572_v10, %v2274_v1  ;;  %v2753_v2 = vpop.f32.mrb[31].mxu1 }
 0x7df   :  { %v3412_v41 = vadd.f32 %v2870_v42, %v2275_v60  ;;  %v2282_v58 = vsel %vm52_vm0, %v3407_v21, 0.0 }
 0x7e0   :  { %2283 = vadd.xlane.f32.xlu1 %v2282_v58 }
 0x7e1   :  { %v2285_v27 = vsel %vm52_vm0, %v3412_v41, 0.0 }
 0x7e2   :  { %2286 = vadd.xlane.f32.xlu0 %v2285_v27 }
 0x86d   :  { %v2284_v61 = vpop.xlane.xlu1 %2283 }
 0x86e   :  { %v2288_v3 = vmul.f32 0.03125, %v2284_v61 }
 0x86f   :  { %v2287_v4 = vpop.xlane.xlu0 %2286 }
 0x870   :  { %v2290_v7 = vsub.f32 %v3407_v21, %v2288_v3  ;;  %v2289_v36 = vmul.f32 0.03125, %v2287_v4 }
 0x872   :  { %v2291_v8 = vsub.f32 %v3412_v41, %v2289_v36  ;;  %v2292_v5 = vmul.f32 %v2290_v7, %v2290_v7 }
 0x874   :  { %v2294_v6 = vsel %vm52_vm0, %v2292_v5, 0.0  ;;  %v2293_v13 = vmul.f32 %v2291_v8, %v2291_v8 }
 0x875   :  { %2295 = vadd.xlane.f32.xlu0 %v2294_v6 }
 0x876   :  { %v2297_v43 = vsel %vm52_vm0, %v2293_v13, 0.0 }
 0x879   :  { %2298 = vadd.xlane.f32.xlu0 %v2297_v43 }
 0x902   :  { %v2296_v16 = vpop.xlane.xlu0 %2295 }
 0x903   :  { %v2300_v19 = vmul.f32 0.03125, %v2296_v16 }
 0x905   :  { %v2302_v20 = vadd.f32 1e-05, %v2300_v19 }
 0x906   :  { %v2299_v22 = vpop.xlane.xlu0 %2298 }
 0x907   :  { %2861 = vrsqrt.f32 %v2302_v20  ;;  %v2301_v23 = vmul.f32 0.03125, %v2299_v22 }
 0x909   :  { %v2303_v24 = vadd.f32 1e-05, %v2301_v23 }
 0x90b   :  { %2863 = vrsqrt.f32 %v2303_v24 }
 0x911   :  { %v2862_v26 = vpop.eup %2861 }
 0x912   :  { %v2306_v28 = vmul.f32 %v2862_v26, %v2290_v7 }
 0x914   :  { %v2314_v31 = vmul.f32 %v2576_v29, %v2306_v28 }
 0x915   :  { %v2864_v30 = vpop.eup %2863 }
 0x916   :  { %v2307_v32 = vmul.f32 %v2864_v30, %v2291_v8  ;;  %v2322_v33 = vadd.f32 %v2577_v40, %v2314_v31 }
 0x918   :  { %v2315_v45 = vmul.f32 %v2576_v29, %v2307_v32 }
 0x91a   :  { %v2323_v56 = vadd.f32 %v2577_v40, %v2315_v45 }
 0x91c   :  { %v2324_v37 = vpack.c.bf16 %v2323_v56, %v2322_v33 }
 0x91e   :  { %2759 = vmatmul.mubr.msk.bf16.vlgmr.msra.gmra.mrb[40].mxu0 %vm52_vm0, %v2324_v37 }
 0x9f1   :  { %v2385_v49 = vpop.f32.mrb[40].mxu0 }
 0x9f2   :  { %v2760_v50 = vpop.f32.mrb[41].mxu0  ;;  %v2386_v47 = vadd.f32 %v2578_v48, %v2385_v49 }
 0x9f3   :  { %v2388_v46 = vpop.f32.mrb[42].mxu0 }
 0x9f4   :  { %v2389_v11 = vadd.f32 %v2578_v48, %v2388_v46  ;;  %v2761_v53 = vpop.f32.mrb[43].mxu0 }
 0x9f6   :  { %v2392_v9 = vpack.c.bf16 %v2389_v11, %v2386_v47 }
 0x9f8   :  { %v2582_v52 = vmul.bf16 3218784218, %v2392_v9 }
 0x9fa   :  { %v2396_v54 = vmul.bf16 1069105081, %v2582_v52 }
 0x9fc   :  { %2865 = vpow.bf16 %v2396_v54 }
 0xa07   :  { %v2866_v15 = vpop.eup %2865 }
 0xa08   :  { %v2398_v55 = vadd.bf16 1065369472, %v2866_v15 }
 0xa0a   :  { %2867 = vrcp.bf16 %v2398_v55 }
 0xa15   :  { %v2868_v57 = vpop.eup %2867 }
 0xa16   :  { %v2400_v62 = vmul.bf16 1065369472, %v2868_v57 }
 0xa18   :  { %v2401_v10 = vmul.bf16 %v2400_v62, %v2392_v9 }
 0xa1a   :  { %2779 = vmatmul.mubr.bf16.vlgmr.msra.gmra.mrb[32].mxu1 %v2401_v10 }
 0xaed   :  { %v2507_v39 = vpop.f32.mrb[32].mxu1 }
 0xaee   :  { %v2508_v63 = vadd.f32 %v2583_v38, %v2507_v39  ;;  %v2780_v1 = vpop.f32.mrb[33].mxu1 }
 0xaef   :  { %v2510_v59 = vpop.f32.mrb[34].mxu1 }
 0xaf0   :  { %v2514_v60 = vadd.f32 %v2508_v63, %v3407_v21  ;;  %v2511_v2 = vadd.f32 %v2583_v38, %v2510_v59  ;;  %v2781_v42 = vpop.f32.mrb[35].mxu1 }
 0xaf2   :  { %2516 = vst.msk [vmem:[#allocation2] sm:$0xff] %vm52_vm0, %v2514_v60  ;;  %v2515_v58 = vadd.f32 %v2511_v2, %v3412_v41 }
 0xaf4   :  { %2517 = vst.msk [vmem:[#allocation2 + $0x8] sm:$0xff] %vm52_vm0, %v2515_v58 }
 0xaf5   :  { %2882 = shalt.err (!%p2879_p4)
}
 0xaf6   :  { %s2883_s19 = scalar_lea.hbm %s3503_s13, 256 }
 0xaf7   :  { %p2884_p5 = scmp.ne.s32.totalorder %s3503_s13, %s2883_s19  ;;  %p2887_p6 = scmp.lt.u32.totalorder %s2883_s19, %s3503_s13 }
 0xaf9   :  { %p2889_p7 = pnand %p2887_p6, %p2884_p5 }
 0xafb   :  { %2892 = shalt.err (!%p2889_p7)
}
 0xafc   :  { %s2908_s21 = smov 128  }
 0xafd   :  { %2529 = dma.vmem_to_hbm [thread:$0]  %s2524_s6, 256, %s3503_s13, [#allocation3], %s2908_s21, %s2908_s21, %s2905_s5  }
 0xafe   :  { %2893 = dma.done.wait [#allocation3], 256  }
 0xaff   :  { %2894 = vsyncadd [#allocation3], 4294967040 }
 0xb00   :  { %2533 = vsyncpa [#allocation3], 1 }

</bundles_post_ra>
